<compile_context>
chip_gen: v6e
topology: v6e:2x2x1
jax: 0.10.0
libtpu: 0.0.40
codegen_flags: <defaults>
</compile_context>

<pallas_src>
import jax
import jax.numpy as jnp
from jax.experimental import pallas as pl
from jax.experimental.pallas import tpu as pltpu


C_IN_REAL, C_IN_PAD, C_MID, N_CLASS = 3, 8, 64, 10


# ----------------------------------------------------------------------------
# In-kernel helpers
# ----------------------------------------------------------------------------

def _maxpool2x2(x_hwc, buf):
    """Vectorized MaxPool2d(2,2) of an (H, W, C) value, staged through a VMEM scratch.

    W-pairs are reduced with two sublane-strided loads (native strided vld);
    H-pairs with a leading-dim split.  No per-pixel loads/stores, no masked stores.
    """
    Hh, Ww, C = x_hwc.shape
    Ho, Wo = Hh // 2, Ww // 2
    buf[0:Hh, 0:Ww, :] = x_hwc
    wmax = jnp.maximum(buf[0:Hh, pl.ds(0, Wo, stride=2), :],
                       buf[0:Hh, pl.ds(1, Wo, stride=2), :])        # (Hh, Wo, C)
    t = wmax.reshape(Ho, 2, Wo, C)                                   # leading-dim split
    return jnp.maximum(t[:, 0], t[:, 1])                             # (Ho, Wo, C)


def _make_fused_kernel(H, W, C1, CM):
    """One grid step == the full forward pass for one image."""
    H2, W2 = H // 2, W // 2
    H4, W4 = H2 // 2, W2 // 2
    inv_gap = 1.0 / float(H4 * W4)

    def kernel(x_ref, noise_ref,
               s1_ref, t1_ref, w1_ref, b1_ref,
               s2_ref, t2_ref, w2_ref, b2_ref,
               s3_ref, t3_ref, w3_ref, b3_ref,
               wfc_ref, bfc_ref,
               o_ref,
               pbuf1, pbuf2, mpbuf):
        # ---- noise + clamp + BN1 (folded) + LeakyReLU(0.1) ----
        x = jnp.clip(x_ref[0] + 0.15 * noise_ref[0], 0.0, 1.0)       # (H, W, C1)
        a1 = x * s1_ref[...] + t1_ref[...]
        a1 = jnp.where(a1 > 0, a1, 0.1 * a1)

        # ---- Conv2d(C1->CM, 3x3, pad 1): zero-padded scratch + 9 shifted matmuls ----
        pbuf1[...] = jnp.zeros_like(pbuf1)
        pbuf1[1:H + 1, 1:W + 1, :] = a1
        acc1 = jnp.zeros((H * W, CM), jnp.float32)
        for kh in range(3):
            for kw in range(3):
                patch = pbuf1[kh:kh + H, kw:kw + W, :].reshape(H * W, C1)
                acc1 = acc1 + jnp.dot(patch, w1_ref[kh, kw],
                                      preferred_element_type=jnp.float32)
        h1 = (acc1 + b1_ref[...]).reshape(H, W, CM)

        # ---- MaxPool2x2 (Dropout2d(0.3) is identity in eval mode) ----
        p1 = _maxpool2x2(h1, mpbuf)                                   # (H2, W2, CM)

        # ---- BN2 + LeakyReLU + Conv2d(CM->CM, 3x3, pad 1) ----
        a2 = p1 * s2_ref[...] + t2_ref[...]
        a2 = jnp.where(a2 > 0, a2, 0.1 * a2)
        pbuf2[...] = jnp.zeros_like(pbuf2)
        pbuf2[1:H2 + 1, 1:W2 + 1, :] = a2
        acc2 = jnp.zeros((H2 * W2, CM), jnp.float32)
        for kh in range(3):
            for kw in range(3):
                patch = pbuf2[kh:kh + H2, kw:kw + W2, :].reshape(H2 * W2, CM)
                acc2 = acc2 + jnp.dot(patch, w2_ref[kh, kw],
                                      preferred_element_type=jnp.float32)
        h2 = (acc2 + b2_ref[...]).reshape(H2, W2, CM)

        # ---- MaxPool2x2 (Dropout2d identity) ----
        p2 = _maxpool2x2(h2, mpbuf).reshape(H4 * W4, CM)              # (H4*W4, CM)

        # ---- BN3 + LeakyReLU + Conv2d(CM->CM, 1x1): a single matmul ----
        a3 = p2 * s3_ref[...] + t3_ref[...]
        a3 = jnp.where(a3 > 0, a3, 0.1 * a3)
        h3 = jnp.dot(a3, w3_ref[...],
                     preferred_element_type=jnp.float32) + b3_ref[...]  # (H4*W4, CM)

        # ---- AdaptiveAvgPool2d((1,1)) + Flatten + Linear(CM -> nclass) ----
        pooled = jnp.sum(h3, axis=0, keepdims=True) * inv_gap           # (1, CM)
        logits = jnp.dot(pooled, wfc_ref[...],
                         preferred_element_type=jnp.float32) + bfc_ref[...]
        o_ref[0] = logits                                                # (1, nclass)

    return kernel


# ----------------------------------------------------------------------------
# Parameters (deterministic, synthetic) and forward glue
# ----------------------------------------------------------------------------

def init_params(key):
    ks = jax.random.split(key, 11)

    def bn_fold(k, C):
        kg, kb, km, kv = jax.random.split(k, 4)
        gamma = 1.0 + 0.1 * jax.random.normal(kg, (C,), jnp.float32)
        beta = 0.1 * jax.random.normal(kb, (C,), jnp.float32)
        rmean = 0.05 * jax.random.normal(km, (C,), jnp.float32)
        rvar = 1.0 + 0.1 * jax.random.uniform(kv, (C,), jnp.float32)
        scale = gamma * jax.lax.rsqrt(rvar + 1e-5)
        shift = beta - rmean * scale
        return scale, shift

    def conv_w(k, kh, kw, cin_real, cin_pad, cout):
        w = 0.1 * jax.random.normal(k, (cout, cin_real, kh, kw), jnp.float32)  # OIHW
        w = jnp.transpose(w, (2, 3, 1, 0))                                     # HWIO
        if cin_pad > cin_real:
            w = jnp.pad(w, ((0, 0), (0, 0), (0, cin_pad - cin_real), (0, 0)))
        return w

    s1, t1 = bn_fold(ks[0], C_IN_REAL)
    s1 = jnp.pad(s1, (0, C_IN_PAD - C_IN_REAL))
    t1 = jnp.pad(t1, (0, C_IN_PAD - C_IN_REAL))
    s2, t2 = bn_fold(ks[1], C_MID)
    s3, t3 = bn_fold(ks[2], C_MID)

    w1 = conv_w(ks[3], 3, 3, C_IN_REAL, C_IN_PAD, C_MID)
    b1 = 0.05 * jax.random.normal(ks[4], (C_MID,), jnp.float32)
    w2 = conv_w(ks[5], 3, 3, C_MID, C_MID, C_MID)
    b2 = 0.05 * jax.random.normal(ks[6], (C_MID,), jnp.float32)
    w3 = conv_w(ks[7], 1, 1, C_MID, C_MID, C_MID)
    b3 = 0.05 * jax.random.normal(ks[8], (C_MID,), jnp.float32)

    wfc = 0.1 * jax.random.normal(ks[9], (N_CLASS, C_MID), jnp.float32)  # torch (out,in)
    bfc = 0.05 * jax.random.normal(ks[10], (N_CLASS,), jnp.float32)

    return dict(bn1_scale=s1, bn1_shift=t1, w1=w1, b1=b1,
                bn2_scale=s2, bn2_shift=t2, w2=w2, b2=b2,
                bn3_scale=s3, bn3_shift=t3, w3=w3, b3=b3,
                wfc=jnp.transpose(wfc), bfc=bfc)           # wfc -> (C_MID, N_CLASS)


def cifar_cnn0_forward(x_nchw, params, noise_key):
    N, C, H, W = x_nchw.shape
    assert C == C_IN_REAL and H % 4 == 0 and W % 4 == 0

    # NCHW -> NHWC, zero-pad channels 3 -> 8 (zeroed weights/BN => no effect)
    x = jnp.transpose(x_nchw, (0, 2, 3, 1)).astype(jnp.float32)
    noise = jax.random.normal(noise_key, x.shape, jnp.float32)   # stands in for torch.randn
    pad_c = C_IN_PAD - C
    x = jnp.pad(x, ((0, 0), (0, 0), (0, 0), (0, pad_c)))
    noise = jnp.pad(noise, ((0, 0), (0, 0), (0, 0), (0, pad_c)))

    bcast2 = lambda n: (0, 0)
    in_specs = [
        pl.BlockSpec((1, H, W, C_IN_PAD), lambda n: (n, 0, 0, 0)),     # x
        pl.BlockSpec((1, H, W, C_IN_PAD), lambda n: (n, 0, 0, 0)),     # noise
        pl.BlockSpec((1, C_IN_PAD), bcast2),                           # bn1 scale
        pl.BlockSpec((1, C_IN_PAD), bcast2),                           # bn1 shift
        pl.BlockSpec((3, 3, C_IN_PAD, C_MID), lambda n: (0, 0, 0, 0)), # w1 (HWIO)
        pl.BlockSpec((1, C_MID), bcast2),                              # b1
        pl.BlockSpec((1, C_MID), bcast2),                              # bn2 scale
        pl.BlockSpec((1, C_MID), bcast2),                              # bn2 shift
        pl.BlockSpec((3, 3, C_MID, C_MID), lambda n: (0, 0, 0, 0)),    # w2 (HWIO)
        pl.BlockSpec((1, C_MID), bcast2),                              # b2
        pl.BlockSpec((1, C_MID), bcast2),                              # bn3 scale
        pl.BlockSpec((1, C_MID), bcast2),                              # bn3 shift
        pl.BlockSpec((C_MID, C_MID), bcast2),                          # w3
        pl.BlockSpec((1, C_MID), bcast2),                              # b3
        pl.BlockSpec((C_MID, N_CLASS), bcast2),                        # wfc
        pl.BlockSpec((1, N_CLASS), bcast2),                            # bfc
    ]

    out = pl.pallas_call(
        _make_fused_kernel(H, W, C_IN_PAD, C_MID),
        out_shape=jax.ShapeDtypeStruct((N, 1, N_CLASS), jnp.float32),
        grid_spec=pltpu.PrefetchScalarGridSpec(
            num_scalar_prefetch=0,
            grid=(N,),                                   # one fused step per image
            in_specs=in_specs,
            out_specs=pl.BlockSpec((1, 1, N_CLASS), lambda n: (n, 0, 0)),
            scratch_shapes=[
                pltpu.VMEM((H + 2, W + 2, C_IN_PAD), jnp.float32),           # conv1 pad buffer
                pltpu.VMEM((H // 2 + 2, W // 2 + 2, C_MID), jnp.float32),    # conv2 pad buffer
                pltpu.VMEM((H, W, C_MID), jnp.float32),                      # maxpool staging
            ],
        ),
        compiler_params=pltpu.CompilerParams(
            dimension_semantics=("parallel",)),          # v7x: split batch over 2 TCs
    )(
        x, noise,
        params["bn1_scale"].reshape(1, C_IN_PAD),
        params["bn1_shift"].reshape(1, C_IN_PAD),
        params["w1"],
        params["b1"].reshape(1, C_MID),
        params["bn2_scale"].reshape(1, C_MID),
        params["bn2_shift"].reshape(1, C_MID),
        params["w2"],
        params["b2"].reshape(1, C_MID),
        params["bn3_scale"].reshape(1, C_MID),
        params["bn3_shift"].reshape(1, C_MID),
        params["w3"].reshape(C_MID, C_MID),
        params["b3"].reshape(1, C_MID),
        params["wfc"],
        params["bfc"].reshape(1, N_CLASS),
    )
    return out.reshape(N, N_CLASS)


if __name__ == "__main__":
    key = jax.random.PRNGKey(0)
    k_in, k_noise, k_params = jax.random.split(key, 3)

    N, C, H, W = 2, 3, 16, 16          # small CIFAR-like input (NCHW)
    x = jax.random.uniform(k_in, (N, C, H, W), jnp.float32)
    params = init_params(k_params)

    fwd = jax.jit(cifar_cnn0_forward)
    out = fwd(x, params, k_noise)
    out = jax.block_until_ready(out)
    assert out.shape == (N, N_CLASS) and out.dtype == jnp.float32
    assert bool(jnp.all(jnp.isfinite(out)))
    print("KERNEL_OK")
</pallas_src>

<mosaic_0001>
module attributes {stable_mosaic.version = 11 : i64} {
  func.func @kernel(%arg0: i32, %arg1: memref<1x16x16x8xf32, #tpu.memory_space<vmem>>, %arg2: memref<1x16x16x8xf32, #tpu.memory_space<vmem>>, %arg3: memref<1x8xf32, #tpu.memory_space<vmem>>, %arg4: memref<1x8xf32, #tpu.memory_space<vmem>>, %arg5: memref<3x3x8x64xf32, #tpu.memory_space<vmem>>, %arg6: memref<1x64xf32, #tpu.memory_space<vmem>>, %arg7: memref<1x64xf32, #tpu.memory_space<vmem>>, %arg8: memref<1x64xf32, #tpu.memory_space<vmem>>, %arg9: memref<3x3x64x64xf32, #tpu.memory_space<vmem>>, %arg10: memref<1x64xf32, #tpu.memory_space<vmem>>, %arg11: memref<1x64xf32, #tpu.memory_space<vmem>>, %arg12: memref<1x64xf32, #tpu.memory_space<vmem>>, %arg13: memref<64x64xf32, #tpu.memory_space<vmem>>, %arg14: memref<1x64xf32, #tpu.memory_space<vmem>>, %arg15: memref<64x10xf32, #tpu.memory_space<vmem>>, %arg16: memref<1x10xf32, #tpu.memory_space<vmem>>, %arg17: memref<1x1x10xf32, #tpu.memory_space<vmem>>, %arg18: memref<18x18x8xf32, #tpu.memory_space<vmem>>, %arg19: memref<10x10x64xf32, #tpu.memory_space<vmem>>, %arg20: memref<16x16x64xf32, #tpu.memory_space<vmem>>) attributes {dimension_semantics = [#tpu.dimension_semantics<parallel>], iteration_bounds = array<i64: 2>, scalar_prefetch = 0 : i64, scratch_operands = 3 : i64, tpu.core_type = #tpu.core_type<tc>, window_params = [{transform_indices = @transform_0, window_bounds = array<i64: 1, 16, 16, 8>}, {transform_indices = @transform_1, window_bounds = array<i64: 1, 16, 16, 8>}, {pipeline_mode = #tpu.pipeline_mode<synchronous>, transform_indices = @transform_2, window_bounds = array<i64: 1, 8>}, {pipeline_mode = #tpu.pipeline_mode<synchronous>, transform_indices = @transform_3, window_bounds = array<i64: 1, 8>}, {pipeline_mode = #tpu.pipeline_mode<synchronous>, transform_indices = @transform_4, window_bounds = array<i64: 3, 3, 8, 64>}, {pipeline_mode = #tpu.pipeline_mode<synchronous>, transform_indices = @transform_5, window_bounds = array<i64: 1, 64>}, {pipeline_mode = #tpu.pipeline_mode<synchronous>, transform_indices = @transform_6, window_bounds = array<i64: 1, 64>}, {pipeline_mode = #tpu.pipeline_mode<synchronous>, transform_indices = @transform_7, window_bounds = array<i64: 1, 64>}, {pipeline_mode = #tpu.pipeline_mode<synchronous>, transform_indices = @transform_8, window_bounds = array<i64: 3, 3, 64, 64>}, {pipeline_mode = #tpu.pipeline_mode<synchronous>, transform_indices = @transform_9, window_bounds = array<i64: 1, 64>}, {pipeline_mode = #tpu.pipeline_mode<synchronous>, transform_indices = @transform_10, window_bounds = array<i64: 1, 64>}, {pipeline_mode = #tpu.pipeline_mode<synchronous>, transform_indices = @transform_11, window_bounds = array<i64: 1, 64>}, {pipeline_mode = #tpu.pipeline_mode<synchronous>, transform_indices = @transform_12, window_bounds = array<i64: 64, 64>}, {pipeline_mode = #tpu.pipeline_mode<synchronous>, transform_indices = @transform_13, window_bounds = array<i64: 1, 64>}, {pipeline_mode = #tpu.pipeline_mode<synchronous>, transform_indices = @transform_14, window_bounds = array<i64: 64, 10>}, {pipeline_mode = #tpu.pipeline_mode<synchronous>, transform_indices = @transform_15, window_bounds = array<i64: 1, 10>}, {transform_indices = @transform_16, window_bounds = array<i64: 1, 1, 10>}]} {
    %c0 = arith.constant 0 : index
    %c0_0 = arith.constant 0 : index
    %c0_1 = arith.constant 0 : index
    %c0_2 = arith.constant 0 : index
    %0 = vector.load %arg1[%c0, %c0_0, %c0_1, %c0_2] : memref<1x16x16x8xf32, #tpu.memory_space<vmem>>, vector<1x16x16x8xf32>
    %1 = vector.shape_cast %0 : vector<1x16x16x8xf32> to vector<16x16x8xf32>
    %c0_3 = arith.constant 0 : index
    %c0_4 = arith.constant 0 : index
    %c0_5 = arith.constant 0 : index
    %c0_6 = arith.constant 0 : index
    %2 = vector.load %arg2[%c0_3, %c0_4, %c0_5, %c0_6] : memref<1x16x16x8xf32, #tpu.memory_space<vmem>>, vector<1x16x16x8xf32>
    %3 = vector.shape_cast %2 : vector<1x16x16x8xf32> to vector<16x16x8xf32>
    %cst = arith.constant 1.500000e-01 : f32
    %4 = vector.broadcast %cst : f32 to vector<16x16x8xf32>
    %5 = arith.mulf %4, %3 : vector<16x16x8xf32>
    %6 = arith.addf %1, %5 : vector<16x16x8xf32>
    %cst_7 = arith.constant 0.000000e+00 : f32
    %cst_8 = arith.constant 1.000000e+00 : f32
    %7 = vector.broadcast %cst_7 : f32 to vector<16x16x8xf32>
    %8 = arith.maximumf %7, %6 : vector<16x16x8xf32>
    %9 = vector.broadcast %cst_8 : f32 to vector<16x16x8xf32>
    %10 = arith.minimumf %9, %8 : vector<16x16x8xf32>
    %c0_9 = arith.constant 0 : index
    %c0_10 = arith.constant 0 : index
    %11 = vector.load %arg3[%c0_9, %c0_10] : memref<1x8xf32, #tpu.memory_space<vmem>>, vector<1x8xf32>
    %12 = vector.shape_cast %11 : vector<1x8xf32> to vector<1x1x8xf32>
    %13 = vector.broadcast %12 : vector<1x1x8xf32> to vector<16x16x8xf32>
    %14 = arith.mulf %10, %13 : vector<16x16x8xf32>
    %c0_11 = arith.constant 0 : index
    %c0_12 = arith.constant 0 : index
    %15 = vector.load %arg4[%c0_11, %c0_12] : memref<1x8xf32, #tpu.memory_space<vmem>>, vector<1x8xf32>
    %16 = vector.shape_cast %15 : vector<1x8xf32> to vector<1x1x8xf32>
    %17 = vector.broadcast %16 : vector<1x1x8xf32> to vector<16x16x8xf32>
    %18 = arith.addf %14, %17 : vector<16x16x8xf32>
    %cst_13 = arith.constant 0.000000e+00 : f32
    %19 = vector.broadcast %cst_13 : f32 to vector<16x16x8xf32>
    %20 = arith.cmpf ogt, %18, %19 : vector<16x16x8xf32>
    %cst_14 = arith.constant 1.000000e-01 : f32
    %21 = vector.broadcast %cst_14 : f32 to vector<16x16x8xf32>
    %22 = arith.mulf %21, %18 : vector<16x16x8xf32>
    %23 = arith.select %20, %18, %22 : vector<16x16x8xi1>, vector<16x16x8xf32>
    %cst_15 = arith.constant 0.000000e+00 : f32
    %24 = vector.broadcast %cst_15 : f32 to vector<18x18x8xf32>
    %c0_16 = arith.constant 0 : index
    %c0_17 = arith.constant 0 : index
    %c0_18 = arith.constant 0 : index
    %25 = vector.load %arg18[%c0_16, %c0_17, %c0_18] : memref<18x18x8xf32, #tpu.memory_space<vmem>>, vector<18x18x8xf32>
    tpu.vector_store %arg18[%c0_16, %c0_17, %c0_18], %24 {strides = array<i32>} : memref<18x18x8xf32, #tpu.memory_space<vmem>>, vector<18x18x8xf32>,
    %c1 = arith.constant 1 : index
    %c1_19 = arith.constant 1 : index
    %c0_20 = arith.constant 0 : index
    %26 = vector.load %arg18[%c1, %c1_19, %c0_20] : memref<18x18x8xf32, #tpu.memory_space<vmem>>, vector<16x16x8xf32>
    tpu.vector_store %arg18[%c1, %c1_19, %c0_20], %23 {strides = array<i32>} : memref<18x18x8xf32, #tpu.memory_space<vmem>>, vector<16x16x8xf32>,
    %cst_21 = arith.constant 0.000000e+00 : f32
    %27 = vector.broadcast %cst_21 : f32 to vector<256x64xf32>
    %c0_22 = arith.constant 0 : index
    %c0_23 = arith.constant 0 : index
    %c0_24 = arith.constant 0 : index
    %28 = vector.load %arg18[%c0_22, %c0_23, %c0_24] : memref<18x18x8xf32, #tpu.memory_space<vmem>>, vector<16x16x8xf32>
    %29 = vector.shape_cast %28 : vector<16x16x8xf32> to vector<256x8xf32>
    %c0_25 = arith.constant 0 : index
    %c0_26 = arith.constant 0 : index
    %c0_27 = arith.constant 0 : index
    %c0_28 = arith.constant 0 : index
    %30 = vector.load %arg5[%c0_25, %c0_26, %c0_27, %c0_28] : memref<3x3x8x64xf32, #tpu.memory_space<vmem>>, vector<1x1x8x64xf32>
    %31 = vector.shape_cast %30 : vector<1x1x8x64xf32> to vector<8x64xf32>
    %cst_29 = arith.constant dense<0.000000e+00> : vector<256x64xf32>
    %32 = tpu.matmul %29, %31, %cst_29 {dimension_numbers = #tpu.dot_dimension_numbers<[1], [0], [0], [1], [0, 0, 1, 1], [], []>} : vector<256x8xf32>, vector<8x64xf32>, vector<256x64xf32> -> vector<256x64xf32>
    %33 = arith.addf %27, %32 : vector<256x64xf32>
    %c0_30 = arith.constant 0 : index
    %c1_31 = arith.constant 1 : index
    %c0_32 = arith.constant 0 : index
    %34 = vector.load %arg18[%c0_30, %c1_31, %c0_32] : memref<18x18x8xf32, #tpu.memory_space<vmem>>, vector<16x16x8xf32>
    %35 = vector.shape_cast %34 : vector<16x16x8xf32> to vector<256x8xf32>
    %c0_33 = arith.constant 0 : index
    %c1_34 = arith.constant 1 : index
    %c0_35 = arith.constant 0 : index
    %c0_36 = arith.constant 0 : index
    %36 = vector.load %arg5[%c0_33, %c1_34, %c0_35, %c0_36] : memref<3x3x8x64xf32, #tpu.memory_space<vmem>>, vector<1x1x8x64xf32>
    %37 = vector.shape_cast %36 : vector<1x1x8x64xf32> to vector<8x64xf32>
    %cst_37 = arith.constant dense<0.000000e+00> : vector<256x64xf32>
    %38 = tpu.matmul %35, %37, %cst_37 {dimension_numbers = #tpu.dot_dimension_numbers<[1], [0], [0], [1], [0, 0, 1, 1], [], []>} : vector<256x8xf32>, vector<8x64xf32>, vector<256x64xf32> -> vector<256x64xf32>
    %39 = arith.addf %33, %38 : vector<256x64xf32>
    %c0_38 = arith.constant 0 : index
    %c2 = arith.constant 2 : index
    %c0_39 = arith.constant 0 : index
    %40 = vector.load %arg18[%c0_38, %c2, %c0_39] : memref<18x18x8xf32, #tpu.memory_space<vmem>>, vector<16x16x8xf32>
    %41 = vector.shape_cast %40 : vector<16x16x8xf32> to vector<256x8xf32>
    %c0_40 = arith.constant 0 : index
    %c2_41 = arith.constant 2 : index
    %c0_42 = arith.constant 0 : index
    %c0_43 = arith.constant 0 : index
    %42 = vector.load %arg5[%c0_40, %c2_41, %c0_42, %c0_43] : memref<3x3x8x64xf32, #tpu.memory_space<vmem>>, vector<1x1x8x64xf32>
    %43 = vector.shape_cast %42 : vector<1x1x8x64xf32> to vector<8x64xf32>
    %cst_44 = arith.constant dense<0.000000e+00> : vector<256x64xf32>
    %44 = tpu.matmul %41, %43, %cst_44 {dimension_numbers = #tpu.dot_dimension_numbers<[1], [0], [0], [1], [0, 0, 1, 1], [], []>} : vector<256x8xf32>, vector<8x64xf32>, vector<256x64xf32> -> vector<256x64xf32>
    %45 = arith.addf %39, %44 : vector<256x64xf32>
    %c1_45 = arith.constant 1 : index
    %c0_46 = arith.constant 0 : index
    %c0_47 = arith.constant 0 : index
    %46 = vector.load %arg18[%c1_45, %c0_46, %c0_47] : memref<18x18x8xf32, #tpu.memory_space<vmem>>, vector<16x16x8xf32>
    %47 = vector.shape_cast %46 : vector<16x16x8xf32> to vector<256x8xf32>
    %c1_48 = arith.constant 1 : index
    %c0_49 = arith.constant 0 : index
    %c0_50 = arith.constant 0 : index
    %c0_51 = arith.constant 0 : index
    %48 = vector.load %arg5[%c1_48, %c0_49, %c0_50, %c0_51] : memref<3x3x8x64xf32, #tpu.memory_space<vmem>>, vector<1x1x8x64xf32>
    %49 = vector.shape_cast %48 : vector<1x1x8x64xf32> to vector<8x64xf32>
    %cst_52 = arith.constant dense<0.000000e+00> : vector<256x64xf32>
    %50 = tpu.matmul %47, %49, %cst_52 {dimension_numbers = #tpu.dot_dimension_numbers<[1], [0], [0], [1], [0, 0, 1, 1], [], []>} : vector<256x8xf32>, vector<8x64xf32>, vector<256x64xf32> -> vector<256x64xf32>
    %51 = arith.addf %45, %50 : vector<256x64xf32>
    %c1_53 = arith.constant 1 : index
    %c1_54 = arith.constant 1 : index
    %c0_55 = arith.constant 0 : index
    %52 = vector.load %arg18[%c1_53, %c1_54, %c0_55] : memref<18x18x8xf32, #tpu.memory_space<vmem>>, vector<16x16x8xf32>
    %53 = vector.shape_cast %52 : vector<16x16x8xf32> to vector<256x8xf32>
    %c1_56 = arith.constant 1 : index
    %c1_57 = arith.constant 1 : index
    %c0_58 = arith.constant 0 : index
    %c0_59 = arith.constant 0 : index
    %54 = vector.load %arg5[%c1_56, %c1_57, %c0_58, %c0_59] : memref<3x3x8x64xf32, #tpu.memory_space<vmem>>, vector<1x1x8x64xf32>
    %55 = vector.shape_cast %54 : vector<1x1x8x64xf32> to vector<8x64xf32>
    %cst_60 = arith.constant dense<0.000000e+00> : vector<256x64xf32>
    %56 = tpu.matmul %53, %55, %cst_60 {dimension_numbers = #tpu.dot_dimension_numbers<[1], [0], [0], [1], [0, 0, 1, 1], [], []>} : vector<256x8xf32>, vector<8x64xf32>, vector<256x64xf32> -> vector<256x64xf32>
    %57 = arith.addf %51, %56 : vector<256x64xf32>
    %c1_61 = arith.constant 1 : index
    %c2_62 = arith.constant 2 : index
    %c0_63 = arith.constant 0 : index
    %58 = vector.load %arg18[%c1_61, %c2_62, %c0_63] : memref<18x18x8xf32, #tpu.memory_space<vmem>>, vector<16x16x8xf32>
    %59 = vector.shape_cast %58 : vector<16x16x8xf32> to vector<256x8xf32>
    %c1_64 = arith.constant 1 : index
    %c2_65 = arith.constant 2 : index
    %c0_66 = arith.constant 0 : index
    %c0_67 = arith.constant 0 : index
    %60 = vector.load %arg5[%c1_64, %c2_65, %c0_66, %c0_67] : memref<3x3x8x64xf32, #tpu.memory_space<vmem>>, vector<1x1x8x64xf32>
    %61 = vector.shape_cast %60 : vector<1x1x8x64xf32> to vector<8x64xf32>
    %cst_68 = arith.constant dense<0.000000e+00> : vector<256x64xf32>
    %62 = tpu.matmul %59, %61, %cst_68 {dimension_numbers = #tpu.dot_dimension_numbers<[1], [0], [0], [1], [0, 0, 1, 1], [], []>} : vector<256x8xf32>, vector<8x64xf32>, vector<256x64xf32> -> vector<256x64xf32>
    %63 = arith.addf %57, %62 : vector<256x64xf32>
    %c2_69 = arith.constant 2 : index
    %c0_70 = arith.constant 0 : index
    %c0_71 = arith.constant 0 : index
    %64 = vector.load %arg18[%c2_69, %c0_70, %c0_71] : memref<18x18x8xf32, #tpu.memory_space<vmem>>, vector<16x16x8xf32>
    %65 = vector.shape_cast %64 : vector<16x16x8xf32> to vector<256x8xf32>
    %c2_72 = arith.constant 2 : index
    %c0_73 = arith.constant 0 : index
    %c0_74 = arith.constant 0 : index
    %c0_75 = arith.constant 0 : index
    %66 = vector.load %arg5[%c2_72, %c0_73, %c0_74, %c0_75] : memref<3x3x8x64xf32, #tpu.memory_space<vmem>>, vector<1x1x8x64xf32>
    %67 = vector.shape_cast %66 : vector<1x1x8x64xf32> to vector<8x64xf32>
    %cst_76 = arith.constant dense<0.000000e+00> : vector<256x64xf32>
    %68 = tpu.matmul %65, %67, %cst_76 {dimension_numbers = #tpu.dot_dimension_numbers<[1], [0], [0], [1], [0, 0, 1, 1], [], []>} : vector<256x8xf32>, vector<8x64xf32>, vector<256x64xf32> -> vector<256x64xf32>
    %69 = arith.addf %63, %68 : vector<256x64xf32>
    %c2_77 = arith.constant 2 : index
    %c1_78 = arith.constant 1 : index
    %c0_79 = arith.constant 0 : index
    %70 = vector.load %arg18[%c2_77, %c1_78, %c0_79] : memref<18x18x8xf32, #tpu.memory_space<vmem>>, vector<16x16x8xf32>
    %71 = vector.shape_cast %70 : vector<16x16x8xf32> to vector<256x8xf32>
    %c2_80 = arith.constant 2 : index
    %c1_81 = arith.constant 1 : index
    %c0_82 = arith.constant 0 : index
    %c0_83 = arith.constant 0 : index
    %72 = vector.load %arg5[%c2_80, %c1_81, %c0_82, %c0_83] : memref<3x3x8x64xf32, #tpu.memory_space<vmem>>, vector<1x1x8x64xf32>
    %73 = vector.shape_cast %72 : vector<1x1x8x64xf32> to vector<8x64xf32>
    %cst_84 = arith.constant dense<0.000000e+00> : vector<256x64xf32>
    %74 = tpu.matmul %71, %73, %cst_84 {dimension_numbers = #tpu.dot_dimension_numbers<[1], [0], [0], [1], [0, 0, 1, 1], [], []>} : vector<256x8xf32>, vector<8x64xf32>, vector<256x64xf32> -> vector<256x64xf32>
    %75 = arith.addf %69, %74 : vector<256x64xf32>
    %c2_85 = arith.constant 2 : index
    %c2_86 = arith.constant 2 : index
    %c0_87 = arith.constant 0 : index
    %76 = vector.load %arg18[%c2_85, %c2_86, %c0_87] : memref<18x18x8xf32, #tpu.memory_space<vmem>>, vector<16x16x8xf32>
    %77 = vector.shape_cast %76 : vector<16x16x8xf32> to vector<256x8xf32>
    %c2_88 = arith.constant 2 : index
    %c2_89 = arith.constant 2 : index
    %c0_90 = arith.constant 0 : index
    %c0_91 = arith.constant 0 : index
    %78 = vector.load %arg5[%c2_88, %c2_89, %c0_90, %c0_91] : memref<3x3x8x64xf32, #tpu.memory_space<vmem>>, vector<1x1x8x64xf32>
    %79 = vector.shape_cast %78 : vector<1x1x8x64xf32> to vector<8x64xf32>
    %cst_92 = arith.constant dense<0.000000e+00> : vector<256x64xf32>
    %80 = tpu.matmul %77, %79, %cst_92 {dimension_numbers = #tpu.dot_dimension_numbers<[1], [0], [0], [1], [0, 0, 1, 1], [], []>} : vector<256x8xf32>, vector<8x64xf32>, vector<256x64xf32> -> vector<256x64xf32>
    %81 = arith.addf %75, %80 : vector<256x64xf32>
    %c0_93 = arith.constant 0 : index
    %c0_94 = arith.constant 0 : index
    %82 = vector.load %arg6[%c0_93, %c0_94] : memref<1x64xf32, #tpu.memory_space<vmem>>, vector<1x64xf32>
    %83 = vector.broadcast %82 : vector<1x64xf32> to vector<256x64xf32>
    %84 = arith.addf %81, %83 : vector<256x64xf32>
    %85 = vector.shape_cast %84 : vector<256x64xf32> to vector<16x16x64xf32>
    %c0_95 = arith.constant 0 : index
    %c0_96 = arith.constant 0 : index
    %c0_97 = arith.constant 0 : index
    %86 = vector.load %arg20[%c0_95, %c0_96, %c0_97] : memref<16x16x64xf32, #tpu.memory_space<vmem>>, vector<16x16x64xf32>
    tpu.vector_store %arg20[%c0_95, %c0_96, %c0_97], %85 {strides = array<i32>} : memref<16x16x64xf32, #tpu.memory_space<vmem>>, vector<16x16x64xf32>,
    %c0_98 = arith.constant 0 : index
    %c0_99 = arith.constant 0 : index
    %c0_100 = arith.constant 0 : index
    %87 = tpu.strided_load %arg20[%c0_98, %c0_99, %c0_100] {strides = array<i32: 1, 2, 1>} : memref<16x16x64xf32, #tpu.memory_space<vmem>>, vector<16x8x64xf32>
    %c0_101 = arith.constant 0 : index
    %c1_102 = arith.constant 1 : index
    %c0_103 = arith.constant 0 : index
    %88 = tpu.strided_load %arg20[%c0_101, %c1_102, %c0_103] {strides = array<i32: 1, 2, 1>} : memref<16x16x64xf32, #tpu.memory_space<vmem>>, vector<16x8x64xf32>
    %89 = arith.maximumf %87, %88 : vector<16x8x64xf32>
    %90 = vector.shape_cast %89 : vector<16x8x64xf32> to vector<8x2x8x64xf32>
    %91 = vector.extract_strided_slice %90 {offsets = [0, 0, 0, 0], sizes = [8, 1, 8, 64], strides = [1, 1, 1, 1]} : vector<8x2x8x64xf32> to vector<8x1x8x64xf32>
    %92 = vector.shape_cast %91 : vector<8x1x8x64xf32> to vector<8x8x64xf32>
    %93 = vector.extract_strided_slice %90 {offsets = [0, 1, 0, 0], sizes = [8, 1, 8, 64], strides = [1, 1, 1, 1]} : vector<8x2x8x64xf32> to vector<8x1x8x64xf32>
    %94 = vector.shape_cast %93 : vector<8x1x8x64xf32> to vector<8x8x64xf32>
    %95 = arith.maximumf %92, %94 : vector<8x8x64xf32>
    %c0_104 = arith.constant 0 : index
    %c0_105 = arith.constant 0 : index
    %96 = vector.load %arg7[%c0_104, %c0_105] : memref<1x64xf32, #tpu.memory_space<vmem>>, vector<1x64xf32>
    %97 = vector.shape_cast %96 : vector<1x64xf32> to vector<1x1x64xf32>
    %98 = vector.broadcast %97 : vector<1x1x64xf32> to vector<8x8x64xf32>
    %99 = arith.mulf %95, %98 : vector<8x8x64xf32>
    %c0_106 = arith.constant 0 : index
    %c0_107 = arith.constant 0 : index
    %100 = vector.load %arg8[%c0_106, %c0_107] : memref<1x64xf32, #tpu.memory_space<vmem>>, vector<1x64xf32>
    %101 = vector.shape_cast %100 : vector<1x64xf32> to vector<1x1x64xf32>
    %102 = vector.broadcast %101 : vector<1x1x64xf32> to vector<8x8x64xf32>
    %103 = arith.addf %99, %102 : vector<8x8x64xf32>
    %cst_108 = arith.constant 0.000000e+00 : f32
    %104 = vector.broadcast %cst_108 : f32 to vector<8x8x64xf32>
    %105 = arith.cmpf ogt, %103, %104 : vector<8x8x64xf32>
    %cst_109 = arith.constant 1.000000e-01 : f32
    %106 = vector.broadcast %cst_109 : f32 to vector<8x8x64xf32>
    %107 = arith.mulf %106, %103 : vector<8x8x64xf32>
    %108 = arith.select %105, %103, %107 : vector<8x8x64xi1>, vector<8x8x64xf32>
    %cst_110 = arith.constant 0.000000e+00 : f32
    %109 = vector.broadcast %cst_110 : f32 to vector<10x10x64xf32>
    %c0_111 = arith.constant 0 : index
    %c0_112 = arith.constant 0 : index
    %c0_113 = arith.constant 0 : index
    %110 = vector.load %arg19[%c0_111, %c0_112, %c0_113] : memref<10x10x64xf32, #tpu.memory_space<vmem>>, vector<10x10x64xf32>
    tpu.vector_store %arg19[%c0_111, %c0_112, %c0_113], %109 {strides = array<i32>} : memref<10x10x64xf32, #tpu.memory_space<vmem>>, vector<10x10x64xf32>,
    %c1_114 = arith.constant 1 : index
    %c1_115 = arith.constant 1 : index
    %c0_116 = arith.constant 0 : index
    %111 = vector.load %arg19[%c1_114, %c1_115, %c0_116] : memref<10x10x64xf32, #tpu.memory_space<vmem>>, vector<8x8x64xf32>
    tpu.vector_store %arg19[%c1_114, %c1_115, %c0_116], %108 {strides = array<i32>} : memref<10x10x64xf32, #tpu.memory_space<vmem>>, vector<8x8x64xf32>,
    %cst_117 = arith.constant 0.000000e+00 : f32
    %112 = vector.broadcast %cst_117 : f32 to vector<64x64xf32>
    %c0_118 = arith.constant 0 : index
    %c0_119 = arith.constant 0 : index
    %c0_120 = arith.constant 0 : index
    %113 = vector.load %arg19[%c0_118, %c0_119, %c0_120] : memref<10x10x64xf32, #tpu.memory_space<vmem>>, vector<8x8x64xf32>
    %114 = vector.shape_cast %113 : vector<8x8x64xf32> to vector<64x64xf32>
    %c0_121 = arith.constant 0 : index
    %c0_122 = arith.constant 0 : index
    %c0_123 = arith.constant 0 : index
    %c0_124 = arith.constant 0 : index
    %115 = vector.load %arg9[%c0_121, %c0_122, %c0_123, %c0_124] : memref<3x3x64x64xf32, #tpu.memory_space<vmem>>, vector<1x1x64x64xf32>
    %116 = vector.shape_cast %115 : vector<1x1x64x64xf32> to vector<64x64xf32>
    %cst_125 = arith.constant dense<0.000000e+00> : vector<64x64xf32>
    %117 = tpu.matmul %114, %116, %cst_125 {dimension_numbers = #tpu.dot_dimension_numbers<[1], [0], [0], [1], [0, 0, 1, 1], [], []>} : vector<64x64xf32>, vector<64x64xf32>, vector<64x64xf32> -> vector<64x64xf32>
    %118 = arith.addf %112, %117 : vector<64x64xf32>
    %c0_126 = arith.constant 0 : index
    %c1_127 = arith.constant 1 : index
    %c0_128 = arith.constant 0 : index
    %119 = vector.load %arg19[%c0_126, %c1_127, %c0_128] : memref<10x10x64xf32, #tpu.memory_space<vmem>>, vector<8x8x64xf32>
    %120 = vector.shape_cast %119 : vector<8x8x64xf32> to vector<64x64xf32>
    %c0_129 = arith.constant 0 : index
    %c1_130 = arith.constant 1 : index
    %c0_131 = arith.constant 0 : index
    %c0_132 = arith.constant 0 : index
    %121 = vector.load %arg9[%c0_129, %c1_130, %c0_131, %c0_132] : memref<3x3x64x64xf32, #tpu.memory_space<vmem>>, vector<1x1x64x64xf32>
    %122 = vector.shape_cast %121 : vector<1x1x64x64xf32> to vector<64x64xf32>
    %cst_133 = arith.constant dense<0.000000e+00> : vector<64x64xf32>
    %123 = tpu.matmul %120, %122, %cst_133 {dimension_numbers = #tpu.dot_dimension_numbers<[1], [0], [0], [1], [0, 0, 1, 1], [], []>} : vector<64x64xf32>, vector<64x64xf32>, vector<64x64xf32> -> vector<64x64xf32>
    %124 = arith.addf %118, %123 : vector<64x64xf32>
    %c0_134 = arith.constant 0 : index
    %c2_135 = arith.constant 2 : index
    %c0_136 = arith.constant 0 : index
    %125 = vector.load %arg19[%c0_134, %c2_135, %c0_136] : memref<10x10x64xf32, #tpu.memory_space<vmem>>, vector<8x8x64xf32>
    %126 = vector.shape_cast %125 : vector<8x8x64xf32> to vector<64x64xf32>
    %c0_137 = arith.constant 0 : index
    %c2_138 = arith.constant 2 : index
    %c0_139 = arith.constant 0 : index
    %c0_140 = arith.constant 0 : index
    %127 = vector.load %arg9[%c0_137, %c2_138, %c0_139, %c0_140] : memref<3x3x64x64xf32, #tpu.memory_space<vmem>>, vector<1x1x64x64xf32>
    %128 = vector.shape_cast %127 : vector<1x1x64x64xf32> to vector<64x64xf32>
    %cst_141 = arith.constant dense<0.000000e+00> : vector<64x64xf32>
    %129 = tpu.matmul %126, %128, %cst_141 {dimension_numbers = #tpu.dot_dimension_numbers<[1], [0], [0], [1], [0, 0, 1, 1], [], []>} : vector<64x64xf32>, vector<64x64xf32>, vector<64x64xf32> -> vector<64x64xf32>
    %130 = arith.addf %124, %129 : vector<64x64xf32>
    %c1_142 = arith.constant 1 : index
    %c0_143 = arith.constant 0 : index
    %c0_144 = arith.constant 0 : index
    %131 = vector.load %arg19[%c1_142, %c0_143, %c0_144] : memref<10x10x64xf32, #tpu.memory_space<vmem>>, vector<8x8x64xf32>
    %132 = vector.shape_cast %131 : vector<8x8x64xf32> to vector<64x64xf32>
    %c1_145 = arith.constant 1 : index
    %c0_146 = arith.constant 0 : index
    %c0_147 = arith.constant 0 : index
    %c0_148 = arith.constant 0 : index
    %133 = vector.load %arg9[%c1_145, %c0_146, %c0_147, %c0_148] : memref<3x3x64x64xf32, #tpu.memory_space<vmem>>, vector<1x1x64x64xf32>
    %134 = vector.shape_cast %133 : vector<1x1x64x64xf32> to vector<64x64xf32>
    %cst_149 = arith.constant dense<0.000000e+00> : vector<64x64xf32>
    %135 = tpu.matmul %132, %134, %cst_149 {dimension_numbers = #tpu.dot_dimension_numbers<[1], [0], [0], [1], [0, 0, 1, 1], [], []>} : vector<64x64xf32>, vector<64x64xf32>, vector<64x64xf32> -> vector<64x64xf32>
    %136 = arith.addf %130, %135 : vector<64x64xf32>
    %c1_150 = arith.constant 1 : index
    %c1_151 = arith.constant 1 : index
    %c0_152 = arith.constant 0 : index
    %137 = vector.load %arg19[%c1_150, %c1_151, %c0_152] : memref<10x10x64xf32, #tpu.memory_space<vmem>>, vector<8x8x64xf32>
    %138 = vector.shape_cast %137 : vector<8x8x64xf32> to vector<64x64xf32>
    %c1_153 = arith.constant 1 : index
    %c1_154 = arith.constant 1 : index
    %c0_155 = arith.constant 0 : index
    %c0_156 = arith.constant 0 : index
    %139 = vector.load %arg9[%c1_153, %c1_154, %c0_155, %c0_156] : memref<3x3x64x64xf32, #tpu.memory_space<vmem>>, vector<1x1x64x64xf32>
    %140 = vector.shape_cast %139 : vector<1x1x64x64xf32> to vector<64x64xf32>
    %cst_157 = arith.constant dense<0.000000e+00> : vector<64x64xf32>
    %141 = tpu.matmul %138, %140, %cst_157 {dimension_numbers = #tpu.dot_dimension_numbers<[1], [0], [0], [1], [0, 0, 1, 1], [], []>} : vector<64x64xf32>, vector<64x64xf32>, vector<64x64xf32> -> vector<64x64xf32>
    %142 = arith.addf %136, %141 : vector<64x64xf32>
    %c1_158 = arith.constant 1 : index
    %c2_159 = arith.constant 2 : index
    %c0_160 = arith.constant 0 : index
    %143 = vector.load %arg19[%c1_158, %c2_159, %c0_160] : memref<10x10x64xf32, #tpu.memory_space<vmem>>, vector<8x8x64xf32>
    %144 = vector.shape_cast %143 : vector<8x8x64xf32> to vector<64x64xf32>
    %c1_161 = arith.constant 1 : index
    %c2_162 = arith.constant 2 : index
    %c0_163 = arith.constant 0 : index
    %c0_164 = arith.constant 0 : index
    %145 = vector.load %arg9[%c1_161, %c2_162, %c0_163, %c0_164] : memref<3x3x64x64xf32, #tpu.memory_space<vmem>>, vector<1x1x64x64xf32>
    %146 = vector.shape_cast %145 : vector<1x1x64x64xf32> to vector<64x64xf32>
    %cst_165 = arith.constant dense<0.000000e+00> : vector<64x64xf32>
    %147 = tpu.matmul %144, %146, %cst_165 {dimension_numbers = #tpu.dot_dimension_numbers<[1], [0], [0], [1], [0, 0, 1, 1], [], []>} : vector<64x64xf32>, vector<64x64xf32>, vector<64x64xf32> -> vector<64x64xf32>
    %148 = arith.addf %142, %147 : vector<64x64xf32>
    %c2_166 = arith.constant 2 : index
    %c0_167 = arith.constant 0 : index
    %c0_168 = arith.constant 0 : index
    %149 = vector.load %arg19[%c2_166, %c0_167, %c0_168] : memref<10x10x64xf32, #tpu.memory_space<vmem>>, vector<8x8x64xf32>
    %150 = vector.shape_cast %149 : vector<8x8x64xf32> to vector<64x64xf32>
    %c2_169 = arith.constant 2 : index
    %c0_170 = arith.constant 0 : index
    %c0_171 = arith.constant 0 : index
    %c0_172 = arith.constant 0 : index
    %151 = vector.load %arg9[%c2_169, %c0_170, %c0_171, %c0_172] : memref<3x3x64x64xf32, #tpu.memory_space<vmem>>, vector<1x1x64x64xf32>
    %152 = vector.shape_cast %151 : vector<1x1x64x64xf32> to vector<64x64xf32>
    %cst_173 = arith.constant dense<0.000000e+00> : vector<64x64xf32>
    %153 = tpu.matmul %150, %152, %cst_173 {dimension_numbers = #tpu.dot_dimension_numbers<[1], [0], [0], [1], [0, 0, 1, 1], [], []>} : vector<64x64xf32>, vector<64x64xf32>, vector<64x64xf32> -> vector<64x64xf32>
    %154 = arith.addf %148, %153 : vector<64x64xf32>
    %c2_174 = arith.constant 2 : index
    %c1_175 = arith.constant 1 : index
    %c0_176 = arith.constant 0 : index
    %155 = vector.load %arg19[%c2_174, %c1_175, %c0_176] : memref<10x10x64xf32, #tpu.memory_space<vmem>>, vector<8x8x64xf32>
    %156 = vector.shape_cast %155 : vector<8x8x64xf32> to vector<64x64xf32>
    %c2_177 = arith.constant 2 : index
    %c1_178 = arith.constant 1 : index
    %c0_179 = arith.constant 0 : index
    %c0_180 = arith.constant 0 : index
    %157 = vector.load %arg9[%c2_177, %c1_178, %c0_179, %c0_180] : memref<3x3x64x64xf32, #tpu.memory_space<vmem>>, vector<1x1x64x64xf32>
    %158 = vector.shape_cast %157 : vector<1x1x64x64xf32> to vector<64x64xf32>
    %cst_181 = arith.constant dense<0.000000e+00> : vector<64x64xf32>
    %159 = tpu.matmul %156, %158, %cst_181 {dimension_numbers = #tpu.dot_dimension_numbers<[1], [0], [0], [1], [0, 0, 1, 1], [], []>} : vector<64x64xf32>, vector<64x64xf32>, vector<64x64xf32> -> vector<64x64xf32>
    %160 = arith.addf %154, %159 : vector<64x64xf32>
    %c2_182 = arith.constant 2 : index
    %c2_183 = arith.constant 2 : index
    %c0_184 = arith.constant 0 : index
    %161 = vector.load %arg19[%c2_182, %c2_183, %c0_184] : memref<10x10x64xf32, #tpu.memory_space<vmem>>, vector<8x8x64xf32>
    %162 = vector.shape_cast %161 : vector<8x8x64xf32> to vector<64x64xf32>
    %c2_185 = arith.constant 2 : index
    %c2_186 = arith.constant 2 : index
    %c0_187 = arith.constant 0 : index
    %c0_188 = arith.constant 0 : index
    %163 = vector.load %arg9[%c2_185, %c2_186, %c0_187, %c0_188] : memref<3x3x64x64xf32, #tpu.memory_space<vmem>>, vector<1x1x64x64xf32>
    %164 = vector.shape_cast %163 : vector<1x1x64x64xf32> to vector<64x64xf32>
    %cst_189 = arith.constant dense<0.000000e+00> : vector<64x64xf32>
    %165 = tpu.matmul %162, %164, %cst_189 {dimension_numbers = #tpu.dot_dimension_numbers<[1], [0], [0], [1], [0, 0, 1, 1], [], []>} : vector<64x64xf32>, vector<64x64xf32>, vector<64x64xf32> -> vector<64x64xf32>
    %166 = arith.addf %160, %165 : vector<64x64xf32>
    %c0_190 = arith.constant 0 : index
    %c0_191 = arith.constant 0 : index
    %167 = vector.load %arg10[%c0_190, %c0_191] : memref<1x64xf32, #tpu.memory_space<vmem>>, vector<1x64xf32>
    %168 = vector.broadcast %167 : vector<1x64xf32> to vector<64x64xf32>
    %169 = arith.addf %166, %168 : vector<64x64xf32>
    %170 = vector.shape_cast %169 : vector<64x64xf32> to vector<8x8x64xf32>
    %c0_192 = arith.constant 0 : index
    %c0_193 = arith.constant 0 : index
    %c0_194 = arith.constant 0 : index
    %171 = vector.load %arg20[%c0_192, %c0_193, %c0_194] : memref<16x16x64xf32, #tpu.memory_space<vmem>>, vector<8x8x64xf32>
    tpu.vector_store %arg20[%c0_192, %c0_193, %c0_194], %170 {strides = array<i32>} : memref<16x16x64xf32, #tpu.memory_space<vmem>>, vector<8x8x64xf32>,
    %c0_195 = arith.constant 0 : index
    %c0_196 = arith.constant 0 : index
    %c0_197 = arith.constant 0 : index
    %172 = tpu.strided_load %arg20[%c0_195, %c0_196, %c0_197] {strides = array<i32: 1, 2, 1>} : memref<16x16x64xf32, #tpu.memory_space<vmem>>, vector<8x4x64xf32>
    %c0_198 = arith.constant 0 : index
    %c1_199 = arith.constant 1 : index
    %c0_200 = arith.constant 0 : index
    %173 = tpu.strided_load %arg20[%c0_198, %c1_199, %c0_200] {strides = array<i32: 1, 2, 1>} : memref<16x16x64xf32, #tpu.memory_space<vmem>>, vector<8x4x64xf32>
    %174 = arith.maximumf %172, %173 : vector<8x4x64xf32>
    %175 = vector.shape_cast %174 : vector<8x4x64xf32> to vector<4x2x4x64xf32>
    %176 = vector.extract_strided_slice %175 {offsets = [0, 0, 0, 0], sizes = [4, 1, 4, 64], strides = [1, 1, 1, 1]} : vector<4x2x4x64xf32> to vector<4x1x4x64xf32>
    %177 = vector.shape_cast %176 : vector<4x1x4x64xf32> to vector<4x4x64xf32>
    %178 = vector.extract_strided_slice %175 {offsets = [0, 1, 0, 0], sizes = [4, 1, 4, 64], strides = [1, 1, 1, 1]} : vector<4x2x4x64xf32> to vector<4x1x4x64xf32>
    %179 = vector.shape_cast %178 : vector<4x1x4x64xf32> to vector<4x4x64xf32>
    %180 = arith.maximumf %177, %179 : vector<4x4x64xf32>
    %181 = vector.shape_cast %180 : vector<4x4x64xf32> to vector<16x64xf32>
    %c0_201 = arith.constant 0 : index
    %c0_202 = arith.constant 0 : index
    %182 = vector.load %arg11[%c0_201, %c0_202] : memref<1x64xf32, #tpu.memory_space<vmem>>, vector<1x64xf32>
    %183 = vector.broadcast %182 : vector<1x64xf32> to vector<16x64xf32>
    %184 = arith.mulf %181, %183 : vector<16x64xf32>
    %c0_203 = arith.constant 0 : index
    %c0_204 = arith.constant 0 : index
    %185 = vector.load %arg12[%c0_203, %c0_204] : memref<1x64xf32, #tpu.memory_space<vmem>>, vector<1x64xf32>
    %186 = vector.broadcast %185 : vector<1x64xf32> to vector<16x64xf32>
    %187 = arith.addf %184, %186 : vector<16x64xf32>
    %cst_205 = arith.constant 0.000000e+00 : f32
    %188 = vector.broadcast %cst_205 : f32 to vector<16x64xf32>
    %189 = arith.cmpf ogt, %187, %188 : vector<16x64xf32>
    %cst_206 = arith.constant 1.000000e-01 : f32
    %190 = vector.broadcast %cst_206 : f32 to vector<16x64xf32>
    %191 = arith.mulf %190, %187 : vector<16x64xf32>
    %192 = arith.select %189, %187, %191 : vector<16x64xi1>, vector<16x64xf32>
    %c0_207 = arith.constant 0 : index
    %c0_208 = arith.constant 0 : index
    %193 = vector.load %arg13[%c0_207, %c0_208] : memref<64x64xf32, #tpu.memory_space<vmem>>, vector<64x64xf32>
    %cst_209 = arith.constant dense<0.000000e+00> : vector<16x64xf32>
    %194 = tpu.matmul %192, %193, %cst_209 {dimension_numbers = #tpu.dot_dimension_numbers<[1], [0], [0], [1], [0, 0, 1, 1], [], []>} : vector<16x64xf32>, vector<64x64xf32>, vector<16x64xf32> -> vector<16x64xf32>
    %c0_210 = arith.constant 0 : index
    %c0_211 = arith.constant 0 : index
    %195 = vector.load %arg14[%c0_210, %c0_211] : memref<1x64xf32, #tpu.memory_space<vmem>>, vector<1x64xf32>
    %196 = vector.broadcast %195 : vector<1x64xf32> to vector<16x64xf32>
    %197 = arith.addf %194, %196 : vector<16x64xf32>
    %cst_212 = arith.constant dense<0.000000e+00> : vector<64xf32>
    %198 = vector.multi_reduction <add>, %197, %cst_212 [0] : vector<16x64xf32> to vector<64xf32>
    %199 = vector.shape_cast %198 : vector<64xf32> to vector<1x64xf32>
    %cst_213 = arith.constant 6.250000e-02 : f32
    %200 = vector.broadcast %cst_213 : f32 to vector<1x64xf32>
    %201 = arith.mulf %199, %200 : vector<1x64xf32>
    %c0_214 = arith.constant 0 : index
    %c0_215 = arith.constant 0 : index
    %202 = vector.load %arg15[%c0_214, %c0_215] : memref<64x10xf32, #tpu.memory_space<vmem>>, vector<64x10xf32>
    %cst_216 = arith.constant dense<0.000000e+00> : vector<1x10xf32>
    %203 = tpu.matmul %201, %202, %cst_216 {dimension_numbers = #tpu.dot_dimension_numbers<[1], [0], [0], [1], [0, 0, 1, 1], [], []>} : vector<1x64xf32>, vector<64x10xf32>, vector<1x10xf32> -> vector<1x10xf32>
    %c0_217 = arith.constant 0 : index
    %c0_218 = arith.constant 0 : index
    %204 = vector.load %arg16[%c0_217, %c0_218] : memref<1x10xf32, #tpu.memory_space<vmem>>, vector<1x10xf32>
    %205 = arith.addf %203, %204 : vector<1x10xf32>
    %c0_219 = arith.constant 0 : index
    %c0_220 = arith.constant 0 : index
    %c0_221 = arith.constant 0 : index
    %206 = vector.load %arg17[%c0_219, %c0_220, %c0_221] : memref<1x1x10xf32, #tpu.memory_space<vmem>>, vector<1x1x10xf32>
    %207 = vector.shape_cast %206 : vector<1x1x10xf32> to vector<1x10xf32>
    %208 = vector.shape_cast %205 : vector<1x10xf32> to vector<1x1x10xf32>
    tpu.vector_store %arg17[%c0_219, %c0_220, %c0_221], %208 {strides = array<i32>} : memref<1x1x10xf32, #tpu.memory_space<vmem>>, vector<1x1x10xf32>,
    return
  }
  func.func @transform_0(%arg0: i32) -> (i32, i32, i32, i32) {
    %c0_i32 = arith.constant 0 : i32
    %c0_i32_0 = arith.constant 0 : i32
    %c0_i32_1 = arith.constant 0 : i32
    %c0_i32_2 = arith.constant 0 : i32
    return %arg0, %c0_i32, %c0_i32_0, %c0_i32_1 : i32, i32, i32, i32
  }
  func.func @transform_1(%arg0: i32) -> (i32, i32, i32, i32) {
    %c0_i32 = arith.constant 0 : i32
    %c0_i32_0 = arith.constant 0 : i32
    %c0_i32_1 = arith.constant 0 : i32
    %c0_i32_2 = arith.constant 0 : i32
    return %arg0, %c0_i32, %c0_i32_0, %c0_i32_1 : i32, i32, i32, i32
  }
  func.func @transform_2(%arg0: i32) -> (i32, i32) {
    %c0_i32 = arith.constant 0 : i32
    %c0_i32_0 = arith.constant 0 : i32
    %c0_i32_1 = arith.constant 0 : i32
    return %c0_i32, %c0_i32_0 : i32, i32
  }
  func.func @transform_3(%arg0: i32) -> (i32, i32) {
    %c0_i32 = arith.constant 0 : i32
    %c0_i32_0 = arith.constant 0 : i32
    %c0_i32_1 = arith.constant 0 : i32
    return %c0_i32, %c0_i32_0 : i32, i32
  }
  func.func @transform_4(%arg0: i32) -> (i32, i32, i32, i32) {
    %c0_i32 = arith.constant 0 : i32
    %c0_i32_0 = arith.constant 0 : i32
    %c0_i32_1 = arith.constant 0 : i32
    %c0_i32_2 = arith.constant 0 : i32
    %c0_i32_3 = arith.constant 0 : i32
    return %c0_i32, %c0_i32_0, %c0_i32_1, %c0_i32_2 : i32, i32, i32, i32
  }
  func.func @transform_5(%arg0: i32) -> (i32, i32) {
    %c0_i32 = arith.constant 0 : i32
    %c0_i32_0 = arith.constant 0 : i32
    %c0_i32_1 = arith.constant 0 : i32
    return %c0_i32, %c0_i32_0 : i32, i32
  }
  func.func @transform_6(%arg0: i32) -> (i32, i32) {
    %c0_i32 = arith.constant 0 : i32
    %c0_i32_0 = arith.constant 0 : i32
    %c0_i32_1 = arith.constant 0 : i32
    return %c0_i32, %c0_i32_0 : i32, i32
  }
  func.func @transform_7(%arg0: i32) -> (i32, i32) {
    %c0_i32 = arith.constant 0 : i32
    %c0_i32_0 = arith.constant 0 : i32
    %c0_i32_1 = arith.constant 0 : i32
    return %c0_i32, %c0_i32_0 : i32, i32
  }
  func.func @transform_8(%arg0: i32) -> (i32, i32, i32, i32) {
    %c0_i32 = arith.constant 0 : i32
    %c0_i32_0 = arith.constant 0 : i32
    %c0_i32_1 = arith.constant 0 : i32
    %c0_i32_2 = arith.constant 0 : i32
    %c0_i32_3 = arith.constant 0 : i32
    return %c0_i32, %c0_i32_0, %c0_i32_1, %c0_i32_2 : i32, i32, i32, i32
  }
  func.func @transform_9(%arg0: i32) -> (i32, i32) {
    %c0_i32 = arith.constant 0 : i32
    %c0_i32_0 = arith.constant 0 : i32
    %c0_i32_1 = arith.constant 0 : i32
    return %c0_i32, %c0_i32_0 : i32, i32
  }
  func.func @transform_10(%arg0: i32) -> (i32, i32) {
    %c0_i32 = arith.constant 0 : i32
    %c0_i32_0 = arith.constant 0 : i32
    %c0_i32_1 = arith.constant 0 : i32
    return %c0_i32, %c0_i32_0 : i32, i32
  }
  func.func @transform_11(%arg0: i32) -> (i32, i32) {
    %c0_i32 = arith.constant 0 : i32
    %c0_i32_0 = arith.constant 0 : i32
    %c0_i32_1 = arith.constant 0 : i32
    return %c0_i32, %c0_i32_0 : i32, i32
  }
  func.func @transform_12(%arg0: i32) -> (i32, i32) {
    %c0_i32 = arith.constant 0 : i32
    %c0_i32_0 = arith.constant 0 : i32
    %c0_i32_1 = arith.constant 0 : i32
    return %c0_i32, %c0_i32_0 : i32, i32
  }
  func.func @transform_13(%arg0: i32) -> (i32, i32) {
    %c0_i32 = arith.constant 0 : i32
    %c0_i32_0 = arith.constant 0 : i32
    %c0_i32_1 = arith.constant 0 : i32
    return %c0_i32, %c0_i32_0 : i32, i32
  }
  func.func @transform_14(%arg0: i32) -> (i32, i32) {
    %c0_i32 = arith.constant 0 : i32
    %c0_i32_0 = arith.constant 0 : i32
    %c0_i32_1 = arith.constant 0 : i32
    return %c0_i32, %c0_i32_0 : i32, i32
  }
  func.func @transform_15(%arg0: i32) -> (i32, i32) {
    %c0_i32 = arith.constant 0 : i32
    %c0_i32_0 = arith.constant 0 : i32
    %c0_i32_1 = arith.constant 0 : i32
    return %c0_i32, %c0_i32_0 : i32, i32
  }
  func.func @transform_16(%arg0: i32) -> (i32, i32, i32) {
    %c0_i32 = arith.constant 0 : i32
    %c0_i32_0 = arith.constant 0 : i32
    %c0_i32_1 = arith.constant 0 : i32
    return %arg0, %c0_i32, %c0_i32_0 : i32, i32, i32
  }
}

</mosaic_0001>

<bundles_post_ra>
// kernel: cifar_cnn0_forward.1
= control target key start
LH: loop header
LB: loop body
LE: loop exit
PB: predicated region body
PF: predicated region fallthrough
CT: control target
= control target key end

     0   :  { %s10692_s0 = inlined_call_operand.vmem [shape: f32[2,16,16,8], index: 0, kind: input, shape index: {}]   ;;  %s10693_s1 = inlined_call_operand.vmem [shape: f32[2,16,16,8], index: 1, kind: input, shape index: {}]   ;;  %s10694_s2 = inlined_call_operand.vmem [shape: f32[1,8], index: 2, kind: input, shape index: {}]   ;;  %s10695_s3 = inlined_call_operand.vmem [shape: f32[1,8], index: 3, kind: input, shape index: {}]   ;;  %s10696_s4 = inlined_call_operand.vmem [shape: f32[3,3,8,64], index: 4, kind: input, shape index: {}]   ;;  %s10697_s5 = inlined_call_operand.vmem [shape: f32[1,64], index: 5, kind: input, shape index: {}]   ;;  %s10698_s6 = inlined_call_operand.vmem [shape: f32[1,64], index: 6, kind: input, shape index: {}]   ;;  %s10699_s7 = inlined_call_operand.vmem [shape: f32[1,64], index: 7, kind: input, shape index: {}]   ;;  %s10700_s8 = inlined_call_operand.vmem [shape: f32[3,3,64,64], index: 8, kind: input, shape index: {}]   ;;  %s10701_s9 = inlined_call_operand.vmem [shape: f32[1,64], index: 9, kind: input, shape index: {}]   ;;  %s10702_s10 = inlined_call_operand.vmem [shape: f32[1,64], index: 10, kind: input, shape index: {}]   ;;  %s10703_s11 = inlined_call_operand.vmem [shape: f32[1,64], index: 11, kind: input, shape index: {}]   ;;  %s10704_s12 = inlined_call_operand.vmem [shape: f32[64,64], index: 12, kind: input, shape index: {}]   ;;  %s10705_s13 = inlined_call_operand.vmem [shape: f32[1,64], index: 13, kind: input, shape index: {}]   ;;  %s10706_s14 = inlined_call_operand.vmem [shape: f32[64,10], index: 14, kind: input, shape index: {}]   ;;  %s10707_s15 = inlined_call_operand.vmem [shape: f32[1,10], index: 15, kind: input, shape index: {}]   ;;  %s10708_s16 = inlined_call_operand.hbm [shape: f32[2,1,10], index: 16, kind: output, shape index: {}]  }
   0x1   :  { %10735 = sst [smem:[#allocation85_spill]] %s10692_s0 }
   0x2   :  { %10736 = sst [smem:[#allocation86_spill]] %s10693_s1 }
   0x3   :  { %10737 = sst [smem:[#allocation87_spill]] %s10694_s2 }
   0x4   :  { %21 = vsyncpa [#allocation6], 0 }
   0x5   :  { %23 = vsyncpa [#allocation6 + $0x1], 0  ;;  %s8240_s21 = smov 0   ;;  %s8242_s22 = smov 0  }
   0x6   :  { %s8244_s23 = smov 0   ;;  %s8246_s24 = smov 0  }
   0x7 LB: > { %10738 = sst [smem:[#allocation8_spill]] %s8146_s23  ;;  %s8261_s25 = sadd.s32 4294967295, %s8150_s24   ;;  %s8150_s24 = sphi %s8246_s24, %s10951_s24   ;;  %s8146_s23 = sphi %s8244_s23, %s10953_s23   ;;  %s8142_s22 = sphi %s8242_s22, %s10955_s22   ;;  %s8138_s21 = sphi %s8240_s21, %s10954_s21  }
   0x8   : > { %s6389_s26 = sadd.s32 4294967294, %s8150_s24   ;;  %s8265_s27 = sadd.s32 1, %s8150_s24  }
   0x9   : > { %10739 = sst [smem:[#allocation9_spill]] %s8265_s27  ;;  %s382_s28 = sadd.s32 1, %s8146_s23 }
   0xa   : > { %s379_s29 = ssub.s32 %s8150_s24, %s8265_s27  ;;  %p392_p0 = scmp.ne.s32.totalorder %s8146_s23, %s8142_s22 }
   0xb   : > { %p380_p1 = scmp.eq.s32.totalorder %s379_s29, 0  ;;  %p393_p2 = scmp.eq.s32.totalorder %s8261_s25, 1 }
   0xc   : > { %p398_p3 = scmp.ne.s32.totalorder %s8142_s22, %s8138_s21  ;;  %p399_p4 = scmp.eq.s32.totalorder %s6389_s26, 1 }
   0xd   : > { %s8276_s30 = scalar_select %p380_p1, %s8146_s23, %s382_s28  }
   0xe   : > { %p8278_p5 = por %p393_p2, %p392_p0  ;;  %p8282_p6 = por %p399_p4, %p398_p3 }
   0xf   : > { %10740 = sst [smem:[#allocation10_spill]] %s8276_s30  ;;  %p6392_p7 = scmp.ge.s32.totalorder %s8150_s24, 1 }
  0x10   : > { %p475_p8 = scmp.lt.s32.totalorder %s8150_s24, 3 }
  0x12   : > { %p476_p9 = pnand %p6392_p7, %p475_p8 }
  0x14   : > { %479 = sbr.rel (%p476_p9) target bundleno = 1331 (0x533), region = 84 }
  0x19   : > { %v8291_v0 = vld [vmem:[%s10696_s4 + $0x8] sm:$0xff]  ;;  %vm905_vm0 = vcmask 64512   ;;  %vm908_vm1 = vcmask 58368   ;;  %v8296_v1 = vld [vmem:[%s10696_s4 + $0x10] sm:$0xff]  ;;  %p529_p10 = scmp.lt.s32.totalorder %s8261_s25, 1  ;;  %v10712_v2 = vmov 0.0  }
  0x1a   : > { %7306 = vmatprep.subr.mxu0 %v8291_v0  ;;  %906 = vst.msk [vmem:[#allocation2] sm:$0xff] %vm905_vm0, %v10712_v2  ;;  %907 = vst.msk [vmem:[#allocation2 + $0x8] sm:$0xff] %vm905_vm0, %v10712_v2  ;;  %8046 = vmatprep.subr.mxu1 %v8291_v0  ;;  %v8412_v3 = vld [vmem:[%s10696_s4] sm:$0xff]  ;;  %s10743_s30 = sld [smem:[#allocation85_spill]]  ;;  %s6841_s20 = sshll.u32 %s8261_s25, 4 }
  0x1b   : > { %910 = vst.msk [vmem:[#allocation2 + $0x18] sm:$0xff] %vm905_vm0, %v10712_v2  ;;  %911 = vst.msk [vmem:[#allocation2 + $0x20] sm:$0xff] %vm905_vm0, %v10712_v2  ;;  %7307 = vmatpush3.msra.mxu0 %v8291_v0  ;;  %8047 = vmatpush3.msra.mxu1 %v8291_v0  ;;  %s530_s18 = scalar_select %p529_p10, %s8261_s25, 1  ;;  %v6530_v11 = vld [vmem:[%s10696_s4 + $0x20] sm:$0xff] }
  0x1c   : > { %913 = vst.msk [vmem:[#allocation2 + $0x30] sm:$0xff] %vm905_vm0, %v10712_v2  ;;  %914 = vst.msk [vmem:[#allocation2 + $0x38] sm:$0xff] %vm905_vm0, %v10712_v2  ;;  %7406 = vmatprep.subr.mxu0 %v8296_v1  ;;  %7356 = vmatprep.subr.mxu1 %v8412_v3  ;;  %s10744_s1 = sld [smem:[#allocation86_spill]]  ;;  %v8460_v37 = vld [vmem:[%s10695_s3] ss:$0 sm:$0xff]  ;;  %s8154_s25 = smov [#allocation5]  }
  0x1d   : > { %916 = vst.msk [vmem:[#allocation2 + $0x48] sm:$0xff] %vm905_vm0, %v10712_v2  ;;  %917 = vst.msk [vmem:[#allocation2 + $0x50] sm:$0xff] %vm905_vm0, %v10712_v2  ;;  %s6844_s19 = sshll.u32 %s530_s18, 8  ;;  %s10745_s2 = sld [smem:[#allocation87_spill]] }
  0x1e   : > { %919 = vst.msk [vmem:[#allocation2 + $0x60] sm:$0xff] %vm905_vm0, %v10712_v2  ;;  %920 = vst.msk [vmem:[#allocation2 + $0x68] sm:$0xff] %vm905_vm0, %v10712_v2  ;;  %s10657_s18 = scalar_lea.hbm %s10708_s16, %s6841_s20 }
  0x1f   : > { %922 = vst.msk [vmem:[#allocation2 + $0x78] sm:$0xff] %vm905_vm0, %v10712_v2  ;;  %923 = vst.msk [vmem:[#allocation2 + $0x80] sm:$0xff] %vm905_vm0, %v10712_v2 }
  0x20   : > { %925 = vst.msk [vmem:[#allocation2 + $0x90] sm:$0xff] %vm905_vm0, %v10712_v2  ;;  %926 = vst.msk [vmem:[#allocation2 + $0x98] sm:$0xff] %vm905_vm0, %v10712_v2  ;;  %s8424_s23 = scalar_lea.vmem %s10743_s30, %s6844_s19 }
  0x21   : > { %928 = vst.msk [vmem:[#allocation2 + $0xa8] sm:$0xff] %vm905_vm0, %v10712_v2  ;;  %929 = vst.msk [vmem:[#allocation2 + $0xb0] sm:$0xff] %vm905_vm0, %v10712_v2  ;;  %v539_v4 = vld [vmem:[%s8424_s23] sm:$0xff]  ;;  %v565_v6 = vld [vmem:[%s8424_s23 + $0xd0] sm:$0xff] }
  0x22   : > { %931 = vst.msk [vmem:[#allocation2 + $0xc0] sm:$0xff] %vm905_vm0, %v10712_v2  ;;  %932 = vst.msk [vmem:[#allocation2 + $0xc8] sm:$0xff] %vm905_vm0, %v10712_v2  ;;  %s8429_s29 = scalar_lea.vmem %s10744_s1, %s6844_s19  ;;  %v540_v9 = vld [vmem:[%s8424_s23 + $0x8] sm:$0xff]  ;;  %v566_v17 = vld [vmem:[%s8424_s23 + $0xd8] sm:$0xff] }
  0x23   : > { %934 = vst.msk [vmem:[#allocation2 + $0xd8] sm:$0xff] %vm905_vm0, %v10712_v2  ;;  %935 = vst.msk [vmem:[#allocation2 + $0xe0] sm:$0xff] %vm905_vm0, %v10712_v2  ;;  %v571_v5 = vld [vmem:[%s8429_s29] sm:$0xff]  ;;  %v597_v8 = vld [vmem:[%s8429_s29 + $0xd0] sm:$0xff] }
  0x24   : > { %937 = vst.msk [vmem:[#allocation2 + $0xf0] sm:$0xff] %vm905_vm0, %v10712_v2  ;;  %938 = vst.msk [vmem:[#allocation2 + $0xf8] sm:$0xff] %vm905_vm0, %v10712_v2  ;;  %v603_v7 = vmul.f32 0.15, %v571_v5  ;;  %v572_v10 = vld [vmem:[%s8429_s29 + $0x8] sm:$0xff]  ;;  %v598_v18 = vld [vmem:[%s8429_s29 + $0xd8] sm:$0xff] }
  0x25   : > { %940 = vst.msk [vmem:[#allocation2 + $0x108] sm:$0xff] %vm905_vm0, %v10712_v2  ;;  %941 = vst.msk [vmem:[#allocation2 + $0x110] sm:$0xff] %vm905_vm0, %v10712_v2  ;;  %v1027_v12 = vld [vmem:[#allocation2 + $0x1] sm:$0xff]  ;;  %v629_v14 = vmul.f32 0.15, %v597_v8  ;;  %v541_v19 = vld [vmem:[%s8424_s23 + $0x10] sm:$0xff] }
  0x26   : > { %943 = vst.msk [vmem:[#allocation2 + $0x120] sm:$0xff] %vm905_vm0, %v10712_v2  ;;  %944 = vst.msk [vmem:[#allocation2 + $0x128] sm:$0xff] %vm905_vm0, %v10712_v2  ;;  %v604_v15 = vmul.f32 0.15, %v572_v10  ;;  %7308 = vmatprep.mubr.msk.f32.mxu0 %vm905_vm0, %v1027_v12  ;;  %v635_v16 = vadd.f32 %v603_v7, %v539_v4  ;;  %v8448_v20 = vld [vmem:[%s10745_s2] ss:$0 sm:$0xff] }
  0x27   : > { %946 = vst.msk [vmem:[#allocation2 + $0x138] sm:$0xff] %vm905_vm0, %v10712_v2  ;;  %947 = vst.msk [vmem:[#allocation2 + $0x140] sm:$0xff] %vm905_vm0, %v10712_v2  ;;  %v661_v21 = vadd.f32 %v629_v14, %v565_v6  ;;  %v630_v23 = vmul.f32 0.15, %v598_v18  ;;  %v573_v24 = vld [vmem:[%s8429_s29 + $0x10] sm:$0xff]  ;;  %v567_v25 = vld [vmem:[%s8424_s23 + $0xe0] sm:$0xff] }
  0x28   : > { %949 = vst.msk [vmem:[#allocation2 + $0x150] sm:$0xff] %vm905_vm0, %v10712_v2  ;;  %950 = vst.msk [vmem:[#allocation2 + $0x158] sm:$0xff] %vm905_vm0, %v10712_v2  ;;  %v636_v22 = vadd.f32 %v604_v15, %v540_v9  ;;  %v599_v26 = vld [vmem:[%s8429_s29 + $0xe0] sm:$0xff]  ;;  %v667_v27 = vmax.f32 %v635_v16, 0.0  ;;  %v605_v28 = vmul.f32 0.15, %v573_v24 }
  0x29   : > { %952 = vst.msk [vmem:[#allocation2 + $0x168] sm:$0xff] %vm905_vm0, %v10712_v2  ;;  %953 = vst.msk [vmem:[#allocation2 + $0x170] sm:$0xff] %vm905_vm0, %v10712_v2  ;;  %v631_v29 = vmul.f32 0.15, %v599_v26  ;;  %v693_v30 = vmax.f32 %v661_v21, 0.0  ;;  %v662_v32 = vadd.f32 %v630_v23, %v566_v17  ;;  %v542_v33 = vld [vmem:[%s8424_s23 + $0x18] sm:$0xff] }
  0x2a   : > { %955 = vst.msk [vmem:[#allocation2 + $0x180] sm:$0xff] %vm905_vm0, %v10712_v2  ;;  %956 = vst.msk [vmem:[#allocation2 + $0x188] sm:$0xff] %vm905_vm0, %v10712_v2  ;;  %v668_v31 = vmax.f32 %v636_v22, 0.0  ;;  %v574_v34 = vld [vmem:[%s8429_s29 + $0x18] sm:$0xff]  ;;  %v600_v35 = vld [vmem:[%s8429_s29 + $0xe8] sm:$0xff]  ;;  %v699_v36 = vmin.f32 %v667_v27, 1.0  ;;  %v637_v38 = vadd.f32 %v605_v28, %v541_v19 }
  0x2b   : > { %958 = vst.msk [vmem:[#allocation2 + $0x198] sm:$0xff] %vm905_vm0, %v10712_v2  ;;  %959 = vst.msk [vmem:[#allocation2 + $0x1a0] sm:$0xff] %vm905_vm0, %v10712_v2  ;;  %v663_v39 = vadd.f32 %v631_v29, %v567_v25  ;;  %v606_v40 = vmul.f32 0.15, %v574_v34  ;;  %v568_v41 = vld [vmem:[%s8424_s23 + $0xe8] sm:$0xff]  ;;  %v725_v42 = vmin.f32 %v693_v30, 1.0 }
  0x2c   : > { %909 = vst.msk [vmem:[#allocation2 + $0x10] sm:$0x3] %vm908_vm1, %v10712_v2  ;;  %912 = vst.msk [vmem:[#allocation2 + $0x28] sm:$0x3] %vm908_vm1, %v10712_v2  ;;  %v700_v43 = vmin.f32 %v668_v31, 1.0  ;;  %v694_v44 = vmax.f32 %v662_v32, 0.0  ;;  %v738_v46 = vmul.f32 %v8448_v20, %v699_v36 }
  0x2d   : > { %915 = vst.msk [vmem:[#allocation2 + $0x40] sm:$0x3] %vm908_vm1, %v10712_v2  ;;  %918 = vst.msk [vmem:[#allocation2 + $0x58] sm:$0x3] %vm908_vm1, %v10712_v2  ;;  %v632_v45 = vmul.f32 0.15, %v600_v35  ;;  %v638_v49 = vadd.f32 %v606_v40, %v542_v33  ;;  %v764_v50 = vmul.f32 %v8448_v20, %v725_v42 }
  0x2e   : > { %921 = vst.msk [vmem:[#allocation2 + $0x70] sm:$0x3] %vm908_vm1, %v10712_v2  ;;  %924 = vst.msk [vmem:[#allocation2 + $0x88] sm:$0x3] %vm908_vm1, %v10712_v2  ;;  %v669_v47 = vmax.f32 %v637_v38, 0.0  ;;  %v695_v48 = vmax.f32 %v663_v39, 0.0  ;;  %v739_v51 = vmul.f32 %v8448_v20, %v700_v43  ;;  %v777_v54 = vadd.f32 %v8460_v37, %v738_v46 }
  0x2f   : > { %927 = vst.msk [vmem:[#allocation2 + $0xa0] sm:$0x3] %vm908_vm1, %v10712_v2  ;;  %930 = vst.msk [vmem:[#allocation2 + $0xb8] sm:$0x3] %vm908_vm1, %v10712_v2  ;;  %v726_v52 = vmin.f32 %v694_v44, 1.0  ;;  %v664_v53 = vadd.f32 %v632_v45, %v568_v41  ;;  %v670_v57 = vmax.f32 %v638_v49, 0.0  ;;  %v803_v58 = vadd.f32 %v8460_v37, %v764_v50 }
  0x30   : > { %933 = vst.msk [vmem:[#allocation2 + $0xd0] sm:$0x3] %vm908_vm1, %v10712_v2  ;;  %936 = vst.msk [vmem:[#allocation2 + $0xe8] sm:$0x3] %vm908_vm1, %v10712_v2  ;;  %v701_v55 = vmin.f32 %v669_v47, 1.0  ;;  %v727_v56 = vmin.f32 %v695_v48, 1.0  ;;  %v778_v59 = vadd.f32 %v8460_v37, %v739_v51 }
  0x31   : > { %939 = vst.msk [vmem:[#allocation2 + $0x100] sm:$0x3] %vm908_vm1, %v10712_v2  ;;  %942 = vst.msk [vmem:[#allocation2 + $0x118] sm:$0x3] %vm908_vm1, %v10712_v2  ;;  %v765_v60 = vmul.f32 %v8448_v20, %v726_v52  ;;  %v696_v61 = vmax.f32 %v664_v53, 0.0  ;;  %vm809_vm2 = vcmp.gt.f32.partialorder %v777_v54, 0.0 }
  0x32   : > { %945 = vst.msk [vmem:[#allocation2 + $0x130] sm:$0x3] %vm908_vm1, %v10712_v2  ;;  %948 = vst.msk [vmem:[#allocation2 + $0x148] sm:$0x3] %vm908_vm1, %v10712_v2  ;;  %v841_v62 = vmul.f32 0.1, %v777_v54  ;;  %v740_v63 = vmul.f32 %v8448_v20, %v701_v55  ;;  %v766_v0 = vmul.f32 %v8448_v20, %v727_v56 }
  0x33   : > { %951 = vst.msk [vmem:[#allocation2 + $0x160] sm:$0x3] %vm908_vm1, %v10712_v2  ;;  %954 = vst.msk [vmem:[#allocation2 + $0x178] sm:$0x3] %vm908_vm1, %v10712_v2  ;;  %v1028_v13 = vld [vmem:[#allocation2 + $0x9] sm:$0xff]  ;;  %vm835_vm3 = vcmp.gt.f32.partialorder %v803_v58, 0.0  ;;  %v804_v6 = vadd.f32 %v8460_v37, %v765_v60 }
  0x34   : > { %957 = vst.msk [vmem:[#allocation2 + $0x190] sm:$0x3] %vm908_vm1, %v10712_v2  ;;  %960 = vst.msk [vmem:[#allocation2 + $0x1a8] sm:$0x3] %vm908_vm1, %v10712_v2  ;;  %7309 = vmatmul.mubr.msk.f32.vlgmr.msra.gmra.mxu0 %vm905_vm0, %v1028_v13  ;;  %vm810_vm4 = vcmp.gt.f32.partialorder %v778_v59, 0.0  ;;  %v873_v5 = vsel %vm809_vm2, %v777_v54, %v841_v62  ;;  %v779_v7 = vadd.f32 %v8460_v37, %v740_v63  ;;  %v728_v12 = vmin.f32 %v696_v61, 1.0 }
  0x35   : > { %7407 = vmatpush3.msra.mxu0 %v8296_v1  ;;  %v867_v1 = vmul.f32 0.1, %v803_v58  ;;  %v842_v4 = vmul.f32 0.1, %v778_v59  ;;  %v805_v8 = vadd.f32 %v8460_v37, %v766_v0  ;;  %962 = vst.msk [vmem:[#allocation2 + $0x19] sm:$0xff] %vm905_vm0, %v873_v5  ;;  %v543_v13 = vld [vmem:[%s8424_s23 + $0x20] sm:$0xff] }
  0x36   : > { %7506 = vmatprep.subr.mxu0 %v6530_v11  ;;  %v702_v11 = vmin.f32 %v670_v57, 1.0  ;;  %v575_v14 = vld [vmem:[%s8429_s29 + $0x20] sm:$0xff]  ;;  %v576_v15 = vld [vmem:[%s8429_s29 + $0x28] sm:$0xff]  ;;  %v577_v16 = vld [vmem:[%s8429_s29 + $0x30] sm:$0xff]  ;;  %vm836_vm5 = vcmp.gt.f32.partialorder %v804_v6, 0.0  ;;  %vm811_vm6 = vcmp.gt.f32.partialorder %v779_v7, 0.0  ;;  %v767_v22 = vmul.f32 %v8448_v20, %v728_v12 }
  0x37   : > { %v899_v9 = vsel %vm835_vm3, %v803_v58, %v867_v1  ;;  %v874_v10 = vsel %vm810_vm4, %v778_v59, %v842_v4  ;;  %v868_v17 = vmul.f32 0.1, %v804_v6  ;;  %v843_v18 = vmul.f32 0.1, %v779_v7  ;;  %v544_v23 = vld [vmem:[%s8424_s23 + $0x28] sm:$0xff]  ;;  %v578_v24 = vld [vmem:[%s8429_s29 + $0x38] sm:$0xff] }
  0x38   : > { %988 = vst.msk [vmem:[#allocation2 + $0x151] sm:$0xff] %vm905_vm0, %v899_v9  ;;  %963 = vst.msk [vmem:[#allocation2 + $0x21] sm:$0xff] %vm905_vm0, %v874_v10  ;;  %vm837_vm7 = vcmp.gt.f32.partialorder %v805_v8, 0.0  ;;  %v869_v19 = vmul.f32 0.1, %v805_v8  ;;  %v741_v21 = vmul.f32 %v8448_v20, %v702_v11  ;;  %v579_v25 = vld [vmem:[%s8429_s29 + $0x40] sm:$0xff]  ;;  %v806_v32 = vadd.f32 %v8460_v37, %v767_v22 }
  0x39   : > { %v900_v26 = vsel %vm836_vm5, %v804_v6, %v868_v17  ;;  %v875_v27 = vsel %vm811_vm6, %v779_v7, %v843_v18  ;;  %v607_v28 = vmul.f32 0.15, %v575_v14  ;;  %v608_v29 = vmul.f32 0.15, %v576_v15  ;;  %v545_v33 = vld [vmem:[%s8424_s23 + $0x30] sm:$0xff]  ;;  %v546_v35 = vld [vmem:[%s8424_s23 + $0x38] sm:$0xff] }
  0x3a   : > { %989 = vst.msk [vmem:[#allocation2 + $0x159] sm:$0xff] %vm905_vm0, %v900_v26  ;;  %964 = vst.msk [vmem:[#allocation2 + $0x31] sm:$0xff] %vm905_vm0, %v875_v27  ;;  %v901_v30 = vsel %vm837_vm7, %v805_v8, %v869_v19  ;;  %v780_v31 = vadd.f32 %v8460_v37, %v741_v21  ;;  %v609_v34 = vmul.f32 0.15, %v577_v16  ;;  %v547_v36 = vld [vmem:[%s8424_s23 + $0x40] sm:$0xff]  ;;  %v548_v42 = vld [vmem:[%s8424_s23 + $0x48] sm:$0xff] }
  0x3b   : > { %990 = vst.msk [vmem:[#allocation2 + $0x169] sm:$0xff] %vm905_vm0, %v901_v30  ;;  %v639_v38 = vadd.f32 %v607_v28, %v543_v13  ;;  %v640_v39 = vadd.f32 %v608_v29, %v544_v23  ;;  %v610_v40 = vmul.f32 0.15, %v578_v24  ;;  %v611_v41 = vmul.f32 0.15, %v579_v25  ;;  %v580_v43 = vld [vmem:[%s8429_s29 + $0x48] sm:$0xff] }
  0x3c   : > { %vm812_vm8 = vcmp.gt.f32.partialorder %v780_v31, 0.0  ;;  %v844_v44 = vmul.f32 0.1, %v780_v31  ;;  %vm838_vm9 = vcmp.gt.f32.partialorder %v806_v32, 0.0  ;;  %v870_v45 = vmul.f32 0.1, %v806_v32 }
  0x3d   : > { %v1029_v46 = vld [vmem:[#allocation2 + $0x19] sm:$0xff]  ;;  %v671_v47 = vmax.f32 %v639_v38, 0.0  ;;  %v672_v48 = vmax.f32 %v640_v39, 0.0  ;;  %v641_v49 = vadd.f32 %v609_v34, %v545_v33  ;;  %v642_v50 = vadd.f32 %v610_v40, %v546_v35  ;;  %v581_v51 = vld [vmem:[%s8429_s29 + $0x50] sm:$0xff]  ;;  %v995_v40 = vld [vmem:[#allocation2 + $0x8] sm:$0xff] }
  0x3e   : > { %v582_v52 = vld [vmem:[%s8429_s29 + $0x58] sm:$0xff]  ;;  %7311 = vmatprep.mubr.msk.f32.mxu0 %vm905_vm0, %v1029_v46  ;;  %v876_v55 = vsel %vm812_vm8, %v780_v31, %v844_v44  ;;  %v902_v56 = vsel %vm838_vm9, %v806_v32, %v870_v45  ;;  %v643_v57 = vadd.f32 %v611_v41, %v547_v36  ;;  %v612_v58 = vmul.f32 0.15, %v580_v43  ;;  %v549_v63 = vld [vmem:[%s8424_s23 + $0x50] sm:$0xff]  ;;  %v583_v7 = vld [vmem:[%s8429_s29 + $0x60] sm:$0xff] }
  0x3f   : > { %v1055_v53 = vld [vmem:[#allocation2 + $0x151] sm:$0xff]  ;;  %v1030_v54 = vld [vmem:[#allocation2 + $0x21] sm:$0xff]  ;;  %965 = vst.msk [vmem:[#allocation2 + $0x39] sm:$0xff] %vm905_vm0, %v876_v55  ;;  %991 = vst.msk [vmem:[#allocation2 + $0x171] sm:$0xff] %vm905_vm0, %v902_v56  ;;  %v703_v59 = vmin.f32 %v671_v47, 1.0  ;;  %v704_v60 = vmin.f32 %v672_v48, 1.0 }
  0x40   : > { %7350 = vmatprep.mubr.msk.f32.mxu1 %vm905_vm0, %v1055_v53  ;;  %7312 = vmatmul.mubr.msk.f32.gmra.mxu0 %vm905_vm0, %v1030_v54  ;;  %v673_v61 = vmax.f32 %v641_v49, 0.0  ;;  %v674_v62 = vmax.f32 %v642_v50, 0.0  ;;  %v550_v0 = vld [vmem:[%s8424_s23 + $0x58] sm:$0xff]  ;;  %v675_v1 = vmax.f32 %v643_v57, 0.0  ;;  %v644_v4 = vadd.f32 %v612_v58, %v548_v42  ;;  %v994_v25 = vld [vmem:[#allocation2] sm:$0xff]  ;;  %v584_v50 = vld [vmem:[%s8429_s29 + $0x68] sm:$0xff] }
  0x41   : > { %v613_v5 = vmul.f32 0.15, %v581_v51  ;;  %v614_v6 = vmul.f32 0.15, %v582_v52  ;;  %v1056_v8 = vld [vmem:[#allocation2 + $0x159] sm:$0xff]  ;;  %v1031_v9 = vld [vmem:[#allocation2 + $0x31] sm:$0xff]  ;;  %v742_v10 = vmul.f32 %v8448_v20, %v703_v59  ;;  %v743_v11 = vmul.f32 %v8448_v20, %v704_v60 }
  0x42   : > { %v705_v12 = vmin.f32 %v673_v61, 1.0  ;;  %v706_v13 = vmin.f32 %v674_v62, 1.0  ;;  %v8512_v14 = vld [vmem:[%s10696_s4 + $0x18] sm:$0xff]  ;;  %7351 = vmatmul.mubr.msk.f32.vlgmr.msra.gmra.mxu1 %vm905_vm0, %v1056_v8  ;;  %7314 = vmatprep.mubr.msk.f32.mxu0 %vm905_vm0, %v1031_v9  ;;  %v1057_v15 = vld [vmem:[#allocation2 + $0x169] sm:$0xff]  ;;  %v707_v16 = vmin.f32 %v675_v1, 1.0  ;;  %v676_v17 = vmax.f32 %v644_v4, 0.0 }
  0x43   : > { %v645_v18 = vadd.f32 %v613_v5, %v549_v63  ;;  %v646_v19 = vadd.f32 %v614_v6, %v550_v0  ;;  %7353 = vmatprep.mubr.msk.f32.mxu1 %vm905_vm0, %v1057_v15  ;;  %v781_v21 = vadd.f32 %v8460_v37, %v742_v10  ;;  %7357 = vmatpush3.msra.mxu1 %v8412_v3  ;;  %v615_v24 = vmul.f32 0.15, %v583_v7  ;;  %v551_v43 = vld [vmem:[%s8424_s23 + $0x60] sm:$0xff]  ;;  %v8534_v46 = vld [vmem:[#allocation2 + $0x18] sm:$0xff]  ;;  %v585_v51 = vld [vmem:[%s8429_s29 + $0x70] sm:$0xff] }
  0x44   : > { %v782_v22 = vadd.f32 %v8460_v37, %v743_v11  ;;  %v744_v23 = vmul.f32 %v8448_v20, %v705_v12  ;;  %v745_v26 = vmul.f32 %v8448_v20, %v706_v13  ;;  %v746_v27 = vmul.f32 %v8448_v20, %v707_v16  ;;  %7456 = vmatprep.subr.mxu1 %v8512_v14  ;;  %v552_v56 = vld [vmem:[%s8424_s23 + $0x68] sm:$0xff]  ;;  %v553_v57 = vld [vmem:[%s8424_s23 + $0x70] sm:$0xff]  ;;  %v586_v58 = vld [vmem:[%s8429_s29 + $0x78] sm:$0xff] }
  0x45   : > { %v708_v28 = vmin.f32 %v676_v17, 1.0  ;;  %v677_v29 = vmax.f32 %v645_v18, 0.0  ;;  %vm813_vm10 = vcmp.gt.f32.partialorder %v781_v21, 0.0  ;;  %v845_v30 = vmul.f32 0.1, %v781_v21  ;;  %v8546_v59 = vld [vmem:[#allocation2 + $0x20] sm:$0xff] }
  0x46   : > { %vm814_vm11 = vcmp.gt.f32.partialorder %v782_v22, 0.0  ;;  %v846_v31 = vmul.f32 0.1, %v782_v22  ;;  %v1032_v3 = vld [vmem:[#allocation2 + $0x39] sm:$0xff]  ;;  %v1058_v32 = vld [vmem:[#allocation2 + $0x171] sm:$0xff]  ;;  %v783_v33 = vadd.f32 %v8460_v37, %v744_v23  ;;  %v784_v34 = vadd.f32 %v8460_v37, %v745_v26  ;;  %v8562_v11 = vld [vmem:[%s10696_s4 + $0x28] sm:$0xff] }
  0x47   : > { %v785_v35 = vadd.f32 %v8460_v37, %v746_v27  ;;  %v747_v36 = vmul.f32 %v8448_v20, %v708_v28  ;;  %7315 = vmatmul.mubr.msk.f32.gmra.mxu0 %vm905_vm0, %v1032_v3  ;;  %7354 = vmatmul.mubr.msk.f32.gmra.mxu1 %vm905_vm0, %v1058_v32  ;;  %v877_v38 = vsel %vm813_vm10, %v781_v21, %v845_v30  ;;  %v709_v41 = vmin.f32 %v677_v29, 1.0  ;;  %v554_v63 = vld [vmem:[%s8424_s23 + $0x78] sm:$0xff]  ;;  %v587_v0 = vld [vmem:[%s8429_s29 + $0x80] sm:$0xff]  ;;  %v8555_v1 = vld [vmem:[#allocation2 + $0x30] sm:$0xff] }
  0x48   : > { %v878_v39 = vsel %vm814_vm11, %v782_v22, %v846_v31  ;;  %v678_v42 = vmax.f32 %v646_v19, 0.0  ;;  %966 = vst.msk [vmem:[#allocation2 + $0x49] sm:$0xff] %vm905_vm0, %v877_v38  ;;  %7358 = vmatprep.mubr.msk.f32.mxu1 %vm905_vm0, %v994_v25  ;;  %vm815_vm12 = vcmp.gt.f32.partialorder %v783_v33, 0.0  ;;  %v847_v44 = vmul.f32 0.1, %v783_v33  ;;  %v555_v17 = vld [vmem:[%s8424_s23 + $0x80] sm:$0xff] }
  0x49   : > { %967 = vst.msk [vmem:[#allocation2 + $0x51] sm:$0xff] %vm905_vm0, %v878_v39  ;;  %vm816_vm13 = vcmp.gt.f32.partialorder %v784_v34, 0.0  ;;  %v848_v45 = vmul.f32 0.1, %v784_v34  ;;  %vm817_vm14 = vcmp.gt.f32.partialorder %v785_v35, 0.0  ;;  %v786_v48 = vadd.f32 %v8460_v37, %v747_v36  ;;  %v588_v18 = vld [vmem:[%s8429_s29 + $0x88] sm:$0xff] }
  0x4a   : > { %v849_v47 = vmul.f32 0.1, %v785_v35  ;;  %v748_v49 = vmul.f32 %v8448_v20, %v709_v41  ;;  %v879_v52 = vsel %vm815_vm12, %v783_v33, %v847_v44  ;;  %v710_v54 = vmin.f32 %v678_v42, 1.0  ;;  %v8580_v25 = vld [vmem:[#allocation2 + $0x38] sm:$0xff]  ;;  %v556_v29 = vld [vmem:[%s8424_s23 + $0x88] sm:$0xff] }
  0x4b   : > { %v880_v53 = vsel %vm816_vm13, %v784_v34, %v848_v45  ;;  %v647_v55 = vadd.f32 %v615_v24, %v551_v43  ;;  %7359 = vmatmul.mubr.msk.f32.vlgmr.msra.gmra.mxu1 %vm905_vm0, %v995_v40  ;;  %968 = vst.msk [vmem:[#allocation2 + $0x61] sm:$0xff] %vm905_vm0, %v879_v52  ;;  %vm818_vm15 = vcmp.gt.f32.partialorder %v786_v48, 0.0  ;;  %v850_v61 = vmul.f32 0.1, %v786_v48  ;;  %v589_v24 = vld [vmem:[%s8429_s29 + $0x90] sm:$0xff] }
  0x4c   : > { %969 = vst.msk [vmem:[#allocation2 + $0x69] sm:$0xff] %vm905_vm0, %v880_v53  ;;  %v881_v60 = vsel %vm817_vm14, %v785_v35, %v849_v47  ;;  %v787_v62 = vadd.f32 %v8460_v37, %v748_v49  ;;  %7361 = vmatprep.mubr.msk.f32.mxu1 %vm905_vm0, %v8534_v46  ;;  %v749_v4 = vmul.f32 %v8448_v20, %v710_v54  ;;  %v616_v6 = vmul.f32 0.15, %v584_v50  ;;  %v557_v34 = vld [vmem:[%s8424_s23 + $0x90] sm:$0xff] }
  0x4d   : > { %970 = vst.msk [vmem:[#allocation2 + $0x79] sm:$0xff] %vm905_vm0, %v881_v60  ;;  %v679_v5 = vmax.f32 %v647_v55, 0.0  ;;  %v617_v7 = vmul.f32 0.15, %v585_v51  ;;  %7457 = vmatpush3.msra.mxu1 %v8512_v14  ;;  %v882_v8 = vsel %vm818_vm15, %v786_v48, %v850_v61  ;;  %v618_v10 = vmul.f32 0.15, %v586_v58 }
  0x4e   : > { %vm819_vm1 = vcmp.gt.f32.partialorder %v787_v62, 0.0  ;;  %v851_v9 = vmul.f32 0.1, %v787_v62  ;;  %971 = vst.msk [vmem:[#allocation2 + $0x81] sm:$0xff] %vm905_vm0, %v882_v8  ;;  %v788_v12 = vadd.f32 %v8460_v37, %v749_v4  ;;  %v648_v15 = vadd.f32 %v616_v6, %v552_v56  ;;  %7556 = vmatprep.subr.mxu1 %v8562_v11  ;;  %v590_v48 = vld [vmem:[%s8429_s29 + $0x98] sm:$0xff] }
  0x4f   : > { %v711_v13 = vmin.f32 %v679_v5, 1.0  ;;  %v649_v16 = vadd.f32 %v617_v7, %v553_v57  ;;  %v8569_v14 = vld [vmem:[#allocation2 + $0x49] sm:$0xff]  ;;  %7362 = vmatmul.mubr.msk.f32.gmra.mxu1 %vm905_vm0, %v8546_v59  ;;  %v650_v22 = vadd.f32 %v618_v10, %v554_v63  ;;  %v619_v23 = vmul.f32 0.15, %v587_v0  ;;  %v558_v58 = vld [vmem:[%s8424_s23 + $0x98] sm:$0xff] }
  0x50   : > { %v8571_v19 = vld [vmem:[#allocation2 + $0x51] sm:$0xff]  ;;  %v883_v21 = vsel %vm819_vm1, %v787_v62, %v851_v9  ;;  %7317 = vmatprep.mubr.msk.f32.mxu0 %vm905_vm0, %v8569_v14  ;;  %7364 = vmatprep.mubr.msk.f32.mxu1 %vm905_vm0, %v8555_v1  ;;  %vm820_vm2 = vcmp.gt.f32.partialorder %v788_v12, 0.0  ;;  %v852_v26 = vmul.f32 0.1, %v788_v12  ;;  %v680_v28 = vmax.f32 %v648_v15, 0.0  ;;  %v8587_v30 = vld [vmem:[#allocation2 + $0x48] sm:$0xff] }
  0x51   : > { %972 = vst.msk [vmem:[#allocation2 + $0x91] sm:$0xff] %vm905_vm0, %v883_v21  ;;  %v750_v27 = vmul.f32 %v8448_v20, %v711_v13  ;;  %7318 = vmatmul.mubr.msk.f32.gmra.mxu0 %vm905_vm0, %v8571_v19  ;;  %v681_v31 = vmax.f32 %v649_v16, 0.0  ;;  %v682_v3 = vmax.f32 %v650_v22, 0.0  ;;  %v651_v32 = vadd.f32 %v619_v23, %v555_v17  ;;  %v8605_v49 = vld [vmem:[#allocation2 + $0x50] sm:$0xff]  ;;  %v591_v9 = vld [vmem:[%s8429_s29 + $0xa0] sm:$0xff] }
  0x52   : > { %v620_v33 = vmul.f32 0.15, %v588_v18  ;;  %v8590_v35 = vld [vmem:[#allocation2 + $0x61] sm:$0xff]  ;;  %v884_v38 = vsel %vm820_vm2, %v788_v12, %v852_v26  ;;  %v712_v40 = vmin.f32 %v680_v28, 1.0  ;;  %v621_v41 = vmul.f32 0.15, %v589_v24 }
  0x53   : > { %v8592_v36 = vld [vmem:[#allocation2 + $0x69] sm:$0xff]  ;;  %v789_v39 = vadd.f32 %v8460_v37, %v750_v27  ;;  %7320 = vmatprep.mubr.msk.f32.mxu0 %vm905_vm0, %v8590_v35  ;;  %7365 = vmatmul.mubr.msk.f32.gmra.mxu1 %vm905_vm0, %v8580_v25  ;;  %973 = vst.msk [vmem:[#allocation2 + $0x99] sm:$0xff] %vm905_vm0, %v884_v38  ;;  %v713_v43 = vmin.f32 %v681_v31, 1.0  ;;  %v714_v44 = vmin.f32 %v682_v3, 1.0  ;;  %v683_v45 = vmax.f32 %v651_v32, 0.0  ;;  %v8610_v53 = vld [vmem:[#allocation2 + $0x60] sm:$0xff] }
  0x54   : > { %v8597_v42 = vld [vmem:[#allocation2 + $0x79] sm:$0xff]  ;;  %v652_v47 = vadd.f32 %v620_v33, %v556_v29  ;;  %7367 = vmatprep.mubr.msk.f32.mxu1 %vm905_vm0, %v8587_v30  ;;  %v751_v51 = vmul.f32 %v8448_v20, %v712_v40  ;;  %v653_v52 = vadd.f32 %v621_v41, %v557_v34  ;;  %v622_v0 = vmul.f32 0.15, %v590_v48  ;;  %v8631_v12 = vld [vmem:[#allocation2 + $0x68] sm:$0xff]  ;;  %v593_v29 = vld [vmem:[%s8429_s29 + $0xb0] sm:$0xff] }
  0x55   : > { %vm821_vm3 = vcmp.gt.f32.partialorder %v789_v39, 0.0  ;;  %v853_v50 = vmul.f32 0.1, %v789_v39  ;;  %7321 = vmatmul.mubr.msk.f32.gmra.mxu0 %vm905_vm0, %v8592_v36  ;;  %v752_v54 = vmul.f32 %v8448_v20, %v713_v43  ;;  %v753_v55 = vmul.f32 %v8448_v20, %v714_v44  ;;  %v8617_v60 = vld [vmem:[#allocation2 + $0x81] sm:$0xff]  ;;  %v8633_v13 = vld [vmem:[#allocation2 + $0x78] sm:$0xff]  ;;  %v561_v38 = vld [vmem:[%s8424_s23 + $0xb0] sm:$0xff] }
  0x56   : > { %v715_v56 = vmin.f32 %v683_v45, 1.0  ;;  %v684_v57 = vmax.f32 %v652_v47, 0.0  ;;  %7323 = vmatprep.mubr.msk.f32.mxu0 %vm905_vm0, %v8597_v42  ;;  %v790_v62 = vadd.f32 %v8460_v37, %v751_v51  ;;  %v685_v63 = vmax.f32 %v653_v52, 0.0  ;;  %v559_v17 = vld [vmem:[%s8424_s23 + $0xa0] sm:$0xff]  ;;  %v592_v28 = vld [vmem:[%s8429_s29 + $0xa8] sm:$0xff]  ;;  %v594_v44 = vld [vmem:[%s8429_s29 + $0xb8] sm:$0xff] }
  0x57   : > { %v885_v61 = vsel %vm821_vm3, %v789_v39, %v853_v50  ;;  %7368 = vmatmul.mubr.msk.f32.gmra.mxu1 %vm905_vm0, %v8605_v49  ;;  %v791_v5 = vadd.f32 %v8460_v37, %v752_v54  ;;  %v792_v6 = vadd.f32 %v8460_v37, %v753_v55  ;;  %v654_v16 = vadd.f32 %v622_v0, %v558_v58  ;;  %v560_v34 = vld [vmem:[%s8424_s23 + $0xa8] sm:$0xff]  ;;  %v8656_v39 = vld [vmem:[#allocation2 + $0x80] sm:$0xff] }
  0x58   : > { %v8620_v4 = vld [vmem:[#allocation2 + $0x91] sm:$0xff]  ;;  %974 = vst.msk [vmem:[#allocation2 + $0xa9] sm:$0xff] %vm905_vm0, %v885_v61  ;;  %v754_v7 = vmul.f32 %v8448_v20, %v715_v56  ;;  %v716_v8 = vmin.f32 %v684_v57, 1.0  ;;  %7370 = vmatprep.mubr.msk.f32.mxu1 %vm905_vm0, %v8610_v53  ;;  %vm822_vm4 = vcmp.gt.f32.partialorder %v790_v62, 0.0  ;;  %v854_v10 = vmul.f32 0.1, %v790_v62 }
  0x59   : > { %v717_v15 = vmin.f32 %v685_v63, 1.0  ;;  %7324 = vmatmul.mubr.msk.f32.gmra.mxu0 %vm905_vm0, %v8617_v60  ;;  %vm823_vm5 = vcmp.gt.f32.partialorder %v791_v5, 0.0  ;;  %v855_v18 = vmul.f32 0.1, %v791_v5  ;;  %vm824_vm6 = vcmp.gt.f32.partialorder %v792_v6, 0.0  ;;  %v595_v45 = vld [vmem:[%s8429_s29 + $0xc0] sm:$0xff] }
  0x5a   : > { %v856_v21 = vmul.f32 0.1, %v792_v6  ;;  %7326 = vmatprep.mubr.msk.f32.mxu0 %vm905_vm0, %v8620_v4  ;;  %v8640_v22 = vld [vmem:[#allocation2 + $0x99] sm:$0xff]  ;;  %v886_v23 = vsel %vm822_vm4, %v790_v62, %v854_v10  ;;  %v793_v24 = vadd.f32 %v8460_v37, %v754_v7  ;;  %v755_v26 = vmul.f32 %v8448_v20, %v716_v8  ;;  %v8664_v47 = vld [vmem:[#allocation2 + $0x90] sm:$0xff] }
  0x5b   : > { %v756_v27 = vmul.f32 %v8448_v20, %v717_v15  ;;  %975 = vst.msk [vmem:[#allocation2 + $0xb1] sm:$0xff] %vm905_vm0, %v886_v23  ;;  %7371 = vmatmul.mubr.msk.f32.gmra.mxu1 %vm905_vm0, %v8631_v12  ;;  %v887_v31 = vsel %vm823_vm5, %v791_v5, %v855_v18  ;;  %v686_v32 = vmax.f32 %v654_v16, 0.0  ;;  %v623_v33 = vmul.f32 0.15, %v591_v9  ;;  %10746 = vst [vmem:[#allocation11_spill] sm:$0xff] %v8664_v47  ;;  %v562_v63 = vld [vmem:[%s8424_s23 + $0xb8] sm:$0xff] }
  0x5c   : > { %v888_v3 = vsel %vm824_vm6, %v792_v6, %v856_v21  ;;  %976 = vst.msk [vmem:[#allocation2 + $0xc1] sm:$0xff] %vm905_vm0, %v887_v31  ;;  %7373 = vmatprep.mubr.msk.f32.mxu1 %vm905_vm0, %v8633_v13  ;;  %vm825_vm7 = vcmp.gt.f32.partialorder %v793_v24, 0.0  ;;  %v857_v40 = vmul.f32 0.1, %v793_v24  ;;  %v794_v41 = vadd.f32 %v8460_v37, %v755_v26  ;;  %v563_v0 = vld [vmem:[%s8424_s23 + $0xc0] sm:$0xff]  ;;  %v596_v5 = vld [vmem:[%s8429_s29 + $0xc8] sm:$0xff] }
  0x5d   : > { %977 = vst.msk [vmem:[#allocation2 + $0xc9] sm:$0xff] %vm905_vm0, %v888_v3  ;;  %v795_v43 = vadd.f32 %v8460_v37, %v756_v27  ;;  %7327 = vmatmul.mubr.msk.f32.gmra.mxu0 %vm905_vm0, %v8640_v22  ;;  %v718_v48 = vmin.f32 %v686_v32, 1.0  ;;  %v655_v50 = vadd.f32 %v623_v33, %v559_v17  ;;  %v624_v51 = vmul.f32 0.15, %v592_v28  ;;  %v8679_v7 = vld [vmem:[#allocation2 + $0x98] sm:$0xff]  ;;  %v564_v28 = vld [vmem:[%s8424_s23 + $0xc8] sm:$0xff] }
  0x5e   : > { %v625_v52 = vmul.f32 0.15, %v593_v29  ;;  %v889_v55 = vsel %vm825_vm7, %v793_v24, %v857_v40  ;;  %vm826_vm8 = vcmp.gt.f32.partialorder %v794_v41, 0.0  ;;  %v858_v56 = vmul.f32 0.1, %v794_v41  ;;  %10747 = vst [vmem:[#allocation12_spill] sm:$0xff] %v8679_v7 }
  0x5f   : > { %v8666_v54 = vld [vmem:[#allocation2 + $0xa9] sm:$0xff]  ;;  %vm827_vm9 = vcmp.gt.f32.partialorder %v795_v43, 0.0  ;;  %7374 = vmatmul.mubr.msk.f32.gmra.mxu1 %vm905_vm0, %v8656_v39  ;;  %978 = vst.msk [vmem:[#allocation2 + $0xd9] sm:$0xff] %vm905_vm0, %v889_v55  ;;  %v859_v57 = vmul.f32 0.1, %v795_v43  ;;  %v757_v58 = vmul.f32 %v8448_v20, %v718_v48  ;;  %v687_v61 = vmax.f32 %v655_v50, 0.0 }
  0x60   : > { %7329 = vmatprep.mubr.msk.f32.mxu0 %vm905_vm0, %v8666_v54  ;;  %v656_v62 = vadd.f32 %v624_v51, %v560_v34  ;;  %7376 = vmatprep.mubr.msk.f32.mxu1 %vm905_vm0, %v8664_v47  ;;  %v890_v6 = vsel %vm826_vm8, %v794_v41, %v858_v56  ;;  %v657_v8 = vadd.f32 %v625_v52, %v561_v38  ;;  %v626_v9 = vmul.f32 0.15, %v594_v44  ;;  %v8683_v16 = vld [vmem:[#allocation2 + $0xa8] sm:$0xff]  ;;  %v601_v31 = vld [vmem:[%s8429_s29 + $0xf0] sm:$0xff]  ;;  %v602_v56 = vld [vmem:[%s8429_s29 + $0xf8] sm:$0xff]  ;;  %s8094_s29 = sshll.u32 %s8154_s25, 4  ;;  %s8095_s29 = int_to_ptr.vmem [resolvable:$false] %s8094_s29 }
  0x61   : > { %v627_v10 = vmul.f32 0.15, %v595_v45  ;;  %979 = vst.msk [vmem:[#allocation2 + $0xe1] sm:$0xff] %vm905_vm0, %v890_v6  ;;  %v891_v15 = vsel %vm827_vm9, %v795_v43, %v859_v57  ;;  %10748 = vst [vmem:[#allocation13_spill] sm:$0xff] %v8683_v16  ;;  %v796_v17 = vadd.f32 %v8460_v37, %v757_v58  ;;  %v719_v18 = vmin.f32 %v687_v61, 1.0  ;;  %v569_v34 = vld [vmem:[%s8424_s23 + $0xf0] sm:$0xff] }
  0x62   : > { %v688_v21 = vmax.f32 %v656_v62, 0.0  ;;  %v8686_v23 = vld [vmem:[#allocation2 + $0xb1] sm:$0xff]  ;;  %980 = vst.msk [vmem:[#allocation2 + $0xf1] sm:$0xff] %vm905_vm0, %v891_v15  ;;  %v689_v24 = vmax.f32 %v657_v8, 0.0  ;;  %v658_v26 = vadd.f32 %v626_v9, %v562_v63  ;;  %v628_v29 = vmul.f32 0.15, %v596_v5 }
  0x63   : > { %v659_v27 = vadd.f32 %v627_v10, %v563_v0  ;;  %7330 = vmatmul.mubr.msk.f32.gmra.mxu0 %vm905_vm0, %v8686_v23  ;;  %v8693_v3 = vld [vmem:[#allocation2 + $0xc1] sm:$0xff]  ;;  %7377 = vmatmul.mubr.msk.f32.gmra.mxu1 %vm905_vm0, %v8679_v7  ;;  %vm828_vm10 = vcmp.gt.f32.partialorder %v796_v17, 0.0  ;;  %v860_v32 = vmul.f32 0.1, %v796_v17  ;;  %v758_v33 = vmul.f32 %v8448_v20, %v719_v18  ;;  %v8705_v40 = vld [vmem:[#allocation2 + $0xb0] sm:$0xff]  ;;  %s8096_s19 = scalar_lea.vmem %s8095_s29, 32 }
  0x64   : > { %7332 = vmatprep.mubr.msk.f32.mxu0 %vm905_vm0, %v8693_v3  ;;  %v8701_v38 = vld [vmem:[#allocation2 + $0xc9] sm:$0xff]  ;;  %7379 = vmatprep.mubr.msk.f32.mxu1 %vm905_vm0, %v8683_v16  ;;  %10749 = vst [vmem:[#allocation14_spill] sm:$0xff] %v8705_v40  ;;  %v720_v41 = vmin.f32 %v688_v21, 1.0  ;;  %v721_v43 = vmin.f32 %v689_v24, 1.0  ;;  %v690_v44 = vmax.f32 %v658_v26, 0.0  ;;  %v8708_v51 = vld [vmem:[#allocation2 + $0xc0] sm:$0xff]  ;;  %v660_v52 = vadd.f32 %v628_v29, %v564_v28 }
  0x65   : > { %v691_v45 = vmax.f32 %v659_v27, 0.0  ;;  %v892_v48 = vsel %vm828_vm10, %v796_v17, %v860_v32  ;;  %v797_v50 = vadd.f32 %v8460_v37, %v758_v33  ;;  %10750 = vst [vmem:[#allocation15_spill] sm:$0xff] %v8708_v51  ;;  %v633_v55 = vmul.f32 0.15, %v601_v31  ;;  %v8727_v10 = vld [vmem:[#allocation2 + $0xc8] sm:$0xff]  ;;  %v570_v31 = vld [vmem:[%s8424_s23 + $0xf8] sm:$0xff] }
  0x66   : > { %v8711_v57 = vld [vmem:[#allocation2 + $0xd9] sm:$0xff]  ;;  %981 = vst.msk [vmem:[#allocation2 + $0xf9] sm:$0xff] %vm905_vm0, %v892_v48  ;;  %v759_v58 = vmul.f32 %v8448_v20, %v720_v41  ;;  %v760_v61 = vmul.f32 %v8448_v20, %v721_v43  ;;  %v722_v62 = vmin.f32 %v690_v44, 1.0  ;;  %v692_v5 = vmax.f32 %v660_v52, 0.0  ;;  %10751 = vst [vmem:[#allocation16_spill] sm:$0xff] %v8727_v10  ;;  %s527_s23 = sand.u32 1, %s8142_s22  }
  0x67   : > { %v723_v63 = vmin.f32 %v691_v45, 1.0  ;;  %7333 = vmatmul.mubr.msk.f32.gmra.mxu0 %vm905_vm0, %v8701_v38  ;;  %7380 = vmatmul.mubr.msk.f32.gmra.mxu1 %vm905_vm0, %v8705_v40  ;;  %vm829_vm11 = vcmp.gt.f32.partialorder %v797_v50, 0.0  ;;  %v861_v0 = vmul.f32 0.1, %v797_v50  ;;  %v665_v6 = vadd.f32 %v633_v55, %v569_v34  ;;  %v8733_v26 = vld [vmem:[#allocation2 + $0xd8] sm:$0xff]  ;;  %s528_s26 = scalar_lea.vmem [#allocation5], %s527_s23 }
  0x68   : > { %7335 = vmatprep.mubr.msk.f32.mxu0 %vm905_vm0, %v8711_v57  ;;  %v8722_v8 = vld [vmem:[#allocation2 + $0xe1] sm:$0xff]  ;;  %7382 = vmatprep.mubr.msk.f32.mxu1 %vm905_vm0, %v8708_v51  ;;  %v798_v9 = vadd.f32 %v8460_v37, %v759_v58  ;;  %v799_v15 = vadd.f32 %v8460_v37, %v760_v61  ;;  %v761_v17 = vmul.f32 %v8448_v20, %v722_v62  ;;  %v634_v18 = vmul.f32 0.15, %v602_v56  ;;  %s6322_s28 = sshll.u32 %s528_s26, 4  ;;  %s6310_s1 = scalar_lea.sflag [#allocation6], %s527_s23  ;;  %s6323_s28 = int_to_ptr.vmem [resolvable:$true] %s6322_s28 }
  0x69   : > { %v8731_v21 = vld [vmem:[#allocation2 + $0xf1] sm:$0xff]  ;;  %v893_v24 = vsel %vm829_vm11, %v797_v50, %v861_v0  ;;  %10752 = vst [vmem:[#allocation17_spill] sm:$0xff] %v8733_v26  ;;  %v762_v27 = vmul.f32 %v8448_v20, %v723_v63  ;;  %v724_v28 = vmin.f32 %v692_v5, 1.0  ;;  %v697_v29 = vmax.f32 %v665_v6, 0.0  ;;  %v8749_v50 = vld [vmem:[#allocation2 + $0xe0] sm:$0xff]  ;;  %s8090_s2 = scalar_lea.vmem %s6323_s28, 16  ;;  %p8097_p0 = scmp.lt.s32.totalorder %s6323_s28, %s8095_s29 }
  0x6a   : > { %982 = vst.msk [vmem:[#allocation2 + $0x109] sm:$0xff] %vm905_vm0, %v893_v24  ;;  %vm830_vm12 = vcmp.gt.f32.partialorder %v798_v9, 0.0  ;;  %v862_v32 = vmul.f32 0.1, %v798_v9  ;;  %vm831_vm13 = vcmp.gt.f32.partialorder %v799_v15, 0.0  ;;  %v800_v34 = vadd.f32 %v8460_v37, %v761_v17  ;;  %10753 = vst [vmem:[#allocation18_spill] sm:$0xff] %v8749_v50  ;;  %p8091_p11 = scmp.ne.s32.totalorder %s6323_s28, %s8090_s2  ;;  %p8098_p1 = scmp.lt.s32.totalorder %s8096_s19, %s8090_s2 }
  0x6b   : > { %v863_v33 = vmul.f32 0.1, %v799_v15  ;;  %7336 = vmatmul.mubr.msk.f32.gmra.mxu0 %vm905_vm0, %v8722_v8  ;;  %7383 = vmatmul.mubr.msk.f32.gmra.mxu1 %vm905_vm0, %v8727_v10  ;;  %v801_v41 = vadd.f32 %v8460_v37, %v762_v27  ;;  %v763_v43 = vmul.f32 %v8448_v20, %v724_v28  ;;  %v729_v44 = vmin.f32 %v697_v29, 1.0  ;;  %v8755_v58 = vld [vmem:[#allocation2 + $0xf0] sm:$0xff]  ;;  %v8953_v2 = vld [vmem:[#allocation2 + $0xe2] sm:$0xff] }
  0x6c   : > { %7338 = vmatprep.mubr.msk.f32.mxu0 %vm905_vm0, %v8731_v21  ;;  %v894_v45 = vsel %vm830_vm12, %v798_v9, %v862_v32  ;;  %7385 = vmatprep.mubr.msk.f32.mxu1 %vm905_vm0, %v8733_v26  ;;  %v666_v52 = vadd.f32 %v634_v18, %v570_v31  ;;  %vm832_vm14 = vcmp.gt.f32.partialorder %v800_v34, 0.0  ;;  %v864_v56 = vmul.f32 0.1, %v800_v34  ;;  %10754 = vst [vmem:[#allocation19_spill] sm:$0xff] %v8755_v58  ;;  %p8092_p12 = pnand %p8091_p11, %p8278_p5  ;;  %p8099_p2 = por %p8098_p1, %p8097_p0 }
  0x6d   : > { %v895_v48 = vsel %vm831_vm13, %v799_v15, %v863_v33  ;;  %v8751_v55 = vld [vmem:[#allocation2 + $0xf9] sm:$0xff]  ;;  %983 = vst.msk [vmem:[#allocation2 + $0x111] sm:$0xff] %vm905_vm0, %v894_v45  ;;  %vm833_vm15 = vcmp.gt.f32.partialorder %v801_v41, 0.0  ;;  %v802_v61 = vadd.f32 %v8460_v37, %v763_v43  ;;  %v865_v62 = vmul.f32 0.1, %v801_v41 }
  0x6e   : > { %984 = vst.msk [vmem:[#allocation2 + $0x121] sm:$0xff] %vm905_vm0, %v895_v48  ;;  %v768_v63 = vmul.f32 %v8448_v20, %v729_v44  ;;  %v698_v0 = vmax.f32 %v666_v52, 0.0  ;;  %v896_v5 = vsel %vm832_vm14, %v800_v34, %v864_v56  ;;  %v8766_v15 = vld [vmem:[#allocation2 + $0xf8] sm:$0xff]  ;;  %vm4627_vm4 = vcmask 517120   ;;  %p8093_p13 = pneg %p8092_p12 }
  0x6f   : > { %7339 = vmatmul.mubr.msk.f32.gmra.mxu0 %vm905_vm0, %v8751_v55  ;;  %7386 = vmatmul.mubr.msk.f32.gmra.mxu1 %vm905_vm0, %v8749_v50  ;;  %vm834_vm1 = vcmp.gt.f32.partialorder %v802_v61, 0.0  ;;  %v866_v6 = vmul.f32 0.1, %v802_v61  ;;  %985 = vst.msk [vmem:[#allocation2 + $0x129] sm:$0xff] %vm905_vm0, %v896_v5  ;;  %v897_v9 = vsel %vm833_vm15, %v801_v41, %v865_v62  ;;  %10755 = vst [vmem:[#allocation20_spill] sm:$0xff] %v8766_v15  ;;  %v1703_v62 = vld [vmem:[#allocation2 + $0x2] sm:$0xff] }
  0x70   : > { %7388 = vmatprep.mubr.msk.f32.mxu1 %vm905_vm0, %v8755_v58  ;;  %v807_v17 = vadd.f32 %v8460_v37, %v768_v63  ;;  %v730_v18 = vmin.f32 %v698_v0, 1.0  ;;  %986 = vst.msk [vmem:[#allocation2 + $0x139] sm:$0xff] %vm905_vm0, %v897_v9  ;;  %v8823_v0 = vld [vmem:[#allocation2 + $0x150] sm:$0xff]  ;;  %v8832_v9 = vld [vmem:[#allocation2 + $0x158] sm:$0xff]  ;;  %p8100_p3 = pnand %p8099_p2, %p8093_p13 }
  0x71   : > { %v8769_v24 = vld [vmem:[#allocation2 + $0x109] sm:$0xff]  ;;  %v898_v27 = vsel %vm834_vm1, %v802_v61, %v866_v6  ;;  %10762 = vst [vmem:[#allocation27_spill] sm:$0xff] %v8823_v0  ;;  %v8826_v6 = vld [vmem:[#allocation2 + $0x1a] sm:$0xff] }
  0x72   : > { %v8772_v28 = vld [vmem:[#allocation2 + $0x108] sm:$0xff]  ;;  %7341 = vmatprep.mubr.msk.f32.mxu0 %vm905_vm0, %v8769_v24  ;;  %987 = vst.msk [vmem:[#allocation2 + $0x141] sm:$0xff] %vm905_vm0, %v898_v27  ;;  %vm839_vm2 = vcmp.gt.f32.partialorder %v807_v17, 0.0  ;;  %v871_v29 = vmul.f32 0.1, %v807_v17  ;;  %v769_v31 = vmul.f32 %v8448_v20, %v730_v18  ;;  %v8089_v27 = vld [vmem:[%s10696_s4 + $0x20] sm:$0xff] }
  0x73   : > { %10756 = vst [vmem:[#allocation21_spill] sm:$0xff] %v8772_v28  ;;  %7389 = vmatmul.mubr.msk.f32.gmra.mxu1 %vm905_vm0, %v8766_v15  ;;  %v1704_v5 = vld [vmem:[#allocation2 + $0xa] sm:$0xff] }
  0x74   : > { %v8780_v32 = vld [vmem:[#allocation2 + $0x111] sm:$0xff]  ;;  %7391 = vmatprep.mubr.msk.f32.mxu1 %vm905_vm0, %v8772_v28  ;;  %v903_v41 = vsel %vm839_vm2, %v807_v17, %v871_v29  ;;  %v808_v43 = vadd.f32 %v8460_v37, %v769_v31  ;;  %v8840_v18 = vld [vmem:[#allocation2 + $0x168] sm:$0xff]  ;;  %vm8153_vm2 = vmmov 0  }
  0x75   : > { %v8782_v33 = vld [vmem:[#allocation2 + $0x121] sm:$0xff]  ;;  %v8786_v34 = vld [vmem:[#allocation2 + $0x110] sm:$0xff]  ;;  %7342 = vmatmul.mubr.msk.f32.gmra.mxu0 %vm905_vm0, %v8780_v32  ;;  %992 = vst.msk [vmem:[#allocation2 + $0x181] sm:$0xff] %vm905_vm0, %v903_v41  ;;  %10763 = vst [vmem:[#allocation28_spill] sm:$0xff] %v8840_v18 }
  0x76   : > { %10757 = vst [vmem:[#allocation22_spill] sm:$0xff] %v8786_v34  ;;  %v8791_v44 = vld [vmem:[#allocation2 + $0x120] sm:$0xff]  ;;  %7344 = vmatprep.mubr.msk.f32.mxu0 %vm905_vm0, %v8782_v33  ;;  %vm840_vm3 = vcmp.gt.f32.partialorder %v808_v43, 0.0  ;;  %v872_v20 = vmul.f32 0.1, %v808_v43  ;;  %v8796_v45 = vld [vmem:[#allocation2 + $0x129] sm:$0xff] }
  0x77   : > { %10758 = vst [vmem:[#allocation23_spill] sm:$0xff] %v8791_v44  ;;  %7392 = vmatmul.mubr.msk.f32.gmra.mxu1 %vm905_vm0, %v8786_v34  ;;  %v8800_v48 = vld [vmem:[#allocation2 + $0x139] sm:$0xff]  ;;  %v8804_v37 = vld [vmem:[#allocation2 + $0x128] sm:$0xff]  ;;  %v8837_v17 = vld [vmem:[%s10696_s4 + $0x30] sm:$0xff] }
  0x78   : > { %7394 = vmatprep.mubr.msk.f32.mxu1 %vm905_vm0, %v8791_v44  ;;  %10759 = vst [vmem:[#allocation24_spill] sm:$0xff] %v8804_v37  ;;  %v904_v52 = vsel %vm840_vm3, %v808_v43, %v872_v20  ;;  %v8808_v56 = vld [vmem:[#allocation2 + $0x138] sm:$0xff]  ;;  %v8847_v29 = vld [vmem:[#allocation2 + $0x22] sm:$0xff]  ;;  %v8856_v41 = vld [vmem:[#allocation2 + $0x170] sm:$0xff]  ;;  %vm6307_vm3 = vcmask 73728  }
  0x79   : > { %7345 = vmatmul.mubr.msk.f32.gmra.mxu0 %vm905_vm0, %v8796_v45  ;;  %10760 = vst [vmem:[#allocation25_spill] sm:$0xff] %v8808_v56  ;;  %993 = vst.msk [vmem:[#allocation2 + $0x189] sm:$0xff] %vm905_vm0, %v904_v52  ;;  %v8813_v61 = vld [vmem:[#allocation2 + $0x141] sm:$0xff]  ;;  %v8849_v31 = vld [vmem:[#allocation2 + $0x32] sm:$0xff] }
  0x7a   : > { %7347 = vmatprep.mubr.msk.f32.mxu0 %vm905_vm0, %v8800_v48  ;;  %v8819_v63 = vld [vmem:[#allocation2 + $0x140] sm:$0xff]  ;;  %v8864_v20 = vld [vmem:[#allocation2 + $0x4a] sm:$0xff]  ;;  %v8874_v52 = vld [vmem:[#allocation2 + $0x52] sm:$0xff] }
  0x7b   : > { %7395 = vmatmul.mubr.msk.f32.gmra.mxu1 %vm905_vm0, %v8804_v37  ;;  %10761 = vst [vmem:[#allocation26_spill] sm:$0xff] %v8819_v63  ;;  %v8862_v43 = vld [vmem:[#allocation2 + $0x3a] sm:$0xff] }
  0x7c   : > { %7397 = vmatprep.mubr.msk.f32.mxu1 %vm905_vm0, %v8808_v56 }
  0x7d   : > { %7348 = vmatmul.mubr.msk.f32.gmra.mxu0 %vm905_vm0, %v8813_v61 }
  0x7e   : > { %7408 = vmatprep.mubr.msk.f32.mxu0 %vm905_vm0, %v1703_v62  ;;  %v8879_v62 = vld [vmem:[%s10696_s4 + $0x38] sm:$0xff] }
  0x7f   : > { %7398 = vmatmul.mubr.msk.f32.gmra.mxu1 %vm905_vm0, %v8819_v63 }
  0x80   : > { %7400 = vmatprep.mubr.msk.f32.mxu1 %vm905_vm0, %v8823_v0 }
  0x81   : > { %7409 = vmatmul.mubr.msk.f32.vlgmr.msra.gmra.mxu0 %vm905_vm0, %v1704_v5  ;;  %v8881_v5 = vld [vmem:[#allocation2 + $0x62] sm:$0xff] }
  0x82   : > { %7507 = vmatpush3.msra.mxu0 %v8089_v27  ;;  %7411 = vmatprep.mubr.msk.f32.mxu0 %vm905_vm0, %v8826_v6  ;;  %v8895_v27 = vld [vmem:[#allocation2 + $0x7a] sm:$0xff] }
  0x83   : > { %7401 = vmatmul.mubr.msk.f32.gmra.mxu1 %vm905_vm0, %v8832_v9  ;;  %7606 = vmatprep.subr.mxu0 %v8837_v17 }
  0x84   : > { %7403 = vmatprep.mubr.msk.f32.mxu1 %vm905_vm0, %v8840_v18 }
  0x85   : > { %7412 = vmatmul.mubr.msk.f32.gmra.mxu0 %vm905_vm0, %v8847_v29 }
  0x86   : > { %7414 = vmatprep.mubr.msk.f32.mxu0 %vm905_vm0, %v8849_v31 }
  0x87   : > { %7404 = vmatmul.mubr.msk.f32.gmra.mxu1 %vm905_vm0, %v8856_v41 }
  0x88   : > { %7458 = vmatprep.mubr.msk.f32.mxu1 %vm905_vm0, %v8534_v46  ;;  %v8893_v46 = vld [vmem:[#allocation2 + $0x6a] sm:$0xff] }
  0x89   : > { %7415 = vmatmul.mubr.msk.f32.gmra.mxu0 %vm905_vm0, %v8862_v43 }
  0x8a   : > { %7417 = vmatprep.mubr.msk.f32.mxu0 %vm905_vm0, %v8864_v20 }
  0x8b   : > { %7459 = vmatmul.mubr.msk.f32.vlgmr.msra.gmra.mxu1 %vm905_vm0, %v8546_v59  ;;  %v8905_v59 = vld [vmem:[#allocation2 + $0x82] sm:$0xff] }
  0x8c   : > { %7461 = vmatprep.mubr.msk.f32.mxu1 %vm905_vm0, %v8555_v1  ;;  %7557 = vmatpush3.msra.mxu1 %v8562_v11  ;;  %v8907_v1 = vld [vmem:[#allocation2 + $0x92] sm:$0xff]  ;;  %v8917_v11 = vld [vmem:[#allocation2 + $0x9a] sm:$0xff] }
  0x8d   : > { %7418 = vmatmul.mubr.msk.f32.gmra.mxu0 %vm905_vm0, %v8874_v52  ;;  %7656 = vmatprep.subr.mxu1 %v8879_v62 }
  0x8e   : > { %7420 = vmatprep.mubr.msk.f32.mxu0 %vm905_vm0, %v8881_v5 }
  0x8f   : > { %7462 = vmatmul.mubr.msk.f32.gmra.mxu1 %vm905_vm0, %v8580_v25  ;;  %v8919_v25 = vld [vmem:[#allocation2 + $0xaa] sm:$0xff] }
  0x90   : > { %7464 = vmatprep.mubr.msk.f32.mxu1 %vm905_vm0, %v8587_v30  ;;  %v8929_v30 = vld [vmem:[#allocation2 + $0xb2] sm:$0xff] }
  0x91   : > { %7421 = vmatmul.mubr.msk.f32.gmra.mxu0 %vm905_vm0, %v8893_v46 }
  0x92   : > { %7423 = vmatprep.mubr.msk.f32.mxu0 %vm905_vm0, %v8895_v27 }
  0x93   : > { %7465 = vmatmul.mubr.msk.f32.gmra.mxu1 %vm905_vm0, %v8605_v49  ;;  %v8931_v49 = vld [vmem:[#allocation2 + $0xc2] sm:$0xff] }
  0x94   : > { %7467 = vmatprep.mubr.msk.f32.mxu1 %vm905_vm0, %v8610_v53  ;;  %v8941_v53 = vld [vmem:[#allocation2 + $0xca] sm:$0xff] }
  0x95   : > { %7424 = vmatmul.mubr.msk.f32.gmra.mxu0 %vm905_vm0, %v8905_v59 }
  0x96   : > { %7426 = vmatprep.mubr.msk.f32.mxu0 %vm905_vm0, %v8907_v1 }
  0x97   : > { %7468 = vmatmul.mubr.msk.f32.gmra.mxu1 %vm905_vm0, %v8631_v12  ;;  %v8943_v12 = vld [vmem:[#allocation2 + $0xda] sm:$0xff] }
  0x98   : > { %7470 = vmatprep.mubr.msk.f32.mxu1 %vm905_vm0, %v8633_v13 }
  0x99   : > { %7427 = vmatmul.mubr.msk.f32.gmra.mxu0 %vm905_vm0, %v8917_v11 }
  0x9a   : > { %7429 = vmatprep.mubr.msk.f32.mxu0 %vm905_vm0, %v8919_v25 }
  0x9b   : > { %7471 = vmatmul.mubr.msk.f32.gmra.mxu1 %vm905_vm0, %v8656_v39 }
  0x9c   : > { %7473 = vmatprep.mubr.msk.f32.mxu1 %vm905_vm0, %v8664_v47  ;;  %v8955_v47 = vld [vmem:[#allocation2 + $0xf2] sm:$0xff] }
  0x9d   : > { %7430 = vmatmul.mubr.msk.f32.gmra.mxu0 %vm905_vm0, %v8929_v30 }
  0x9e   : > { %7432 = vmatprep.mubr.msk.f32.mxu0 %vm905_vm0, %v8931_v49 }
  0x9f   : > { %7474 = vmatmul.mubr.msk.f32.gmra.mxu1 %vm905_vm0, %v8679_v7  ;;  %v8967_v7 = vld [vmem:[#allocation2 + $0x10a] sm:$0xff] }
  0xa0   : > { %7476 = vmatprep.mubr.msk.f32.mxu1 %vm905_vm0, %v8683_v16  ;;  %v8965_v16 = vld [vmem:[#allocation2 + $0xfa] sm:$0xff] }
  0xa1   : > { %7433 = vmatmul.mubr.msk.f32.gmra.mxu0 %vm905_vm0, %v8941_v53 }
  0xa2   : > { %7435 = vmatprep.mubr.msk.f32.mxu0 %vm905_vm0, %v8943_v12 }
  0xa3   : > { %7477 = vmatmul.mubr.msk.f32.gmra.mxu1 %vm905_vm0, %v8705_v40  ;;  %v8979_v40 = vld [vmem:[#allocation2 + $0x122] sm:$0xff] }
  0xa4   : > { %7479 = vmatprep.mubr.msk.f32.mxu1 %vm905_vm0, %v8708_v51  ;;  %v8977_v51 = vld [vmem:[#allocation2 + $0x112] sm:$0xff] }
  0xa5   : > { %7436 = vmatmul.mubr.msk.f32.gmra.mxu0 %vm905_vm0, %v8953_v2 }
  0xa6   : > { %7438 = vmatprep.mubr.msk.f32.mxu0 %vm905_vm0, %v8955_v47 }
  0xa7   : > { %7480 = vmatmul.mubr.msk.f32.gmra.mxu1 %vm905_vm0, %v8727_v10  ;;  %v8991_v10 = vld [vmem:[#allocation2 + $0x13a] sm:$0xff] }
  0xa8   : > { %7482 = vmatprep.mubr.msk.f32.mxu1 %vm905_vm0, %v8733_v26  ;;  %v8989_v26 = vld [vmem:[#allocation2 + $0x12a] sm:$0xff] }
  0xa9   : > { %7439 = vmatmul.mubr.msk.f32.gmra.mxu0 %vm905_vm0, %v8965_v16 }
  0xaa   : > { %7441 = vmatprep.mubr.msk.f32.mxu0 %vm905_vm0, %v8967_v7 }
  0xab   : > { %7483 = vmatmul.mubr.msk.f32.gmra.mxu1 %vm905_vm0, %v8749_v50  ;;  %v9003_v50 = vld [vmem:[#allocation2 + $0x152] sm:$0xff] }
  0xac   : > { %7485 = vmatprep.mubr.msk.f32.mxu1 %vm905_vm0, %v8755_v58  ;;  %v9001_v58 = vld [vmem:[#allocation2 + $0x142] sm:$0xff] }
  0xad   : > { %7442 = vmatmul.mubr.msk.f32.gmra.mxu0 %vm905_vm0, %v8977_v51 }
  0xae   : > { %7444 = vmatprep.mubr.msk.f32.mxu0 %vm905_vm0, %v8979_v40 }
  0xaf   : > { %7486 = vmatmul.mubr.msk.f32.gmra.mxu1 %vm905_vm0, %v8766_v15  ;;  %v9015_v15 = vld [vmem:[#allocation2 + $0x16a] sm:$0xff] }
  0xb0   : > { %7488 = vmatprep.mubr.msk.f32.mxu1 %vm905_vm0, %v8772_v28  ;;  %v9013_v28 = vld [vmem:[#allocation2 + $0x15a] sm:$0xff] }
  0xb1   : > { %7445 = vmatmul.mubr.msk.f32.gmra.mxu0 %vm905_vm0, %v8989_v26 }
  0xb2   : > { %7447 = vmatprep.mubr.msk.f32.mxu0 %vm905_vm0, %v8991_v10 }
  0xb3   : > { %7489 = vmatmul.mubr.msk.f32.gmra.mxu1 %vm905_vm0, %v8786_v34  ;;  %v2477_v34 = vld [vmem:[#allocation2 + $0x19] sm:$0xff] }
  0xb4   : > { %7491 = vmatprep.mubr.msk.f32.mxu1 %vm905_vm0, %v8791_v44  ;;  %v9025_v44 = vld [vmem:[#allocation2 + $0x172] sm:$0xff] }
  0xb5   : > { %7448 = vmatmul.mubr.msk.f32.gmra.mxu0 %vm905_vm0, %v9001_v58 }
  0xb6   : > { %7450 = vmatprep.mubr.msk.f32.mxu0 %vm905_vm0, %v9003_v50 }
  0xb7   : > { %7492 = vmatmul.mubr.msk.f32.gmra.mxu1 %vm905_vm0, %v8804_v37  ;;  %v9034_v37 = vld [vmem:[#allocation2 + $0x31] sm:$0xff] }
  0xb8   : > { %7494 = vmatprep.mubr.msk.f32.mxu1 %vm905_vm0, %v8808_v56  ;;  %v2478_v56 = vld [vmem:[#allocation2 + $0x21] sm:$0xff] }
  0xb9   : > { %7451 = vmatmul.mubr.msk.f32.gmra.mxu0 %vm905_vm0, %v9013_v28 }
  0xba   : > { %7453 = vmatprep.mubr.msk.f32.mxu0 %vm905_vm0, %v9015_v15 }
  0xbb   : > { %7495 = vmatmul.mubr.msk.f32.gmra.mxu1 %vm905_vm0, %v8819_v63  ;;  %v9043_v63 = vld [vmem:[%s10696_s4 + $0x40] sm:$0xff] }
  0xbc   : > { %7497 = vmatprep.mubr.msk.f32.mxu1 %vm905_vm0, %v8823_v0  ;;  %v9046_v0 = vld [vmem:[#allocation2 + $0x180] sm:$0xff] }
  0xbd   : > { %7454 = vmatmul.mubr.msk.f32.gmra.mxu0 %vm905_vm0, %v9025_v44 }
  0xbe   : > { %7508 = vmatprep.mubr.msk.f32.mxu0 %vm905_vm0, %v2477_v34  ;;  %v9051_v34 = vld [vmem:[#allocation2 + $0x39] sm:$0xff] }
  0xbf   : > { %7498 = vmatmul.mubr.msk.f32.gmra.mxu1 %vm905_vm0, %v8832_v9 }
  0xc0   : > { %7500 = vmatprep.mubr.msk.f32.mxu1 %vm905_vm0, %v8840_v18  ;;  %v9058_v18 = vld [vmem:[#allocation2 + $0x188] sm:$0xff] }
  0xc1   : > { %7509 = vmatmul.mubr.msk.f32.vlgmr.msra.gmra.mxu0 %vm905_vm0, %v2478_v56 }
  0xc2   : > { %7607 = vmatpush3.msra.mxu0 %v8837_v17  ;;  %7511 = vmatprep.mubr.msk.f32.mxu0 %vm905_vm0, %v9034_v37 }
  0xc3   : > { %7501 = vmatmul.mubr.msk.f32.gmra.mxu1 %vm905_vm0, %v8856_v41  ;;  %7706 = vmatprep.subr.mxu0 %v9043_v63 }
  0xc4   : > { %7503 = vmatprep.mubr.msk.f32.mxu1 %vm905_vm0, %v9046_v0 }
  0xc5   : > { %7512 = vmatmul.mubr.msk.f32.gmra.mxu0 %vm905_vm0, %v9051_v34 }
  0xc6   : > { %7514 = vmatprep.mubr.msk.f32.mxu0 %vm905_vm0, %v8569_v14  ;;  %v9145_v14 = vld [vmem:[#allocation2 + $0x151] sm:$0xff] }
  0xc7   : > { %7504 = vmatmul.mubr.msk.f32.gmra.mxu1 %vm905_vm0, %v9058_v18 }
  0xc8   : > { %7558 = vmatprep.mubr.msk.f32.mxu1 %vm905_vm0, %v8826_v6 }
  0xc9   : > { %7515 = vmatmul.mubr.msk.f32.gmra.mxu0 %vm905_vm0, %v8571_v19  ;;  %v9157_v19 = vld [vmem:[#allocation2 + $0x169] sm:$0xff] }
  0xca   : > { %7517 = vmatprep.mubr.msk.f32.mxu0 %vm905_vm0, %v8590_v35  ;;  %v9167_v35 = vld [vmem:[#allocation2 + $0x171] sm:$0xff] }
  0xcb   : > { %7559 = vmatmul.mubr.msk.f32.vlgmr.msra.gmra.mxu1 %vm905_vm0, %v8847_v29 }
  0xcc   : > { %7561 = vmatprep.mubr.msk.f32.mxu1 %vm905_vm0, %v8849_v31  ;;  %7657 = vmatpush3.msra.mxu1 %v8879_v62 }
  0xcd   : > { %7518 = vmatmul.mubr.msk.f32.gmra.mxu0 %vm905_vm0, %v8592_v36  ;;  %v9169_v36 = vld [vmem:[#allocation2 + $0x181] sm:$0xff] }
  0xce   : > { %7520 = vmatprep.mubr.msk.f32.mxu0 %vm905_vm0, %v8597_v42  ;;  %v9179_v42 = vld [vmem:[#allocation2 + $0x189] sm:$0xff] }
  0xcf   : > { %7562 = vmatmul.mubr.msk.f32.gmra.mxu1 %vm905_vm0, %v8862_v43 }
  0xd0   : > { %7564 = vmatprep.mubr.msk.f32.mxu1 %vm905_vm0, %v8864_v20 }
  0xd1   : > { %7521 = vmatmul.mubr.msk.f32.gmra.mxu0 %vm905_vm0, %v8617_v60  ;;  %v3252_v60 = vld [vmem:[#allocation2 + $0x30] sm:$0xff] }
  0xd2   : > { %7523 = vmatprep.mubr.msk.f32.mxu0 %vm905_vm0, %v8620_v4 }
  0xd3   : > { %7565 = vmatmul.mubr.msk.f32.gmra.mxu1 %vm905_vm0, %v8874_v52 }
  0xd4   : > { %7567 = vmatprep.mubr.msk.f32.mxu1 %vm905_vm0, %v8881_v5 }
  0xd5   : > { %7524 = vmatmul.mubr.msk.f32.gmra.mxu0 %vm905_vm0, %v8640_v22  ;;  %v3253_v22 = vld [vmem:[#allocation2 + $0x38] sm:$0xff] }
  0xd6   : > { %7526 = vmatprep.mubr.msk.f32.mxu0 %vm905_vm0, %v8666_v54 }
  0xd7   : > { %7568 = vmatmul.mubr.msk.f32.gmra.mxu1 %vm905_vm0, %v8893_v46 }
  0xd8   : > { %7570 = vmatprep.mubr.msk.f32.mxu1 %vm905_vm0, %v8895_v27 }
  0xd9   : > { %7527 = vmatmul.mubr.msk.f32.gmra.mxu0 %vm905_vm0, %v8686_v23  ;;  %v3255_v23 = vld [vmem:[#allocation2 + $0x50] sm:$0xff] }
  0xda   : > { %7529 = vmatprep.mubr.msk.f32.mxu0 %vm905_vm0, %v8693_v3 }
  0xdb   : > { %7571 = vmatmul.mubr.msk.f32.gmra.mxu1 %vm905_vm0, %v8905_v59 }
  0xdc   : > { %7573 = vmatprep.mubr.msk.f32.mxu1 %vm905_vm0, %v8907_v1  ;;  %v3646_v1 = vld [vmem:[#allocation2 + $0x81] sm:$0xff] }
  0xdd   : > { %7530 = vmatmul.mubr.msk.f32.gmra.mxu0 %vm905_vm0, %v8701_v38  ;;  %v3256_v38 = vld [vmem:[#allocation2 + $0x60] sm:$0xff] }
  0xde   : > { %7532 = vmatprep.mubr.msk.f32.mxu0 %vm905_vm0, %v8711_v57 }
  0xdf   : > { %7574 = vmatmul.mubr.msk.f32.gmra.mxu1 %vm905_vm0, %v8917_v11  ;;  %v10767_v11 = vld [vmem:[#allocation14_spill] sm:$0xff] }
  0xe0   : > { %7576 = vmatprep.mubr.msk.f32.mxu1 %vm905_vm0, %v8919_v25 }
  0xe1   : > { %7533 = vmatmul.mubr.msk.f32.gmra.mxu0 %vm905_vm0, %v8722_v8  ;;  %v3257_v8 = vld [vmem:[#allocation2 + $0x68] sm:$0xff] }
  0xe2   : > { %7535 = vmatprep.mubr.msk.f32.mxu0 %vm905_vm0, %v8731_v21 }
  0xe3   : > { %7577 = vmatmul.mubr.msk.f32.gmra.mxu1 %vm905_vm0, %v8929_v30 }
  0xe4   : > { %7579 = vmatprep.mubr.msk.f32.mxu1 %vm905_vm0, %v8931_v49  ;;  %v3647_v49 = vld [vmem:[#allocation2 + $0x91] sm:$0xff] }
  0xe5   : > { %7536 = vmatmul.mubr.msk.f32.gmra.mxu0 %vm905_vm0, %v8751_v55 }
  0xe6   : > { %7538 = vmatprep.mubr.msk.f32.mxu0 %vm905_vm0, %v8769_v24 }
  0xe7   : > { %7580 = vmatmul.mubr.msk.f32.gmra.mxu1 %vm905_vm0, %v8941_v53  ;;  %v10768_v53 = vld [vmem:[#allocation15_spill] sm:$0xff] }
  0xe8   : > { %7582 = vmatprep.mubr.msk.f32.mxu1 %vm905_vm0, %v8943_v12 }
  0xe9   : > { %7539 = vmatmul.mubr.msk.f32.gmra.mxu0 %vm905_vm0, %v8780_v32  ;;  %v3643_v32 = vld [vmem:[#allocation2 + $0x61] sm:$0xff] }
  0xea   : > { %7541 = vmatprep.mubr.msk.f32.mxu0 %vm905_vm0, %v8782_v33  ;;  %v10764_v33 = vld [vmem:[#allocation11_spill] sm:$0xff] }
  0xeb   : > { %7583 = vmatmul.mubr.msk.f32.gmra.mxu1 %vm905_vm0, %v8953_v2  ;;  %v9155_v2 = vld [vmem:[#allocation2 + $0x159] sm:$0xff] }
  0xec   : > { %7585 = vmatprep.mubr.msk.f32.mxu1 %vm905_vm0, %v8955_v47  ;;  %v3254_v47 = vld [vmem:[#allocation2 + $0x48] sm:$0xff] }
  0xed   : > { %7542 = vmatmul.mubr.msk.f32.gmra.mxu0 %vm905_vm0, %v8796_v45 }
  0xee   : > { %7544 = vmatprep.mubr.msk.f32.mxu0 %vm905_vm0, %v8800_v48  ;;  %v3644_v48 = vld [vmem:[#allocation2 + $0x69] sm:$0xff] }
  0xef   : > { %7586 = vmatmul.mubr.msk.f32.gmra.mxu1 %vm905_vm0, %v8965_v16  ;;  %v9193_v16 = vld [vmem:[#allocation2 + $0x182] sm:$0xff] }
  0xf0   : > { %7588 = vmatprep.mubr.msk.f32.mxu1 %vm905_vm0, %v8967_v7 }
  0xf1   : > { %7545 = vmatmul.mubr.msk.f32.gmra.mxu0 %vm905_vm0, %v8813_v61  ;;  %v3645_v61 = vld [vmem:[#allocation2 + $0x79] sm:$0xff] }
  0xf2   : > { %7547 = vmatprep.mubr.msk.f32.mxu0 %vm905_vm0, %v9145_v14 }
  0xf3   : > { %7589 = vmatmul.mubr.msk.f32.gmra.mxu1 %vm905_vm0, %v8977_v51  ;;  %v9205_v51 = vld [vmem:[#allocation2 + $0x18a] sm:$0xff] }
  0xf4   : > { %7591 = vmatprep.mubr.msk.f32.mxu1 %vm905_vm0, %v8979_v40  ;;  %v7310_v4 = vpop.f32.mrf.mxu0 }
  0xf5   : > { %7548 = vmatmul.mubr.msk.f32.gmra.mxu0 %vm905_vm0, %v9155_v2 }
  0xf6   : > { %7550 = vmatprep.mubr.msk.f32.mxu0 %vm905_vm0, %v9157_v19  ;;  %v1223_v54 = vpop.f32.mrf.mxu0 }
  0xf7   : > { %7592 = vmatmul.mubr.msk.f32.gmra.mxu1 %vm905_vm0, %v8989_v26 }
  0xf8   : > { %7594 = vmatprep.mubr.msk.f32.mxu1 %vm905_vm0, %v8991_v10 }
  0xf9   : > { %7551 = vmatmul.mubr.msk.f32.gmra.mxu0 %vm905_vm0, %v9167_v35 }
  0xfa   : > { %7553 = vmatprep.mubr.msk.f32.mxu0 %vm905_vm0, %v9169_v36 }
  0xfb   : > { %7595 = vmatmul.mubr.msk.f32.gmra.mxu1 %vm905_vm0, %v9001_v58 }
  0xfc   : > { %7597 = vmatprep.mubr.msk.f32.mxu1 %vm905_vm0, %v9003_v50  ;;  %v3641_v50 = vld [vmem:[#allocation2 + $0x49] sm:$0xff] }
  0xfd   : > { %7554 = vmatmul.mubr.msk.f32.gmra.mxu0 %vm905_vm0, %v9179_v42 }
  0xfe   : > { %7608 = vmatprep.mubr.msk.f32.mxu0 %vm905_vm0, %v3252_v60 }
  0xff   : > { %7598 = vmatmul.mubr.msk.f32.gmra.mxu1 %vm905_vm0, %v9013_v28 }
 0x100   : > { %7600 = vmatprep.mubr.msk.f32.mxu1 %vm905_vm0, %v9015_v15  ;;  %v7313_v7 = vpop.f32.mrf.mxu0  ;;  %v3642_v15 = vld [vmem:[#allocation2 + $0x51] sm:$0xff] }
 0x101   : > { %7609 = vmatmul.mubr.msk.f32.vlgmr.msra.gmra.mxu0 %vm905_vm0, %v3253_v22  ;;  %v3648_v22 = vld [vmem:[#allocation2 + $0x99] sm:$0xff] }
 0x102   : > { %7707 = vmatpush3.msra.mxu0 %v9043_v63  ;;  %7611 = vmatprep.mubr.msk.f32.mxu0 %vm905_vm0, %v3254_v47  ;;  %v9197_v3 = vpop.f32.mrf.mxu1  ;;  %v1233_v57 = vpop.f32.mrf.mxu0  ;;  %v10766_v63 = vld [vmem:[#allocation13_spill] sm:$0xff]  ;;  %v10769_v47 = vld [vmem:[#allocation16_spill] sm:$0xff] }
 0x103   : > { %7601 = vmatmul.mubr.msk.f32.gmra.mxu1 %vm905_vm0, %v9025_v44 }
 0x104   : > { %v9201_v40 = vpop.f32.mrf.mxu1  ;;  %7603 = vmatprep.mubr.msk.f32.mxu1 %vm905_vm0, %v9193_v16 }
 0x105   : > { %7612 = vmatmul.mubr.msk.f32.gmra.mxu0 %vm905_vm0, %v3255_v23  ;;  %v3649_v23 = vld [vmem:[#allocation2 + $0xa9] sm:$0xff] }
 0x106   : > { %7614 = vmatprep.mubr.msk.f32.mxu0 %vm905_vm0, %v3256_v38  ;;  %v10770_v38 = vld [vmem:[#allocation17_spill] sm:$0xff] }
 0x107   : > { %v9209_v10 = vpop.f32.mrf.mxu1  ;;  %7604 = vmatmul.mubr.msk.f32.gmra.mxu1 %vm905_vm0, %v9205_v51  ;;  %v7316_v21 = vpop.f32.mrf.mxu0 }
 0x108   : > { %7658 = vmatprep.mubr.msk.f32.mxu1 %vm905_vm0, %v9034_v37  ;;  %v10765_v37 = vld [vmem:[#allocation12_spill] sm:$0xff] }
 0x109   : > { %7615 = vmatmul.mubr.msk.f32.gmra.mxu0 %vm905_vm0, %v3257_v8  ;;  %v9216_v26 = vpop.f32.mrf.mxu1  ;;  %v1243_v24 = vpop.f32.mrf.mxu0 }
 0x10a   : > { %7617 = vmatprep.mubr.msk.f32.mxu0 %vm905_vm0, %v8633_v13 }
 0x10b   : > { %v7360_v55 = vpop.f32.mrf.mxu1  ;;  %7659 = vmatmul.mubr.msk.f32.vlgmr.msra.gmra.mxu1 %vm905_vm0, %v9051_v34 }
 0x10c   : > { %v9222_v58 = vadd.f32 %v7360_v55, %v7310_v4  ;;  %7661 = vmatprep.mubr.msk.f32.mxu1 %vm905_vm0, %v3641_v50  ;;  %v3650_v55 = vld [vmem:[#allocation2 + $0xb1] sm:$0xff] }
 0x10d   : > { %7618 = vmatmul.mubr.msk.f32.gmra.mxu0 %vm905_vm0, %v8656_v39  ;;  %v1544_v28 = vpop.f32.mrf.mxu1 }
 0x10e   : > { %7620 = vmatprep.mubr.msk.f32.mxu0 %vm905_vm0, %v10764_v33  ;;  %v9229_v44 = vadd.f32 %v1544_v28, %v1223_v54  ;;  %v10772_v33 = vld [vmem:[#allocation19_spill] sm:$0xff] }
 0x10f   : > { %v7363_v13 = vpop.f32.mrf.mxu1  ;;  %7662 = vmatmul.mubr.msk.f32.gmra.mxu1 %vm905_vm0, %v3642_v15  ;;  %v10771_v15 = vld [vmem:[#allocation18_spill] sm:$0xff] }
 0x110   : > { %v9232_v45 = vadd.f32 %v7363_v13, %v7313_v7  ;;  %7664 = vmatprep.mubr.msk.f32.mxu1 %vm905_vm0, %v3643_v32  ;;  %v3651_v32 = vld [vmem:[#allocation2 + $0xc1] sm:$0xff] }
 0x111   : > { %7621 = vmatmul.mubr.msk.f32.gmra.mxu0 %vm905_vm0, %v10765_v37  ;;  %v7319_v39 = vpop.f32.mrf.mxu0  ;;  %v1554_v56 = vpop.f32.mrf.mxu1 }
 0x112   : > { %7623 = vmatprep.mubr.msk.f32.mxu0 %vm905_vm0, %v10766_v63  ;;  %v9239_v6 = vadd.f32 %v1554_v56, %v1233_v57  ;;  %v3652_v56 = vld [vmem:[#allocation2 + $0xc9] sm:$0xff] }
 0x113   : > { %v1253_v17 = vpop.f32.mrf.mxu0  ;;  %v7366_v29 = vpop.f32.mrf.mxu1  ;;  %7665 = vmatmul.mubr.msk.f32.gmra.mxu1 %vm905_vm0, %v3644_v48 }
 0x114   : > { %v9242_v62 = vadd.f32 %v7366_v29, %v7316_v21  ;;  %7667 = vmatprep.mubr.msk.f32.mxu1 %vm905_vm0, %v3645_v61  ;;  %v10773_v61 = vld [vmem:[#allocation20_spill] sm:$0xff]  ;;  %v10774_v29 = vld [vmem:[#allocation21_spill] sm:$0xff] }
 0x115   : > { %7624 = vmatmul.mubr.msk.f32.gmra.mxu0 %vm905_vm0, %v10767_v11  ;;  %v7322_v25 = vpop.f32.mrf.mxu0  ;;  %v1564_v30 = vpop.f32.mrf.mxu1 }
 0x116   : > { %7626 = vmatprep.mubr.msk.f32.mxu0 %vm905_vm0, %v10768_v53  ;;  %v9249_v12 = vadd.f32 %v1564_v30, %v1243_v24  ;;  %v10775_v53 = vld [vmem:[#allocation22_spill] sm:$0xff] }
 0x117   : > { %v1263_v34 = vpop.f32.mrf.mxu0  ;;  %v7369_v60 = vpop.f32.mrf.mxu1  ;;  %7668 = vmatmul.mubr.msk.f32.gmra.mxu1 %vm905_vm0, %v3646_v1 }
 0x118   : > { %v9252_v4 = vadd.f32 %v7369_v60, %v7319_v39  ;;  %7670 = vmatprep.mubr.msk.f32.mxu1 %vm905_vm0, %v3647_v49  ;;  %v3654_v49 = vld [vmem:[#allocation2 + $0xe1] sm:$0xff] }
 0x119   : > { %7627 = vmatmul.mubr.msk.f32.gmra.mxu0 %vm905_vm0, %v10769_v47  ;;  %v7325_v54 = vpop.f32.mrf.mxu0  ;;  %v1574_v7 = vpop.f32.mrf.mxu1  ;;  %v10776_v47 = vld [vmem:[#allocation23_spill] sm:$0xff] }
 0x11a   : > { %7629 = vmatprep.mubr.msk.f32.mxu0 %vm905_vm0, %v10770_v38  ;;  %v9259_v57 = vadd.f32 %v1574_v7, %v1253_v17  ;;  %v3653_v17 = vld [vmem:[#allocation2 + $0xd9] sm:$0xff] }
 0x11b   : > { %v1273_v8 = vpop.f32.mrf.mxu0  ;;  %v7372_v21 = vpop.f32.mrf.mxu1  ;;  %7671 = vmatmul.mubr.msk.f32.gmra.mxu1 %vm905_vm0, %v3648_v22  ;;  %v3655_v22 = vld [vmem:[#allocation2 + $0xf1] sm:$0xff] }
 0x11c   : > { %v9262_v50 = vadd.f32 %v7372_v21, %v7322_v25  ;;  %7673 = vmatprep.mubr.msk.f32.mxu1 %vm905_vm0, %v3649_v23  ;;  %v10777_v21 = vld [vmem:[#allocation24_spill] sm:$0xff] }
 0x11d   : > { %7630 = vmatmul.mubr.msk.f32.gmra.mxu0 %vm905_vm0, %v10771_v15  ;;  %v7328_v24 = vpop.f32.mrf.mxu0  ;;  %v1584_v28 = vpop.f32.mrf.mxu1 }
 0x11e   : > { %7632 = vmatprep.mubr.msk.f32.mxu0 %vm905_vm0, %v10772_v33  ;;  %v9269_v13 = vadd.f32 %v1584_v28, %v1263_v34  ;;  %v10778_v28 = vld [vmem:[#allocation25_spill] sm:$0xff] }
 0x11f   : > { %v1283_v48 = vpop.f32.mrf.mxu0  ;;  %v7375_v37 = vpop.f32.mrf.mxu1  ;;  %7674 = vmatmul.mubr.msk.f32.gmra.mxu1 %vm905_vm0, %v3650_v55 }
 0x120   : > { %v9272_v39 = vadd.f32 %v7375_v37, %v7325_v54  ;;  %7676 = vmatprep.mubr.msk.f32.mxu1 %vm905_vm0, %v3651_v32 }
 0x121   : > { %7633 = vmatmul.mubr.msk.f32.gmra.mxu0 %vm905_vm0, %v10773_v61  ;;  %v1594_v63 = vpop.f32.mrf.mxu1  ;;  %v10779_v61 = vld [vmem:[#allocation26_spill] sm:$0xff] }
 0x122   : > { %7635 = vmatprep.mubr.msk.f32.mxu0 %vm905_vm0, %v10774_v29  ;;  %v9279_v1 = vadd.f32 %v1594_v63, %v1273_v8  ;;  %v3656_v8 = vld [vmem:[#allocation2 + $0xf9] sm:$0xff]  ;;  %v3659_v29 = vld [vmem:[#allocation2 + $0x121] sm:$0xff] }
 0x123   : > { %v7331_v11 = vpop.f32.mrf.mxu0  ;;  %v7378_v25 = vpop.f32.mrf.mxu1  ;;  %7677 = vmatmul.mubr.msk.f32.gmra.mxu1 %vm905_vm0, %v3652_v56  ;;  %v3658_v56 = vld [vmem:[#allocation2 + $0x111] sm:$0xff] }
 0x124   : > { %v9282_v30 = vadd.f32 %v7378_v25, %v7328_v24  ;;  %7679 = vmatprep.mubr.msk.f32.mxu1 %vm905_vm0, %v3653_v17  ;;  %v3657_v24 = vld [vmem:[#allocation2 + $0x109] sm:$0xff] }
 0x125   : > { %7636 = vmatmul.mubr.msk.f32.gmra.mxu0 %vm905_vm0, %v10775_v53  ;;  %v1293_v34 = vpop.f32.mrf.mxu0  ;;  %v1604_v60 = vpop.f32.mrf.mxu1 }
 0x126   : > { %7638 = vmatprep.mubr.msk.f32.mxu0 %vm905_vm0, %v10776_v47  ;;  %v9289_v54 = vadd.f32 %v1604_v60, %v1283_v48  ;;  %v3661_v47 = vld [vmem:[#allocation2 + $0x139] sm:$0xff] }
 0x127   : > { %v7334_v7 = vpop.f32.mrf.mxu0  ;;  %v7381_v23 = vpop.f32.mrf.mxu1  ;;  %7680 = vmatmul.mubr.msk.f32.gmra.mxu1 %vm905_vm0, %v3654_v49 }
 0x128   : > { %v9292_v38 = vadd.f32 %v7381_v23, %v7331_v11  ;;  %7682 = vmatprep.mubr.msk.f32.mxu1 %vm905_vm0, %v3655_v22  ;;  %v10780_v11 = vld [vmem:[#allocation27_spill] sm:$0xff] }
 0x129   : > { %7639 = vmatmul.mubr.msk.f32.gmra.mxu0 %vm905_vm0, %v10777_v21  ;;  %v9297_v55 = vpop.f32.mrf.mxu0  ;;  %v1614_v15 = vpop.f32.mrf.mxu1  ;;  %v3662_v21 = vld [vmem:[#allocation2 + $0x141] sm:$0xff] }
 0x12a   : > { %7641 = vmatprep.mubr.msk.f32.mxu0 %vm905_vm0, %v10778_v28  ;;  %v9301_v32 = vadd.f32 %v1614_v15, %v1293_v34  ;;  %v3660_v34 = vld [vmem:[#allocation2 + $0x129] sm:$0xff]  ;;  %v3282_v28 = vld [vmem:[#allocation2 + $0x198] sm:$0xff] }
 0x12b   : > { %v7337_v33 = vpop.f32.mrf.mxu0  ;;  %v7384_v48 = vpop.f32.mrf.mxu1  ;;  %7683 = vmatmul.mubr.msk.f32.gmra.mxu1 %vm905_vm0, %v3656_v8 }
 0x12c   : > { %v9304_v37 = vadd.f32 %v7384_v48, %v7334_v7  ;;  %7685 = vmatprep.mubr.msk.f32.mxu1 %vm905_vm0, %v3657_v24  ;;  %v10781_v7 = vld [vmem:[#allocation28_spill] sm:$0xff] }
 0x12d   : > { %7642 = vmatmul.mubr.msk.f32.gmra.mxu0 %vm905_vm0, %v10779_v61  ;;  %v9309_v63 = vpop.f32.mrf.mxu0  ;;  %v9311_v17 = vpop.f32.mrf.mxu1 }
 0x12e   : > { %7644 = vmatprep.mubr.msk.f32.mxu0 %vm905_vm0, %v10780_v11 }
 0x12f   : > { %v7340_v25 = vpop.f32.mrf.mxu0  ;;  %v7387_v49 = vpop.f32.mrf.mxu1  ;;  %7686 = vmatmul.mubr.msk.f32.gmra.mxu1 %vm905_vm0, %v3658_v56 }
 0x130   : > { %v9316_v53 = vadd.f32 %v7387_v49, %v7337_v33  ;;  %7688 = vmatprep.mubr.msk.f32.mxu1 %vm905_vm0, %v3659_v29 }
 0x131   : > { %7645 = vmatmul.mubr.msk.f32.gmra.mxu0 %vm905_vm0, %v8832_v9  ;;  %v9321_v60 = vpop.f32.mrf.mxu0  ;;  %v9323_v22 = vpop.f32.mrf.mxu1 }
 0x132   : > { %7647 = vmatprep.mubr.msk.f32.mxu0 %vm905_vm0, %v10781_v7 }
 0x133   : > { %v7390_v23 = vpop.f32.mrf.mxu1  ;;  %7689 = vmatmul.mubr.msk.f32.gmra.mxu1 %vm905_vm0, %v3660_v34 }
 0x134   : > { %v9328_v8 = vadd.f32 %v7390_v23, %v7340_v25  ;;  %7691 = vmatprep.mubr.msk.f32.mxu1 %vm905_vm0, %v3661_v47  ;;  %v3669_v47 = vld [vmem:[#allocation2 + $0x199] sm:$0xff] }
 0x135   : > { %v7343_v15 = vpop.f32.mrf.mxu0  ;;  %7648 = vmatmul.mubr.msk.f32.gmra.mxu0 %vm905_vm0, %v8856_v41  ;;  %v9333_v9 = vpop.f32.mrf.mxu1 }
 0x136   : > { %7650 = vmatprep.mubr.msk.f32.mxu0 %vm905_vm0, %v9046_v0  ;;  %v3283_v0 = vld [vmem:[#allocation2 + $0x1a0] sm:$0xff] }
 0x137   : > { %v9337_v24 = vpop.f32.mrf.mxu0  ;;  %v7393_v33 = vpop.f32.mrf.mxu1  ;;  %7692 = vmatmul.mubr.msk.f32.gmra.mxu1 %vm905_vm0, %v3662_v21 }
 0x138   : > { %v9340_v48 = vadd.f32 %v7393_v33, %v7343_v15  ;;  %7694 = vmatprep.mubr.msk.f32.mxu1 %vm905_vm0, %v9145_v14  ;;  %v4034_v33 = vld [vmem:[#allocation2 + $0x92] sm:$0xff] }
 0x139   : > { %v7346_v56 = vpop.f32.mrf.mxu0  ;;  %7651 = vmatmul.mubr.msk.f32.gmra.mxu0 %vm905_vm0, %v9058_v18  ;;  %v9346_v41 = vpop.f32.mrf.mxu1 }
 0x13a   : > { %7653 = vmatprep.mubr.msk.f32.mxu0 %vm905_vm0, %v3282_v28 }
 0x13b   : > { %v9349_v61 = vpop.f32.mrf.mxu0  ;;  %v7396_v29 = vpop.f32.mrf.mxu1  ;;  %7695 = vmatmul.mubr.msk.f32.gmra.mxu1 %vm905_vm0, %v9155_v2 }
 0x13c   : > { %v9353_v11 = vadd.f32 %v7396_v29, %v7346_v56  ;;  %7697 = vmatprep.mubr.msk.f32.mxu1 %vm905_vm0, %v9157_v19 }
 0x13d   : > { %v7349_v14 = vpop.f32.mrf.mxu0  ;;  %7654 = vmatmul.mubr.msk.f32.gmra.mxu0 %vm905_vm0, %v3283_v0  ;;  %v9358_v18 = vpop.f32.mrf.mxu1 }
 0x13e   : > { %7708 = vmatprep.mubr.msk.f32.mxu0 %vm905_vm0, %v8849_v31 }
 0x13f   : > { %v9362_v25 = vpop.f32.mrf.mxu0  ;;  %v7399_v49 = vpop.f32.mrf.mxu1  ;;  %7698 = vmatmul.mubr.msk.f32.gmra.mxu1 %vm905_vm0, %v9167_v35 }
 0x140   : > { %v9366_v2 = vadd.f32 %v7399_v49, %v7349_v14  ;;  %7700 = vmatprep.mubr.msk.f32.mxu1 %vm905_vm0, %v9169_v36  ;;  %v4036_v14 = vld [vmem:[#allocation2 + $0xaa] sm:$0xff] }
 0x141   : > { %v7410_v19 = vpop.f32.mrf.mxu0  ;;  %7709 = vmatmul.mubr.msk.f32.vlgmr.msra.gmra.mxu0 %vm905_vm0, %v8862_v43  ;;  %v9372_v34 = vpop.f32.mrf.mxu1  ;;  %v3670_v43 = vld [vmem:[#allocation2 + $0x1a1] sm:$0xff] }
 0x142   : > { %v2059_v31 = vadd.f32 %v7410_v19, %v9222_v58  ;;  %7711 = vmatprep.mubr.msk.f32.mxu0 %vm905_vm0, %v8864_v20 }
 0x143   : > { %v1899_v7 = vpop.f32.mrf.mxu0  ;;  %v7402_v23 = vpop.f32.mrf.mxu1  ;;  %7701 = vmatmul.mubr.msk.f32.gmra.mxu1 %vm905_vm0, %v9179_v42 }
 0x144   : > { %v9380_v35 = vadd.f32 %v1899_v7, %v9229_v44  ;;  %v9383_v36 = vadd.f32 %v7402_v23, %v9197_v3  ;;  %7703 = vmatprep.mubr.msk.f32.mxu1 %vm905_vm0, %v3669_v47  ;;  %v4038_v23 = vld [vmem:[#allocation2 + $0xc2] sm:$0xff] }
 0x145   : > { %v7413_v21 = vpop.f32.mrf.mxu0  ;;  %7712 = vmatmul.mubr.msk.f32.gmra.mxu0 %vm905_vm0, %v8874_v52  ;;  %v9388_v58 = vpop.f32.mrf.mxu1 }
 0x146   : > { %10782 = vst [vmem:[#allocation11_spill] sm:$0xff] %v9380_v35  ;;  %v2061_v20 = vadd.f32 %v7413_v21, %v9232_v45  ;;  %7714 = vmatprep.mubr.msk.f32.mxu0 %vm905_vm0, %v8881_v5 }
 0x147   : > { %v1909_v42 = vpop.f32.mrf.mxu0  ;;  %v7405_v44 = vpop.f32.mrf.mxu1  ;;  %7704 = vmatmul.mubr.msk.f32.gmra.mxu1 %vm905_vm0, %v3670_v43 }
 0x148   : > { %v9395_v3 = vadd.f32 %v1909_v42, %v9239_v6  ;;  %v9398_v15 = vadd.f32 %v7405_v44, %v9209_v10 }
 0x149   : > { %v7416_v28 = vpop.f32.mrf.mxu0  ;;  %7715 = vmatmul.mubr.msk.f32.gmra.mxu0 %vm905_vm0, %v8893_v46  ;;  %v9402_v52 = vpop.f32.mrf.mxu1 }
 0x14a   : > { %10783 = vst [vmem:[#allocation12_spill] sm:$0xff] %v9395_v3  ;;  %v2063_v45 = vadd.f32 %v7416_v28, %v9242_v62  ;;  %7717 = vmatprep.mubr.msk.f32.mxu0 %vm905_vm0, %v8895_v27  ;;  %v4035_v62 = vld [vmem:[#allocation2 + $0x9a] sm:$0xff] }
 0x14b   : > { %v1919_v5 = vpop.f32.mrf.mxu0  ;;  %v7460_v56 = vpop.f32.mrf.mxu1 }
 0x14c   : > { %v9408_v6 = vadd.f32 %v1919_v5, %v9249_v12  ;;  %v9410_v0 = vadd.f32 %v7460_v56, %v2059_v31  ;;  %v4040_v5 = vld [vmem:[#allocation2 + $0xda] sm:$0xff] }
 0x14d   : > { %v7419_v10 = vpop.f32.mrf.mxu0  ;;  %7718 = vmatmul.mubr.msk.f32.gmra.mxu0 %vm905_vm0, %v8905_v59  ;;  %v9414_v46 = vpop.f32.mrf.mxu1 }
 0x14e   : > { %10784 = vst [vmem:[#allocation13_spill] sm:$0xff] %v9408_v6  ;;  %10785 = vst [vmem:[#allocation14_spill] sm:$0xff] %v9414_v46  ;;  %v2065_v29 = vadd.f32 %v7419_v10, %v9252_v4  ;;  %7720 = vmatprep.mubr.msk.f32.mxu0 %vm905_vm0, %v4034_v33  ;;  %v4037_v4 = vld [vmem:[#allocation2 + $0xb2] sm:$0xff] }
 0x14f   : > { %v1929_v27 = vpop.f32.mrf.mxu0  ;;  %v7463_v49 = vpop.f32.mrf.mxu1 }
 0x150   : > { %v9419_v19 = vadd.f32 %v1929_v27, %v9259_v57  ;;  %v9421_v12 = vadd.f32 %v7463_v49, %v2061_v20 }
 0x151   : > { %v7422_v47 = vpop.f32.mrf.mxu0  ;;  %7721 = vmatmul.mubr.msk.f32.gmra.mxu0 %vm905_vm0, %v4035_v62  ;;  %v9424_v31 = vpop.f32.mrf.mxu1 }
 0x152   : > { %10786 = vst [vmem:[#allocation15_spill] sm:$0xff] %v9419_v19  ;;  %10787 = vst [vmem:[#allocation16_spill] sm:$0xff] %v9424_v31  ;;  %v2067_v59 = vadd.f32 %v7422_v47, %v9262_v50  ;;  %7723 = vmatprep.mubr.msk.f32.mxu0 %vm905_vm0, %v4036_v14  ;;  %v4039_v50 = vld [vmem:[#allocation2 + $0xca] sm:$0xff]  ;;  %v4042_v14 = vld [vmem:[#allocation2 + $0xf2] sm:$0xff] }
 0x153   : > { %v1939_v7 = vpop.f32.mrf.mxu0  ;;  %v7466_v43 = vpop.f32.mrf.mxu1 }
 0x154   : > { %v9429_v21 = vadd.f32 %v1939_v7, %v9269_v13  ;;  %v9431_v57 = vadd.f32 %v7466_v43, %v2063_v45  ;;  %v4044_v43 = vld [vmem:[#allocation2 + $0x10a] sm:$0xff] }
 0x155   : > { %v7425_v20 = vpop.f32.mrf.mxu0  ;;  %7724 = vmatmul.mubr.msk.f32.gmra.mxu0 %vm905_vm0, %v4037_v4  ;;  %v9434_v42 = vpop.f32.mrf.mxu1 }
 0x156   : > { %10788 = vst [vmem:[#allocation17_spill] sm:$0xff] %v9429_v21  ;;  %10789 = vst [vmem:[#allocation18_spill] sm:$0xff] %v9434_v42  ;;  %v2069_v44 = vadd.f32 %v7425_v20, %v9272_v39  ;;  %7726 = vmatprep.mubr.msk.f32.mxu0 %vm905_vm0, %v4038_v23  ;;  %v4041_v39 = vld [vmem:[#allocation2 + $0xe2] sm:$0xff] }
 0x157   : > { %v1949_v28 = vpop.f32.mrf.mxu0  ;;  %v7469_v33 = vpop.f32.mrf.mxu1 }
 0x158   : > { %v9439_v56 = vadd.f32 %v1949_v28, %v9279_v1  ;;  %v9441_v13 = vadd.f32 %v7469_v33, %v2065_v29 }
 0x159   : > { %v7428_v45 = vpop.f32.mrf.mxu0  ;;  %7727 = vmatmul.mubr.msk.f32.gmra.mxu0 %vm905_vm0, %v4039_v50  ;;  %v9444_v10 = vpop.f32.mrf.mxu1 }
 0x15a   : > { %10790 = vst [vmem:[#allocation19_spill] sm:$0xff] %v9444_v10  ;;  %v2071_v62 = vadd.f32 %v7428_v45, %v9282_v30  ;;  %7729 = vmatprep.mubr.msk.f32.mxu0 %vm905_vm0, %v4040_v5  ;;  %v4043_v30 = vld [vmem:[#allocation2 + $0xfa] sm:$0xff]  ;;  %v4046_v45 = vld [vmem:[#allocation2 + $0x122] sm:$0xff] }
 0x15b   : > { %v1959_v27 = vpop.f32.mrf.mxu0  ;;  %v7472_v49 = vpop.f32.mrf.mxu1 }
 0x15c   : > { %v9449_v47 = vadd.f32 %v1959_v27, %v9289_v54  ;;  %v9451_v1 = vadd.f32 %v7472_v49, %v2067_v59  ;;  %v4047_v49 = vld [vmem:[#allocation2 + $0x12a] sm:$0xff] }
 0x15d   : > { %v7431_v29 = vpop.f32.mrf.mxu0  ;;  %7730 = vmatmul.mubr.msk.f32.gmra.mxu0 %vm905_vm0, %v4041_v39  ;;  %v9454_v4 = vpop.f32.mrf.mxu1 }
 0x15e   : > { %10791 = vst [vmem:[#allocation20_spill] sm:$0xff] %v9454_v4  ;;  %v2073_v7 = vadd.f32 %v7431_v29, %v9292_v38  ;;  %7732 = vmatprep.mubr.msk.f32.mxu0 %vm905_vm0, %v4042_v14  ;;  %v4045_v38 = vld [vmem:[#allocation2 + $0x112] sm:$0xff]  ;;  %v4048_v29 = vld [vmem:[#allocation2 + $0x13a] sm:$0xff] }
 0x15f   : > { %v1969_v23 = vpop.f32.mrf.mxu0  ;;  %v7475_v20 = vpop.f32.mrf.mxu1 }
 0x160   : > { %v9459_v50 = vadd.f32 %v1969_v23, %v9301_v32  ;;  %v9461_v54 = vadd.f32 %v7475_v20, %v2069_v44 }
 0x161   : > { %v7434_v59 = vpop.f32.mrf.mxu0  ;;  %7733 = vmatmul.mubr.msk.f32.gmra.mxu0 %vm905_vm0, %v4043_v30  ;;  %v9464_v28 = vpop.f32.mrf.mxu1 }
 0x162   : > { %v2075_v5 = vadd.f32 %v7434_v59, %v9304_v37  ;;  %7735 = vmatprep.mubr.msk.f32.mxu0 %vm905_vm0, %v4044_v43  ;;  %v4049_v59 = vld [vmem:[#allocation2 + $0x142] sm:$0xff] }
 0x163   : > { %v9468_v33 = vpop.f32.mrf.mxu0  ;;  %v7478_v39 = vpop.f32.mrf.mxu1 }
 0x164   : > { %v9470_v27 = vadd.f32 %v7478_v39, %v2071_v62 }
 0x165   : > { %v7437_v32 = vpop.f32.mrf.mxu0  ;;  %7736 = vmatmul.mubr.msk.f32.gmra.mxu0 %vm905_vm0, %v4045_v38  ;;  %v9473_v44 = vpop.f32.mrf.mxu1  ;;  %v4050_v38 = vld [vmem:[#allocation2 + $0x152] sm:$0xff] }
 0x166   : > { %v2077_v14 = vadd.f32 %v7437_v32, %v9316_v53  ;;  %7738 = vmatprep.mubr.msk.f32.mxu0 %vm905_vm0, %v4046_v45 }
 0x167   : > { %v9477_v37 = vpop.f32.mrf.mxu0  ;;  %v7481_v30 = vpop.f32.mrf.mxu1 }
 0x168   : > { %v9479_v23 = vadd.f32 %v7481_v30, %v2073_v7  ;;  %v4051_v30 = vld [vmem:[#allocation2 + $0x15a] sm:$0xff] }
 0x169   : > { %v7440_v43 = vpop.f32.mrf.mxu0  ;;  %7739 = vmatmul.mubr.msk.f32.gmra.mxu0 %vm905_vm0, %v4047_v49  ;;  %v9482_v62 = vpop.f32.mrf.mxu1 }
 0x16a   : > { %v2079_v20 = vadd.f32 %v7440_v43, %v9328_v8  ;;  %7741 = vmatprep.mubr.msk.f32.mxu0 %vm905_vm0, %v4048_v29  ;;  %v4052_v29 = vld [vmem:[#allocation2 + $0x16a] sm:$0xff] }
 0x16b   : > { %v9486_v53 = vpop.f32.mrf.mxu0  ;;  %v7484_v45 = vpop.f32.mrf.mxu1 }
 0x16c   : > { %v9488_v39 = vadd.f32 %v7484_v45, %v2075_v5  ;;  %v4053_v45 = vld [vmem:[#allocation2 + $0x172] sm:$0xff] }
 0x16d   : > { %v7443_v32 = vpop.f32.mrf.mxu0  ;;  %7742 = vmatmul.mubr.msk.f32.gmra.mxu0 %vm905_vm0, %v4049_v59  ;;  %v9491_v7 = vpop.f32.mrf.mxu1 }
 0x16e   : > { %v2081_v49 = vadd.f32 %v7443_v32, %v9340_v48  ;;  %7744 = vmatprep.mubr.msk.f32.mxu0 %vm905_vm0, %v4050_v38 }
 0x16f   : > { %v9495_v8 = vpop.f32.mrf.mxu0  ;;  %v7487_v43 = vpop.f32.mrf.mxu1 }
 0x170   : > { %v9497_v4 = vadd.f32 %v7487_v43, %v2077_v14 }
 0x171   : > { %v7446_v21 = vpop.f32.mrf.mxu0  ;;  %7745 = vmatmul.mubr.msk.f32.gmra.mxu0 %vm905_vm0, %v4051_v30  ;;  %v9500_v5 = vpop.f32.mrf.mxu1 }
 0x172   : > { %v2083_v59 = vadd.f32 %v7446_v21, %v9353_v11  ;;  %7747 = vmatprep.mubr.msk.f32.mxu0 %vm905_vm0, %v4052_v29  ;;  %v4056_v11 = vld [vmem:[#allocation2 + $0x19a] sm:$0xff] }
 0x173   : > { %v9504_v48 = vpop.f32.mrf.mxu0  ;;  %v7490_v38 = vpop.f32.mrf.mxu1 }
 0x174   : > { %v9506_v32 = vadd.f32 %v7490_v38, %v2079_v20 }
 0x175   : > { %v7449_v10 = vpop.f32.mrf.mxu0  ;;  %7748 = vmatmul.mubr.msk.f32.gmra.mxu0 %vm905_vm0, %v4053_v45  ;;  %v9509_v14 = vpop.f32.mrf.mxu1 }
 0x176   : > { %v2085_v43 = vadd.f32 %v7449_v10, %v9366_v2  ;;  %7750 = vmatprep.mubr.msk.f32.mxu0 %vm905_vm0, %v9193_v16  ;;  %v4057_v2 = vld [vmem:[#allocation2 + $0x1a2] sm:$0xff] }
 0x177   : > { %v9514_v30 = vpop.f32.mrf.mxu0  ;;  %v7493_v21 = vpop.f32.mrf.mxu1 }
 0x178   : > { %v9516_v29 = vadd.f32 %v7493_v21, %v2081_v49 }
 0x179   : > { %v7452_v19 = vpop.f32.mrf.mxu0  ;;  %7751 = vmatmul.mubr.msk.f32.gmra.mxu0 %vm905_vm0, %v9205_v51  ;;  %v9520_v20 = vpop.f32.mrf.mxu1 }
 0x17a   : > { %v2087_v45 = vadd.f32 %v7452_v19, %v9383_v36  ;;  %7753 = vmatprep.mubr.msk.f32.mxu0 %vm905_vm0, %v4056_v11 }
 0x17b   : > { %v9524_v10 = vpop.f32.mrf.mxu0  ;;  %v7496_v16 = vpop.f32.mrf.mxu1 }
 0x17c   : > { %v9526_v38 = vadd.f32 %v7496_v16, %v2083_v59 }
 0x17d   : > { %v7455_v42 = vpop.f32.mrf.mxu0  ;;  %7754 = vmatmul.mubr.msk.f32.gmra.mxu0 %vm905_vm0, %v4057_v2  ;;  %v9529_v49 = vpop.f32.mrf.mxu1  ;;  %vm4452_vm0 = vcmask 523264  }
 0x17e   : > { %v2089_v21 = vadd.f32 %v7455_v42, %v9398_v15  ;;  %v10795_v15 = vmov 0.0  }
 0x17f   : > { %v9532_v51 = vpop.f32.mrf.mxu0  ;;  %v7499_v6 = vpop.f32.mrf.mxu1  ;;  %4626 = vst.msk [vmem:[#allocation3] sm:$0xff] %vm4452_vm0, %v10795_v15  ;;  %4629 = vst.msk [vmem:[#allocation3 + $0x10] sm:$0xff] %vm4452_vm0, %v10795_v15 }
 0x180   : > { %10792 = vst [vmem:[#allocation21_spill] sm:$0xff] %v9532_v51  ;;  %v9534_v31 = vadd.f32 %v7499_v6, %v2085_v43  ;;  %4631 = vst.msk [vmem:[#allocation3 + $0x20] sm:$0xff] %vm4452_vm0, %v10795_v15 }
 0x181   : > { %v7510_v36 = vpop.f32.mrf.mxu0  ;;  %v9536_v19 = vpop.f32.mrf.mxu1  ;;  %4633 = vst.msk [vmem:[#allocation3 + $0x30] sm:$0xff] %vm4452_vm0, %v10795_v15  ;;  %4635 = vst.msk [vmem:[#allocation3 + $0x40] sm:$0xff] %vm4452_vm0, %v10795_v15 }
 0x182   : > { %v9539_v11 = vadd.f32 %v7510_v36, %v9410_v0  ;;  %4637 = vst.msk [vmem:[#allocation3 + $0x50] sm:$0xff] %vm4452_vm0, %v10795_v15  ;;  %4639 = vst.msk [vmem:[#allocation3 + $0x60] sm:$0xff] %vm4452_vm0, %v10795_v15 }
 0x183   : > { %v9541_v59 = vpop.f32.mrf.mxu0  ;;  %v7502_v16 = vpop.f32.mrf.mxu1  ;;  %4641 = vst.msk [vmem:[#allocation3 + $0x70] sm:$0xff] %vm4452_vm0, %v10795_v15  ;;  %4643 = vst.msk [vmem:[#allocation3 + $0x80] sm:$0xff] %vm4452_vm0, %v10795_v15 }
 0x184   : > { %10793 = vst [vmem:[#allocation22_spill] sm:$0xff] %v9539_v11  ;;  %10794 = vst [vmem:[#allocation23_spill] sm:$0xff] %v9541_v59  ;;  %v9543_v3 = vadd.f32 %v7502_v16, %v2087_v45 }
 0x185   : > { %v7513_v2 = vpop.f32.mrf.mxu0  ;;  %v9545_v46 = vpop.f32.mrf.mxu1  ;;  %4645 = vst.msk [vmem:[#allocation3 + $0x90] sm:$0xff] %vm4452_vm0, %v10795_v15 }
 0x186   : > { %v9568_v6 = vadd.f32 %v7513_v2, %v9421_v12  ;;  %4628 = vst.msk [vmem:[#allocation3 + $0x8] sm:$0x3] %vm4627_vm4, %v10795_v15  ;;  %4630 = vst.msk [vmem:[#allocation3 + $0x18] sm:$0x3] %vm4627_vm4, %v10795_v15 }
 0x187   : > { %v9570_v0 = vpop.f32.mrf.mxu0  ;;  %v7505_v42 = vpop.f32.mrf.mxu1  ;;  %4632 = vst.msk [vmem:[#allocation3 + $0x28] sm:$0x3] %vm4627_vm4, %v10795_v15  ;;  %4634 = vst.msk [vmem:[#allocation3 + $0x38] sm:$0x3] %vm4627_vm4, %v10795_v15 }
 0x188   : > { %10796 = vst [vmem:[#allocation24_spill] sm:$0xff] %v9568_v6  ;;  %10797 = vst [vmem:[#allocation25_spill] sm:$0xff] %v9570_v0  ;;  %v9572_v43 = vadd.f32 %v7505_v42, %v2089_v21 }
 0x189   : > { %v7516_v45 = vpop.f32.mrf.mxu0  ;;  %v9574_v36 = vpop.f32.mrf.mxu1  ;;  %4636 = vst.msk [vmem:[#allocation3 + $0x48] sm:$0x3] %vm4627_vm4, %v10795_v15  ;;  %4638 = vst.msk [vmem:[#allocation3 + $0x58] sm:$0x3] %vm4627_vm4, %v10795_v15 }
 0x18a   : > { %v9577_v16 = vadd.f32 %v7516_v45, %v9431_v57  ;;  %4640 = vst.msk [vmem:[#allocation3 + $0x68] sm:$0x3] %vm4627_vm4, %v10795_v15  ;;  %4642 = vst.msk [vmem:[#allocation3 + $0x78] sm:$0x3] %vm4627_vm4, %v10795_v15 }
 0x18b   : > { %v9579_v11 = vpop.f32.mrf.mxu0  ;;  %v9581_v59 = vpop.f32.mrf.mxu1  ;;  %4644 = vst.msk [vmem:[#allocation3 + $0x88] sm:$0x3] %vm4627_vm4, %v10795_v15  ;;  %4646 = vst.msk [vmem:[#allocation3 + $0x98] sm:$0x3] %vm4627_vm4, %v10795_v15 }
 0x18c   : > { %10798 = vst [vmem:[#allocation26_spill] sm:$0xff] %v9577_v16  ;;  %10799 = vst [vmem:[#allocation27_spill] sm:$0xff] %v9579_v11 }
 0x18d   : > { %v7519_v35 = vpop.f32.mrf.mxu0  ;;  %v9583_v51 = vpop.f32.mrf.mxu1 }
 0x18e   : > { %v9586_v12 = vadd.f32 %v7519_v35, %v9441_v13  ;;  %v2455_v35 = vadd.f32 %v9464_v28, %v9439_v56 }
 0x18f   : > { %v9588_v2 = vpop.f32.mrf.mxu0  ;;  %v9590_v21 = vpop.f32.mrf.mxu1 }
 0x190   : > { %10800 = vst [vmem:[#allocation28_spill] sm:$0xff] %v9586_v12  ;;  %10801 = vst [vmem:[#allocation29_spill] sm:$0xff] %v9588_v2  ;;  %v6705_v12 = vld [vmem:[%s10700_s8 + $0x78] sm:$0xff] }
 0x191   : > { %v7522_v42 = vpop.f32.mrf.mxu0  ;;  %v9592_v6 = vpop.f32.mrf.mxu1  ;;  %7756 = vmatprep.subr.mxu1 %v6705_v12 }
 0x192   : > { %v9595_v57 = vadd.f32 %v7522_v42, %v9451_v1  ;;  %7757 = vmatpush3.msra.mxu1 %v6705_v12 }
 0x193   : > { %v9597_v45 = vpop.f32.mrf.mxu0  ;;  %v9599_v16 = vpop.f32.mrf.mxu1 }
 0x194   : > { %10802 = vst [vmem:[#allocation30_spill] sm:$0xff] %v9595_v57  ;;  %10803 = vst [vmem:[#allocation31_spill] sm:$0xff] %v9597_v45  ;;  %v6704_v57 = vld [vmem:[%s10700_s8 + $0x70] sm:$0xff] }
 0x195   : > { %v7525_v11 = vpop.f32.mrf.mxu0  ;;  %v9601_v0 = vpop.f32.mrf.mxu1  ;;  %7758 = vmatprep.subr.mxu1 %v6704_v57 }
 0x196   : > { %v9606_v13 = vadd.f32 %v7525_v11, %v9461_v54  ;;  %v2457_v54 = vadd.f32 %v9473_v44, %v9449_v47  ;;  %7759 = vmatpush3.msra.mxu1 %v6704_v57  ;;  %v6703_v11 = vld [vmem:[%s10700_s8 + $0x68] sm:$0xff]  ;;  %v6702_v47 = vld [vmem:[%s10700_s8 + $0x60] sm:$0xff]  ;;  %v2459_v44 = vadd.f32 %v9482_v62, %v9459_v50 }
 0x197   : > { %v2723_v2 = vpop.f32.mrf.mxu0  ;;  %v9611_v1 = vpop.f32.mrf.mxu1  ;;  %7760 = vmatprep.subr.mxu1 %v6703_v11 }
 0x198   : > { %10804 = vst [vmem:[#allocation32_spill] sm:$0xff] %v9606_v13  ;;  %v9613_v42 = vadd.f32 %v2723_v2, %v2455_v35  ;;  %7761 = vmatpush3.msra.mxu1 %v6703_v11  ;;  %v6701_v11 = vld [vmem:[%s10700_s8 + $0x58] sm:$0xff] }
 0x199   : > { %v7528_v45 = vpop.f32.mrf.mxu0  ;;  %v9618_v56 = vpop.f32.mrf.mxu1  ;;  %7762 = vmatprep.subr.mxu1 %v6702_v47 }
 0x19a   : > { %10805 = vst [vmem:[#allocation33_spill] sm:$0xff] %v9613_v42  ;;  %v9623_v28 = vadd.f32 %v7528_v45, %v9470_v27  ;;  %v1625_v27 = vadd.f32 %v9311_v17, %v9297_v55  ;;  %7763 = vmatpush3.msra.mxu1 %v6702_v47  ;;  %v6761_v55 = vld [vmem:[%s10700_s8 + $0x138] sm:$0xff] }
 0x19b   : > { %v2733_v12 = vpop.f32.mrf.mxu0  ;;  %v9628_v2 = vpop.f32.mrf.mxu1  ;;  %7764 = vmatprep.subr.mxu1 %v6701_v11  ;;  %7868 = vmatprep.subr.mxu0 %v6761_v55 }
 0x19c   : > { %v9630_v35 = vadd.f32 %v2733_v12, %v2457_v54  ;;  %v2074_v17 = vadd.f32 %v9468_v33, %v1625_v27  ;;  %7765 = vmatpush3.msra.mxu1 %v6701_v11  ;;  %7869 = vmatpush3.msra.mxu0 %v6761_v55  ;;  %v6760_v12 = vld [vmem:[%s10700_s8 + $0x130] sm:$0xff]  ;;  %v1635_v33 = vadd.f32 %v9323_v22, %v9309_v63  ;;  %v6699_v11 = vld [vmem:[%s10700_s8 + $0x48] sm:$0xff] }
 0x19d   : > { %v7531_v42 = vpop.f32.mrf.mxu0  ;;  %v9632_v13 = vpop.f32.mrf.mxu1  ;;  %7870 = vmatprep.subr.mxu0 %v6760_v12  ;;  %v6759_v63 = vld [vmem:[%s10700_s8 + $0x128] sm:$0xff] }
 0x19e   : > { %v9642_v57 = vadd.f32 %v7531_v42, %v9479_v23  ;;  %v6700_v42 = vld [vmem:[%s10700_s8 + $0x50] sm:$0xff]  ;;  %v2461_v47 = vadd.f32 %v9491_v7, %v2074_v17  ;;  %7871 = vmatpush3.msra.mxu0 %v6760_v12  ;;  %v2076_v22 = vadd.f32 %v9477_v37, %v1635_v33  ;;  %v6698_v17 = vld [vmem:[%s10700_s8 + $0x40] sm:$0xff]  ;;  %v1645_v37 = vadd.f32 %v9333_v9, %v9321_v60 }
 0x19f   : > { %v2743_v45 = vpop.f32.mrf.mxu0  ;;  %v9644_v54 = vpop.f32.mrf.mxu1  ;;  %7766 = vmatprep.subr.mxu1 %v6700_v42  ;;  %7872 = vmatprep.subr.mxu0 %v6759_v63  ;;  %v4672_v33 = vld [vmem:[#allocation3 + $0x1] sm:$0xff] }
 0x1a0   : > { %v9663_v50 = vadd.f32 %v2743_v45, %v2459_v44  ;;  %7767 = vmatpush3.msra.mxu1 %v6700_v42  ;;  %7873 = vmatpush3.msra.mxu0 %v6759_v63  ;;  %v2463_v42 = vadd.f32 %v9500_v5, %v2076_v22  ;;  %v2078_v60 = vadd.f32 %v9486_v53, %v1645_v37  ;;  %v6756_v63 = vld [vmem:[%s10700_s8 + $0x110] sm:$0xff] }
 0x1a1   : > { %v7534_v23 = vpop.f32.mrf.mxu0  ;;  %v9665_v62 = vpop.f32.mrf.mxu1  ;;  %7768 = vmatprep.subr.mxu1 %v6699_v11  ;;  %7772 = vmatprep.mubr.msk.f32.mxu1 %vm4452_vm0, %v4672_v33  ;;  %v1655_v22 = vadd.f32 %v9346_v41, %v9337_v24 }
 0x1a2   : > { %v9677_v27 = vadd.f32 %v7534_v23, %v9488_v39  ;;  %7769 = vmatpush3.msra.mxu1 %v6699_v11  ;;  %v6758_v23 = vld [vmem:[%s10700_s8 + $0x120] sm:$0xff]  ;;  %v6757_v11 = vld [vmem:[%s10700_s8 + $0x118] sm:$0xff] }
 0x1a3   : > { %v2753_v44 = vpop.f32.mrf.mxu0  ;;  %v9679_v45 = vpop.f32.mrf.mxu1  ;;  %7770 = vmatprep.subr.mxu1 %v6698_v17  ;;  %7874 = vmatprep.subr.mxu0 %v6758_v23 }
 0x1a4   : > { %10806 = vst [vmem:[#allocation34_spill] sm:$0xff] %v9677_v27  ;;  %v9688_v7 = vadd.f32 %v2753_v44, %v2461_v47  ;;  %7771 = vmatpush3.msra.mxu1 %v6698_v17  ;;  %7875 = vmatpush3.msra.mxu0 %v6758_v23  ;;  %v6755_v23 = vld [vmem:[%s10700_s8 + $0x108] sm:$0xff] }
 0x1a5   : > { %v7537_v39 = vpop.f32.mrf.mxu0  ;;  %v9690_v55 = vpop.f32.mrf.mxu1  ;;  %7876 = vmatprep.subr.mxu0 %v6757_v11 }
 0x1a6   : > { %10807 = vst [vmem:[#allocation35_spill] sm:$0xff] %v9688_v7  ;;  %v9702_v12 = vadd.f32 %v7537_v39, %v9497_v4  ;;  %v2465_v39 = vadd.f32 %v9509_v14, %v2078_v60  ;;  %7877 = vmatpush3.msra.mxu0 %v6757_v11  ;;  %v1665_v14 = vadd.f32 %v9358_v18, %v9349_v61 }
 0x1a7   : > { %v2763_v47 = vpop.f32.mrf.mxu0  ;;  %v9704_v44 = vpop.f32.mrf.mxu1  ;;  %7878 = vmatprep.subr.mxu0 %v6756_v63  ;;  %v1675_v61 = vadd.f32 %v9372_v34, %v9362_v25 }
 0x1a8   : > { %10808 = vst [vmem:[#allocation36_spill] sm:$0xff] %v9702_v12  ;;  %v9711_v9 = vadd.f32 %v2763_v47, %v2463_v42  ;;  %v2080_v42 = vadd.f32 %v9495_v8, %v1655_v22  ;;  %7879 = vmatpush3.msra.mxu0 %v6756_v63  ;;  %v10859_v12 = vld [vmem:[#allocation11_spill] sm:$0xff] }
 0x1a9   : > { %v7540_v4 = vpop.f32.mrf.mxu0  ;;  %v9713_v5 = vpop.f32.mrf.mxu1  ;;  %7880 = vmatprep.subr.mxu0 %v6755_v23 }
 0x1aa   : > { %10809 = vst [vmem:[#allocation37_spill] sm:$0xff] %v9711_v9  ;;  %v9722_v17 = vadd.f32 %v7540_v4, %v9506_v32  ;;  %v6754_v32 = vld [vmem:[%s10700_s8 + $0x100] sm:$0xff]  ;;  %v2467_v47 = vadd.f32 %v9520_v20, %v2080_v42  ;;  %7881 = vmatpush3.msra.mxu0 %v6755_v23  ;;  %v2082_v4 = vadd.f32 %v9504_v48, %v1665_v14 }
 0x1ab   : > { %v2773_v53 = vpop.f32.mrf.mxu0  ;;  %v9724_v37 = vpop.f32.mrf.mxu1  ;;  %7882 = vmatprep.subr.mxu0 %v6754_v32  ;;  %v2084_v23 = vadd.f32 %v9514_v30, %v1675_v61 }
 0x1ac   : > { %10810 = vst [vmem:[#allocation38_spill] sm:$0xff] %v9722_v17  ;;  %10811 = vst [vmem:[#allocation39_spill] sm:$0xff] %v9724_v37  ;;  %v9730_v33 = vadd.f32 %v2773_v53, %v2465_v39  ;;  %7883 = vmatpush3.msra.mxu0 %v6754_v32  ;;  %v2469_v18 = vadd.f32 %v9529_v49, %v2082_v4  ;;  %v1685_v32 = vadd.f32 %v9388_v58, %v9201_v40 }
 0x1ad   : > { %v7543_v24 = vpop.f32.mrf.mxu0  ;;  %v9732_v41 = vpop.f32.mrf.mxu1  ;;  %v2471_v25 = vadd.f32 %v9536_v19, %v2084_v23  ;;  %v1695_v4 = vadd.f32 %v9402_v52, %v9216_v26 }
 0x1ae   : > { %10812 = vst [vmem:[#allocation40_spill] sm:$0xff] %v9730_v33  ;;  %10813 = vst [vmem:[#allocation41_spill] sm:$0xff] %v9732_v41  ;;  %v9741_v11 = vadd.f32 %v7543_v24, %v9516_v29  ;;  %v2086_v14 = vadd.f32 %v9524_v10, %v1685_v32 }
 0x1af   : > { %v2783_v8 = vpop.f32.mrf.mxu0  ;;  %v9743_v60 = vpop.f32.mrf.mxu1 }
 0x1b0   : > { %10814 = vst [vmem:[#allocation42_spill] sm:$0xff] %v9741_v11  ;;  %10815 = vst [vmem:[#allocation43_spill] sm:$0xff] %v9743_v60  ;;  %v9746_v63 = vadd.f32 %v2783_v8, %v2467_v47  ;;  %v2473_v40 = vadd.f32 %v9545_v46, %v2086_v14 }
 0x1b1   : > { %v7546_v22 = vpop.f32.mrf.mxu0  ;;  %v9748_v39 = vpop.f32.mrf.mxu1 }
 0x1b2   : > { %10816 = vst [vmem:[#allocation44_spill] sm:$0xff] %v9746_v63  ;;  %10817 = vst [vmem:[#allocation45_spill] sm:$0xff] %v9748_v39  ;;  %v9754_v29 = vadd.f32 %v7546_v22, %v9526_v38  ;;  %v10828_v22 = vld [vmem:[#allocation21_spill] sm:$0xff] }
 0x1b3   : > { %v2793_v20 = vpop.f32.mrf.mxu0  ;;  %v9756_v53 = vpop.f32.mrf.mxu1  ;;  %v2088_v61 = vadd.f32 %v10828_v22, %v1695_v4 }
 0x1b4   : > { %10818 = vst [vmem:[#allocation46_spill] sm:$0xff] %v9754_v29  ;;  %10819 = vst [vmem:[#allocation47_spill] sm:$0xff] %v9756_v53  ;;  %v9759_v48 = vadd.f32 %v2793_v20, %v2469_v18 }
 0x1b5   : > { %v7549_v42 = vpop.f32.mrf.mxu0  ;;  %v9761_v24 = vpop.f32.mrf.mxu1  ;;  %v2475_v23 = vadd.f32 %v9574_v36, %v2088_v61  ;;  %v9820_v61 = vld [vmem:[%s10700_s8 + $0x38] sm:$0xff] }
 0x1b6   : > { %10820 = vst [vmem:[#allocation48_spill] sm:$0xff] %v9759_v48  ;;  %10821 = vst [vmem:[#allocation49_spill] sm:$0xff] %v9761_v24  ;;  %v9767_v34 = vadd.f32 %v7549_v42, %v9534_v31  ;;  %7784 = vmatprep.subr.mxu1 %v9820_v61 }
 0x1b7   : > { %v2803_v38 = vpop.f32.mrf.mxu0  ;;  %v9769_v49 = vpop.f32.mrf.mxu1  ;;  %10839 = vst [vmem:[#allocation65_spill] sm:$0xff] %v9820_v61 }
 0x1b8   : > { %10822 = vst [vmem:[#allocation50_spill] sm:$0xff] %v9767_v34  ;;  %10823 = vst [vmem:[#allocation51_spill] sm:$0xff] %v9769_v49  ;;  %v9772_v47 = vadd.f32 %v2803_v38, %v2471_v25 }
 0x1b9   : > { %v7552_v30 = vpop.f32.mrf.mxu0  ;;  %v9774_v8 = vpop.f32.mrf.mxu1 }
 0x1ba   : > { %10824 = vst [vmem:[#allocation52_spill] sm:$0xff] %v9772_v47  ;;  %10825 = vst [vmem:[#allocation53_spill] sm:$0xff] %v9774_v8  ;;  %v9780_v58 = vadd.f32 %v7552_v30, %v9543_v3 }
 0x1bb   : > { %v2813_v31 = vpop.f32.mrf.mxu0  ;;  %v9782_v19 = vpop.f32.mrf.mxu1 }
 0x1bc   : > { %10826 = vst [vmem:[#allocation54_spill] sm:$0xff] %v9780_v58  ;;  %10827 = vst [vmem:[#allocation55_spill] sm:$0xff] %v9782_v19  ;;  %v9785_v18 = vadd.f32 %v2813_v31, %v2473_v40 }
 0x1bd   : > { %v7555_v10 = vpop.f32.mrf.mxu0  ;;  %v9787_v20 = vpop.f32.mrf.mxu1 }
 0x1be   : > { %10829 = vst [vmem:[#allocation21_spill] sm:$0xff] %v9785_v18  ;;  %10830 = vst [vmem:[#allocation56_spill] sm:$0xff] %v9787_v20  ;;  %v9791_v42 = vadd.f32 %v7555_v10, %v9572_v43 }
 0x1bf   : > { %v2823_v26 = vpop.f32.mrf.mxu0  ;;  %v9793_v52 = vpop.f32.mrf.mxu1 }
 0x1c0   : > { %10831 = vst [vmem:[#allocation57_spill] sm:$0xff] %v9791_v42  ;;  %10832 = vst [vmem:[#allocation58_spill] sm:$0xff] %v9793_v52  ;;  %v9795_v3 = vadd.f32 %v2823_v26, %v2475_v23 }
 0x1c1   : > { %v7610_v46 = vpop.f32.mrf.mxu0  ;;  %v9797_v32 = vpop.f32.mrf.mxu1 }
 0x1c2   : > { %10833 = vst [vmem:[#allocation59_spill] sm:$0xff] %v9795_v3  ;;  %10834 = vst [vmem:[#allocation60_spill] sm:$0xff] %v9797_v32 }
 0x1c3   : > { %v9799_v25 = vpop.f32.mrf.mxu0  ;;  %v9801_v38 = vpop.f32.mrf.mxu1 }
 0x1c4   : > { %10835 = vst [vmem:[#allocation61_spill] sm:$0xff] %v9801_v38 }
 0x1c5   : > { %v9803_v14 = vpop.f32.mrf.mxu0  ;;  %v9805_v30 = vpop.f32.mrf.mxu1 }
 0x1c6   : > { %10836 = vst [vmem:[#allocation62_spill] sm:$0xff] %v9805_v30 }
 0x1c7   : > { %v9807_v36 = vpop.f32.mrf.mxu0  ;;  %v9809_v43 = vpop.f32.mrf.mxu1 }
 0x1c8   : > { %10837 = vst [vmem:[#allocation63_spill] sm:$0xff] %v9809_v43  ;;  %v9836_v43 = vld [vmem:[%s10700_s8 + $0x1b8] sm:$0xff] }
 0x1c9   : > { %v9811_v4 = vpop.f32.mrf.mxu0  ;;  %v9813_v40 = vpop.f32.mrf.mxu1  ;;  %10840 = vst [vmem:[#allocation66_spill] sm:$0xff] %v9836_v43  ;;  %7924 = vmatprep.subr.mxu0 %v9836_v43 }
 0x1ca   : > { %10838 = vst [vmem:[#allocation64_spill] sm:$0xff] %v9813_v40 }
 0x1cb   : > { %v9815_v31 = vpop.f32.mrf.mxu0  ;;  %v7660_v22 = vpop.f32.mrf.mxu1 }
 0x1cd   : > { %v9822_v10 = vpop.f32.mrf.mxu0  ;;  %v3835_v23 = vpop.f32.mrf.mxu1 }
 0x1cf   : > { %v9825_v26 = vpop.f32.mrf.mxu0  ;;  %v9827_v15 = vpop.f32.mrf.mxu1 }
 0x1d1   : > { %v9829_v3 = vpop.f32.mrf.mxu0  ;;  %v9831_v40 = vpop.f32.mrf.mxu1 }
 0x1d3   : > { %v9838_v42 = vpop.f32.mrf.mxu0  ;;  %v9840_v30 = vpop.f32.mrf.mxu1 }
 0x1d5   : > { %v9843_v18 = vpop.f32.mrf.mxu0  ;;  %v9845_v38 = vpop.f32.mrf.mxu1 }
 0x1d7   : > { %v9847_v58 = vpop.f32.mrf.mxu0  ;;  %v9849_v32 = vpop.f32.mrf.mxu1 }
 0x1d9   : > { %v9851_v47 = vpop.f32.mrf.mxu0  ;;  %v9855_v34 = vpop.f32.mrf.mxu1 }
 0x1db   : > { %v9853_v52 = vpop.f32.mrf.mxu0  ;;  %v9861_v19 = vpop.f32.mrf.mxu1 }
 0x1dc   : > { %10841 = vst [vmem:[#allocation67_spill] sm:$0xff] %v9853_v52 }
 0x1dd   : > { %v9857_v20 = vpop.f32.mrf.mxu0  ;;  %v9867_v8 = vpop.f32.mrf.mxu1 }
 0x1de   : > { %10842 = vst [vmem:[#allocation68_spill] sm:$0xff] %v9857_v20 }
 0x1df   : > { %v9859_v48 = vpop.f32.mrf.mxu0  ;;  %v9873_v49 = vpop.f32.mrf.mxu1 }
 0x1e0   : > { %10843 = vst [vmem:[#allocation69_spill] sm:$0xff] %v9859_v48 }
 0x1e1   : > { %v9863_v43 = vpop.f32.mrf.mxu0  ;;  %v9879_v33 = vpop.f32.mrf.mxu1 }
 0x1e2   : > { %10844 = vst [vmem:[#allocation70_spill] sm:$0xff] %v9863_v43 }
 0x1e3   : > { %v9865_v29 = vpop.f32.mrf.mxu0  ;;  %v9883_v17 = vpop.f32.mrf.mxu1 }
 0x1e4   : > { %10845 = vst [vmem:[#allocation71_spill] sm:$0xff] %v9865_v29 }
 0x1e5   : > { %v9869_v63 = vpop.f32.mrf.mxu0  ;;  %v9889_v29 = vpop.f32.mrf.mxu1 }
 0x1e6   : > { %10846 = vst [vmem:[#allocation72_spill] sm:$0xff] %v9869_v63  ;;  %10853 = vst [vmem:[#allocation79_spill] sm:$0xff] %v9889_v29  ;;  %v10864_v29 = vld [vmem:[#allocation22_spill] sm:$0xff] }
 0x1e7   : > { %v9871_v61 = vpop.f32.mrf.mxu0  ;;  %v9895_v60 = vpop.f32.mrf.mxu1 }
 0x1e8   : > { %10847 = vst [vmem:[#allocation73_spill] sm:$0xff] %v9871_v61  ;;  %10856 = vst [vmem:[#allocation82_spill] sm:$0xff] %v9895_v60  ;;  %v10867_v60 = vld [vmem:[#allocation16_spill] sm:$0xff] }
 0x1e9   : > { %v9875_v11 = vpop.f32.mrf.mxu0  ;;  %v9903_v41 = vpop.f32.mrf.mxu1 }
 0x1ea   : > { %10848 = vst [vmem:[#allocation74_spill] sm:$0xff] %v9875_v11  ;;  %10861 = vst [vmem:[#allocation11_spill] sm:$0xff] %v9903_v41 }
 0x1eb   : > { %v9877_v24 = vpop.f32.mrf.mxu0  ;;  %v9915_v27 = vpop.f32.mrf.mxu1 }
 0x1ec   : > { %10849 = vst [vmem:[#allocation75_spill] sm:$0xff] %v9877_v24 }
 0x1ed   : > { %v9881_v53 = vpop.f32.mrf.mxu0 }
 0x1ee   : > { %10850 = vst [vmem:[#allocation76_spill] sm:$0xff] %v9881_v53  ;;  %v10860_v53 = vld [vmem:[#allocation14_spill] sm:$0xff] }
 0x1ef   : > { %v9885_v39 = vpop.f32.mrf.mxu0  ;;  %v2445_v43 = vadd.f32 %v10860_v53, %v10859_v12  ;;  %v10868_v53 = vld [vmem:[#allocation25_spill] sm:$0xff] }
 0x1f0   : > { %10851 = vst [vmem:[#allocation77_spill] sm:$0xff] %v9885_v39 }
 0x1f1   : > { %v9887_v9 = vpop.f32.mrf.mxu0 }
 0x1f2   : > { %10852 = vst [vmem:[#allocation78_spill] sm:$0xff] %v9887_v9  ;;  %v10863_v9 = vld [vmem:[#allocation23_spill] sm:$0xff] }
 0x1f3   : > { %v9891_v63 = vpop.f32.mrf.mxu0  ;;  %v2832_v7 = vadd.f32 %v10863_v9, %v2445_v43 }
 0x1f4   : > { %10854 = vst [vmem:[#allocation80_spill] sm:$0xff] %v9891_v63  ;;  %v3220_v63 = vadd.f32 %v9581_v59, %v10864_v29  ;;  %v10870_v29 = vld [vmem:[#allocation13_spill] sm:$0xff] }
 0x1f5   : > { %v9893_v61 = vpop.f32.mrf.mxu0 }
 0x1f6   : > { %10855 = vst [vmem:[#allocation81_spill] sm:$0xff] %v9893_v61  ;;  %v10866_v61 = vld [vmem:[#allocation12_spill] sm:$0xff] }
 0x1f7   : > { %v9897_v11 = vpop.f32.mrf.mxu0  ;;  %v2447_v37 = vadd.f32 %v10867_v60, %v10866_v61 }
 0x1f8   : > { %10857 = vst [vmem:[#allocation83_spill] sm:$0xff] %v9897_v11  ;;  %v3219_v11 = vadd.f32 %v9583_v51, %v2832_v7  ;;  %v9928_v51 = vld [vmem:[%s10697_s5] ss:$0 sm:$0xff] }
 0x1f9   : > { %v9899_v24 = vpop.f32.mrf.mxu0  ;;  %v2834_v41 = vadd.f32 %v10868_v53, %v2447_v37 }
 0x1fa   : > { %10858 = vst [vmem:[#allocation84_spill] sm:$0xff] %v9899_v24  ;;  %v3608_v24 = vadd.f32 %v7610_v46, %v3220_v63  ;;  %v3607_v43 = vadd.f32 %v9799_v25, %v3219_v11  ;;  %v10872_v46 = vld [vmem:[#allocation27_spill] sm:$0xff] }
 0x1fb   : > { %v9905_v39 = vpop.f32.mrf.mxu0  ;;  %v3221_v7 = vadd.f32 %v9592_v6, %v2834_v41  ;;  %v10874_v6 = vld [vmem:[#allocation15_spill] sm:$0xff] }
 0x1fc   : > { %10862 = vst [vmem:[#allocation14_spill] sm:$0xff] %v9905_v39  ;;  %v10869_v39 = vld [vmem:[#allocation24_spill] sm:$0xff]  ;;  %v3995_v59 = vadd.f32 %v7660_v22, %v3608_v24  ;;  %v3994_v37 = vadd.f32 %v3835_v23, %v3607_v43  ;;  %v9935_v24 = vpop.f32.mrf.mxu1  ;;  %v10875_v41 = vld [vmem:[#allocation19_spill] sm:$0xff]  ;;  %v10876_v43 = vld [vmem:[#allocation29_spill] sm:$0xff] }
 0x1fd   : > { %v9910_v48 = vpop.f32.mrf.mxu0  ;;  %v3222_v9 = vadd.f32 %v9590_v21, %v10869_v39  ;;  %v10873_v39 = vld [vmem:[#allocation26_spill] sm:$0xff]  ;;  %v3609_v25 = vadd.f32 %v9807_v36, %v3221_v7 }
 0x1fe   : > { %10865 = vst [vmem:[#allocation23_spill] sm:$0xff] %v9910_v48  ;;  %v10871_v48 = vld [vmem:[#allocation18_spill] sm:$0xff]  ;;  %v3224_v11 = vadd.f32 %v9599_v16, %v10873_v39  ;;  %v9950_v7 = vpop.f32.mrf.mxu1 }
 0x1ff   : > { %v9917_v12 = vpop.f32.mrf.mxu0  ;;  %v2449_v20 = vadd.f32 %v10871_v48, %v10870_v29  ;;  %v3610_v60 = vadd.f32 %v9803_v14, %v3222_v9  ;;  %v2451_v14 = vadd.f32 %v10875_v41, %v10874_v6  ;;  %v3996_v16 = vadd.f32 %v9831_v40, %v3609_v25  ;;  %v10880_v25 = vld [vmem:[#allocation31_spill] sm:$0xff] }
 0x200   : > { %v9966_v6 = vpop.f32.mrf.mxu1 }
 0x201   : > { %v7710_v52 = vpop.f32.mrf.mxu0  ;;  %v2836_v21 = vadd.f32 %v10872_v46, %v2449_v20  ;;  %v3997_v22 = vadd.f32 %v9827_v15, %v3610_v60  ;;  %v3612_v20 = vadd.f32 %v9811_v4, %v3224_v11  ;;  %v2838_v15 = vadd.f32 %v10876_v43, %v2451_v14  ;;  %v10879_v46 = vld [vmem:[#allocation20_spill] sm:$0xff] }
 0x202   : > { %v4382_v63 = vadd.f32 %v7710_v52, %v3995_v59  ;;  %v10877_v59 = vld [vmem:[#allocation28_spill] sm:$0xff] }
 0x203   : > { %v4222_v48 = vpop.f32.mrf.mxu0  ;;  %v3223_v52 = vadd.f32 %v9601_v0, %v2836_v21  ;;  %v3226_v29 = vadd.f32 %v9611_v1, %v10877_v59  ;;  %v3225_v39 = vadd.f32 %v9618_v56, %v2838_v15  ;;  %v10883_v59 = vld [vmem:[#allocation33_spill] sm:$0xff] }
 0x204   : > { %v4421_v61 = vadd.f32 %v9928_v51, %v4382_v63  ;;  %v4381_v53 = vadd.f32 %v4222_v48, %v3994_v37  ;;  %v3999_v37 = vadd.f32 %v9840_v30, %v3612_v20  ;;  %v10878_v63 = vld [vmem:[#allocation17_spill] sm:$0xff] }
 0x205   : > { %v7713_v23 = vpop.f32.mrf.mxu0  ;;  %v3611_v0 = vadd.f32 %v9815_v31, %v3223_v52  ;;  %v2453_v21 = vadd.f32 %v10879_v46, %v10878_v63  ;;  %v3614_v1 = vadd.f32 %v9822_v10, %v3226_v29  ;;  %v3613_v56 = vadd.f32 %v9825_v26, %v3225_v39  ;;  %v10882_v26 = vld [vmem:[#allocation32_spill] sm:$0xff] }
 0x206   : > { %4454 = vst.msk [vmem:[#allocation4 + $0x8] sm:$0xff] %vm4452_vm0, %v4421_v61  ;;  %v4420_v9 = vadd.f32 %v9928_v51, %v4381_v53  ;;  %v4384_v36 = vadd.f32 %v7713_v23, %v3997_v22  ;;  %v10881_v61 = vld [vmem:[#allocation30_spill] sm:$0xff]  ;;  %v3229_v29 = vadd.f32 %v9665_v62, %v10883_v59 }
 0x207   : > { %v4232_v60 = vpop.f32.mrf.mxu0  ;;  %v3998_v48 = vadd.f32 %v9845_v38, %v3611_v0  ;;  %v2840_v22 = vadd.f32 %v10880_v25, %v2453_v21  ;;  %v3228_v53 = vadd.f32 %v9628_v2, %v10881_v61  ;;  %v4001_v14 = vadd.f32 %v9849_v32, %v3614_v1 }
 0x208   : > { %4453 = vst.msk [vmem:[#allocation4] sm:$0xff] %vm4452_vm0, %v4420_v9  ;;  %v4423_v4 = vadd.f32 %v9928_v51, %v4384_v36  ;;  %v4383_v40 = vadd.f32 %v4232_v60, %v3996_v16  ;;  %v4000_v16 = vadd.f32 %v9855_v34, %v3613_v56  ;;  %v3230_v32 = vadd.f32 %v9644_v54, %v10882_v26  ;;  %v9979_v36 = vpop.f32.mrf.mxu1 }
 0x209   : > { %v7716_v11 = vpop.f32.mrf.mxu0  ;;  %v3227_v52 = vadd.f32 %v9632_v13, %v2840_v22  ;;  %v3616_v20 = vadd.f32 %v9829_v3, %v3228_v53  ;;  %v3617_v63 = vadd.f32 %v9847_v58, %v3229_v29  ;;  %v3231_v22 = vadd.f32 %v9690_v55, %v9630_v35  ;;  %v10017_v53 = vld [vmem:[%s10699_s7] ss:$0 sm:$0xff] }
 0x20a   : > { %4456 = vst.msk [vmem:[#allocation4 + $0x18] sm:$0xff] %vm4452_vm0, %v4423_v4  ;;  %v4422_v31 = vadd.f32 %v9928_v51, %v4383_v40  ;;  %v4386_v30 = vadd.f32 %v7716_v11, %v3999_v37  ;;  %v3618_v60 = vadd.f32 %v9843_v18, %v3230_v32  ;;  %v3232_v40 = vadd.f32 %v9679_v45, %v9623_v28  ;;  %v9995_v62 = vpop.f32.mrf.mxu1  ;;  %v10003_v28 = vld [vmem:[%s10698_s6] ss:$0 sm:$0xff] }
 0x20b   : > { %v4242_v41 = vpop.f32.mrf.mxu0  ;;  %v3615_v15 = vadd.f32 %v9838_v42, %v3227_v52  ;;  %v4003_v13 = vadd.f32 %v9861_v19, %v3616_v20  ;;  %v10885_v52 = vld [vmem:[#allocation68_spill] sm:$0xff] }
 0x20c   : > { %4455 = vst.msk [vmem:[#allocation4 + $0x10] sm:$0xff] %vm4452_vm0, %v4422_v31  ;;  %v4425_v38 = vadd.f32 %v9928_v51, %v4386_v30  ;;  %v4385_v10 = vadd.f32 %v4242_v41, %v3998_v48  ;;  %v4005_v46 = vadd.f32 %v9873_v49, %v3618_v60  ;;  %v3620_v31 = vadd.f32 %v9851_v47, %v3232_v40  ;;  %v10012_v61 = vpop.f32.mrf.mxu1 }
 0x20d   : > { %v7719_v23 = vpop.f32.mrf.mxu0  ;;  %v4002_v4 = vadd.f32 %v9867_v8, %v3615_v15  ;;  %v4004_v49 = vadd.f32 %v9879_v33, %v3617_v63  ;;  %v3234_v47 = vadd.f32 %v9704_v44, %v9642_v57  ;;  %v3233_v57 = vadd.f32 %v9713_v5, %v9663_v50  ;;  %v10884_v44 = vld [vmem:[#allocation67_spill] sm:$0xff]  ;;  %v10890_v50 = vld [vmem:[#allocation82_spill] sm:$0xff] }
 0x20e   : > { %4458 = vst.msk [vmem:[#allocation4 + $0x28] sm:$0xff] %vm4452_vm0, %v4425_v38  ;;  %v4424_v2 = vadd.f32 %v9928_v51, %v4385_v10  ;;  %v4388_v9 = vadd.f32 %v7719_v23, %v4001_v14  ;;  %v4007_v41 = vadd.f32 %v9883_v17, %v3620_v31  ;;  %v3619_v10 = vadd.f32 %v10884_v44, %v3231_v22  ;;  %v10893_v63 = vld [vmem:[#allocation70_spill] sm:$0xff]  ;;  %v10895_v31 = vld [vmem:[#allocation36_spill] sm:$0xff] }
 0x20f   : > { %v4252_v43 = vpop.f32.mrf.mxu0  ;;  %v4485_v0 = vld [vmem:[#allocation4] ss:$2 sm:$0xff]  ;;  %v4517_v37 = vld [vmem:[#allocation4 + $0x1] ss:$2 sm:$0xff]  ;;  %v3622_v23 = vadd.f32 %v10885_v52, %v3234_v47 }
 0x210   : > { %4457 = vst.msk [vmem:[#allocation4 + $0x20] sm:$0xff] %vm4452_vm0, %v4424_v2  ;;  %v4427_v3 = vadd.f32 %v9928_v51, %v4388_v9  ;;  %v4387_v34 = vadd.f32 %v4252_v43, %v4000_v16  ;;  %v4548_v11 = vmax.f32 %v4485_v0, %v4517_v37  ;;  %v10886_v16 = vld [vmem:[#allocation34_spill] sm:$0xff]  ;;  %v10887_v2 = vld [vmem:[#allocation39_spill] sm:$0xff]  ;;  %v10888_v43 = vld [vmem:[#allocation69_spill] sm:$0xff] }
 0x211   : > { %v7722_v54 = vpop.f32.mrf.mxu0  ;;  %v3236_v17 = vadd.f32 %v10887_v2, %v10886_v16  ;;  %v3621_v15 = vadd.f32 %v10888_v43, %v3233_v57  ;;  %v4009_v5 = vadd.f32 %v10890_v50, %v3622_v23  ;;  %v10899_v57 = vld [vmem:[#allocation45_spill] sm:$0xff] }
 0x212   : > { %4460 = vst.msk [vmem:[#allocation4 + $0x38] sm:$0xff] %vm4452_vm0, %v4427_v3  ;;  %v4426_v42 = vadd.f32 %v9928_v51, %v4387_v34  ;;  %v4390_v19 = vadd.f32 %v7722_v54, %v4003_v13  ;;  %v10889_v13 = vld [vmem:[#allocation79_spill] sm:$0xff]  ;;  %v10035_v34 = vpop.f32.mrf.mxu1 }
 0x213   : > { %v4487_v18 = vld [vmem:[#allocation4 + $0x10] ss:$2 sm:$0xff]  ;;  %v4519_v21 = vld [vmem:[#allocation4 + $0x11] ss:$2 sm:$0xff]  ;;  %v4262_v39 = vpop.f32.mrf.mxu0  ;;  %v4006_v3 = vadd.f32 %v10889_v13, %v3619_v10 }
 0x214   : > { %v4549_v1 = vmax.f32 %v4487_v18, %v4519_v21  ;;  %4459 = vst.msk [vmem:[#allocation4 + $0x30] sm:$0xff] %vm4452_vm0, %v4426_v42  ;;  %v4429_v8 = vadd.f32 %v9928_v51, %v4390_v19  ;;  %v4389_v48 = vadd.f32 %v4262_v39, %v4002_v4  ;;  %v10891_v42 = vld [vmem:[#allocation35_spill] sm:$0xff]  ;;  %v10892_v19 = vld [vmem:[#allocation41_spill] sm:$0xff]  ;;  %v10900_v10 = vld [vmem:[#allocation72_spill] sm:$0xff] }
 0x215   : > { %v7725_v45 = vpop.f32.mrf.mxu0  ;;  %v3235_v40 = vadd.f32 %v10892_v19, %v10891_v42  ;;  %v10894_v39 = vld [vmem:[#allocation11_spill] sm:$0xff] }
 0x216   : > { %v4564_v58 = vmax.f32 %v4548_v11, %v4549_v1  ;;  %4462 = vst.msk [vmem:[#allocation4 + $0x48] sm:$0xff] %vm4452_vm0, %v4429_v8  ;;  %v4428_v30 = vadd.f32 %v9928_v51, %v4389_v48  ;;  %v4392_v25 = vadd.f32 %v7725_v45, %v4005_v46  ;;  %v3624_v46 = vadd.f32 %v10893_v63, %v3236_v17  ;;  %v10896_v45 = vld [vmem:[#allocation43_spill] sm:$0xff]  ;;  %v10901_v17 = vld [vmem:[#allocation38_spill] sm:$0xff] }
 0x217   : > { %v4272_v33 = vpop.f32.mrf.mxu0  ;;  %v4489_v14 = vld [vmem:[#allocation4 + $0x20] ss:$2 sm:$0xff]  ;;  %v4521_v38 = vld [vmem:[#allocation4 + $0x21] ss:$2 sm:$0xff]  ;;  %v4008_v11 = vadd.f32 %v10894_v39, %v3621_v15 }
 0x218   : > { %v4579_v56 = vmul.f32 %v10003_v28, %v4564_v58  ;;  %4461 = vst.msk [vmem:[#allocation4 + $0x40] sm:$0xff] %vm4452_vm0, %v4428_v30  ;;  %v4431_v35 = vadd.f32 %v9928_v51, %v4392_v25  ;;  %v4391_v55 = vadd.f32 %v4272_v33, %v4004_v49  ;;  %v4550_v59 = vmax.f32 %v4489_v14, %v4521_v38  ;;  %v10897_v58 = vld [vmem:[#allocation71_spill] sm:$0xff]  ;;  %v10047_v25 = vpop.f32.mrf.mxu1 }
 0x219   : > { %v7728_v20 = vpop.f32.mrf.mxu0  ;;  %v3238_v49 = vadd.f32 %v10896_v45, %v10895_v31  ;;  %v3623_v30 = vadd.f32 %v10897_v58, %v3235_v40  ;;  %v4011_v33 = vadd.f32 %v9915_v27, %v3624_v46  ;;  %v4670_v39 = vld [vmem:[%s10700_s8 + $0x30] sm:$0xff] }
 0x21a   : > { %v4594_v9 = vadd.f32 %v10017_v53, %v4579_v56  ;;  %4464 = vst.msk [vmem:[#allocation4 + $0x58] sm:$0xff] %vm4452_vm0, %v4431_v35  ;;  %v4430_v26 = vadd.f32 %v9928_v51, %v4391_v55  ;;  %v4394_v32 = vadd.f32 %v7728_v20, %v4007_v41  ;;  %v10898_v55 = vld [vmem:[#allocation37_spill] sm:$0xff]  ;;  %v10066_v13 = vpop.f32.mrf.mxu1 }
 0x21b   : > { %v4491_v29 = vld [vmem:[#allocation4 + $0x30] ss:$2 sm:$0xff]  ;;  %v4523_v60 = vld [vmem:[#allocation4 + $0x31] ss:$2 sm:$0xff]  ;;  %v4282_v0 = vpop.f32.mrf.mxu0  ;;  %v3237_v44 = vadd.f32 %v10899_v57, %v10898_v55  ;;  %v3626_v52 = vadd.f32 %v10900_v10, %v3238_v49  ;;  %v4010_v20 = vadd.f32 %v9935_v24, %v3623_v30 }
 0x21c   : > { %vm4602_vm5 = vcmp.gt.f32.partialorder %v4594_v9, 0.0  ;;  %v4610_v37 = vmul.f32 0.1, %v4594_v9  ;;  %v4551_v54 = vmax.f32 %v4491_v29, %v4523_v60  ;;  %4463 = vst.msk [vmem:[#allocation4 + $0x50] sm:$0xff] %vm4452_vm0, %v4430_v26  ;;  %v4433_v4 = vadd.f32 %v9928_v51, %v4394_v32  ;;  %v10903_v32 = vld [vmem:[#allocation73_spill] sm:$0xff]  ;;  %v10082_v45 = vpop.f32.mrf.mxu1  ;;  %v10913_v55 = vld [vmem:[#allocation76_spill] sm:$0xff] }
 0x21d   : > { %v4393_v18 = vadd.f32 %v4282_v0, %v4006_v3  ;;  %v7731_v21 = vpop.f32.mrf.mxu0  ;;  %v3625_v43 = vadd.f32 %v10903_v32, %v3237_v44  ;;  %v4013_v15 = vadd.f32 %v9950_v7, %v3626_v52  ;;  %v10904_v0 = vld [vmem:[#allocation40_spill] sm:$0xff] }
 0x21e   : > { %v4565_v1 = vmax.f32 %v4550_v59, %v4551_v54  ;;  %4466 = vst.msk [vmem:[#allocation4 + $0x68] sm:$0xff] %vm4452_vm0, %v4433_v4  ;;  %v4396_v8 = vadd.f32 %v7731_v21, %v4009_v5  ;;  %v4618_v48 = vsel %vm4602_vm5, %v4594_v9, %v4610_v37  ;;  %v10902_v9 = vld [vmem:[#allocation47_spill] sm:$0xff]  ;;  %v10905_v37 = vld [vmem:[#allocation49_spill] sm:$0xff]  ;;  %v10906_v4 = vld [vmem:[#allocation74_spill] sm:$0xff] }
 0x21f   : > { %v4432_v22 = vadd.f32 %v9928_v51, %v4393_v18  ;;  %v4292_v47 = vpop.f32.mrf.mxu0  ;;  %4648 = vst.msk [vmem:[#allocation3 + $0x11] sm:$0xff] %vm4452_vm0, %v4618_v48  ;;  %v4493_v56 = vld [vmem:[#allocation4 + $0x40] ss:$2 sm:$0xff]  ;;  %v4525_v14 = vld [vmem:[#allocation4 + $0x41] ss:$2 sm:$0xff]  ;;  %v3240_v26 = vadd.f32 %v10902_v9, %v10901_v17  ;;  %v3239_v54 = vadd.f32 %v10905_v37, %v10904_v0  ;;  %v4012_v40 = vadd.f32 %v9966_v6, %v3625_v43  ;;  %v10916_v9 = vld [vmem:[#allocation77_spill] sm:$0xff] }
 0x220   : > { %v4580_v41 = vmul.f32 %v10003_v28, %v4565_v1  ;;  %v4435_v38 = vadd.f32 %v9928_v51, %v4396_v8  ;;  %v4395_v35 = vadd.f32 %v4292_v47, %v4008_v11  ;;  %v4552_v3 = vmax.f32 %v4493_v56, %v4525_v14  ;;  %v10907_v11 = vld [vmem:[#allocation42_spill] sm:$0xff]  ;;  %v10908_v1 = vld [vmem:[#allocation51_spill] sm:$0xff]  ;;  %v10910_v56 = vld [vmem:[#allocation65_spill] sm:$0xff] }
 0x221   : > { %4465 = vst.msk [vmem:[#allocation4 + $0x60] sm:$0xff] %vm4452_vm0, %v4432_v22  ;;  %v7734_v23 = vpop.f32.mrf.mxu0  ;;  %v3628_v42 = vadd.f32 %v10906_v4, %v3240_v26  ;;  %v3242_v8 = vadd.f32 %v10908_v1, %v10907_v11  ;;  %v10909_v48 = vld [vmem:[#allocation75_spill] sm:$0xff]  ;;  %v4669_v14 = vld [vmem:[%s10700_s8 + $0x28] sm:$0xff]  ;;  %v10923_v11 = vld [vmem:[#allocation60_spill] sm:$0xff] }
 0x222   : > { %v4595_v16 = vadd.f32 %v10017_v53, %v4580_v41  ;;  %4468 = vst.msk [vmem:[#allocation4 + $0x78] sm:$0xff] %vm4452_vm0, %v4435_v38  ;;  %v4434_v27 = vadd.f32 %v9928_v51, %v4395_v35  ;;  %v4398_v2 = vadd.f32 %v7734_v23, %v4011_v33  ;;  %v3627_v31 = vadd.f32 %v10909_v48, %v3239_v54  ;;  %v10911_v38 = vld [vmem:[#allocation44_spill] sm:$0xff]  ;;  %v10912_v35 = vld [vmem:[#allocation53_spill] sm:$0xff]  ;;  %v10919_v37 = vld [vmem:[#allocation78_spill] sm:$0xff] }
 0x223   : > { %v4495_v50 = vld [vmem:[#allocation4 + $0x50] ss:$2 sm:$0xff]  ;;  %v4527_v5 = vld [vmem:[#allocation4 + $0x51] ss:$2 sm:$0xff]  ;;  %v4302_v24 = vpop.f32.mrf.mxu0  ;;  %v4015_v58 = vadd.f32 %v9979_v36, %v3628_v42  ;;  %v3241_v36 = vadd.f32 %v10912_v35, %v10911_v38  ;;  %v3630_v57 = vadd.f32 %v10913_v55, %v3242_v8 }
 0x224   : > { %v4553_v59 = vmax.f32 %v4495_v50, %v4527_v5  ;;  %4467 = vst.msk [vmem:[#allocation4 + $0x70] sm:$0xff] %vm4452_vm0, %v4434_v27  ;;  %v4437_v29 = vadd.f32 %v9928_v51, %v4398_v2  ;;  %v4397_v60 = vadd.f32 %v4302_v24, %v4010_v20  ;;  %vm4603_vm6 = vcmp.gt.f32.partialorder %v4595_v16, 0.0  ;;  %v10914_v27 = vld [vmem:[#allocation46_spill] sm:$0xff]  ;;  %v10915_v2 = vld [vmem:[#allocation55_spill] sm:$0xff]  ;;  %v10924_v8 = vld [vmem:[#allocation80_spill] sm:$0xff] }
 0x225   : > { %v7737_v19 = vpop.f32.mrf.mxu0  ;;  %v4611_v7 = vmul.f32 0.1, %v4595_v16  ;;  %v4014_v10 = vadd.f32 %v9995_v62, %v3627_v31  ;;  %v3244_v17 = vadd.f32 %v10915_v2, %v10914_v27  ;;  %v3629_v26 = vadd.f32 %v10916_v9, %v3241_v36  ;;  %v10110_v62 = vpop.f32.mrf.mxu1  ;;  %v10925_v38 = vld [vmem:[#allocation54_spill] sm:$0xff]  ;;  %v10927_v36 = vld [vmem:[#allocation81_spill] sm:$0xff]  ;;  %v10929_v27 = vld [vmem:[#allocation83_spill] sm:$0xff] }
 0x226   : > { %v4566_v63 = vmax.f32 %v4552_v3, %v4553_v59  ;;  %4470 = vst.msk [vmem:[#allocation4 + $0x88] sm:$0xff] %vm4452_vm0, %v4437_v29  ;;  %v4436_v46 = vadd.f32 %v9928_v51, %v4397_v60  ;;  %v4400_v18 = vadd.f32 %v7737_v19, %v4013_v15  ;;  %v4673_v21 = vld [vmem:[#allocation3 + $0x11] sm:$0xff]  ;;  %v4017_v32 = vadd.f32 %v10012_v61, %v3630_v57  ;;  %v4667_v29 = vld [vmem:[%s10700_s8 + $0x18] sm:$0xff] }
 0x227   : > { %v4312_v49 = vpop.f32.mrf.mxu0  ;;  %7773 = vmatmul.mubr.msk.f32.vlgmr.msra.gmra.mxu1 %vm4452_vm0, %v4673_v21  ;;  %7884 = vmatprep.mubr.msk.f32.mxu0 %vm4452_vm0, %v4673_v21  ;;  %v4619_v6 = vsel %vm4603_vm6, %v4595_v16, %v4611_v7  ;;  %v4668_v16 = vld [vmem:[%s10700_s8 + $0x20] sm:$0xff]  ;;  %v3632_v54 = vadd.f32 %v10919_v37, %v3244_v17  ;;  %v4016_v19 = vadd.f32 %v10035_v34, %v3629_v26  ;;  %v10128_v31 = vpop.f32.mrf.mxu1 }
 0x228   : > { %v4581_v30 = vmul.f32 %v10003_v28, %v4566_v63  ;;  %v4497_v22 = vld [vmem:[#allocation4 + $0x60] ss:$2 sm:$0xff]  ;;  %v4529_v47 = vld [vmem:[#allocation4 + $0x61] ss:$2 sm:$0xff]  ;;  %4469 = vst.msk [vmem:[#allocation4 + $0x80] sm:$0xff] %vm4452_vm0, %v4436_v46  ;;  %v4439_v33 = vadd.f32 %v9928_v51, %v4400_v18  ;;  %v4399_v41 = vadd.f32 %v4312_v49, %v4012_v40  ;;  %4649 = vst.msk [vmem:[#allocation3 + $0x21] sm:$0xff] %vm4452_vm0, %v4619_v6  ;;  %7785 = vmatpush3.msra.mxu1 %v10910_v56 }
 0x229   : > { %v7740_v44 = vpop.f32.mrf.mxu0  ;;  %7786 = vmatprep.subr.mxu1 %v4670_v39  ;;  %v4554_v43 = vmax.f32 %v4497_v22, %v4529_v47  ;;  %v10917_v61 = vld [vmem:[#allocation48_spill] sm:$0xff]  ;;  %v10920_v46 = vld [vmem:[#allocation50_spill] sm:$0xff]  ;;  %v3975_v9 = vpop.f32.mrf.mxu1 }
 0x22a   : > { %v4596_v52 = vadd.f32 %v10017_v53, %v4581_v30  ;;  %4472 = vst.msk [vmem:[#allocation4 + $0x98] sm:$0xff] %vm4452_vm0, %v4439_v33  ;;  %v4438_v23 = vadd.f32 %v9928_v51, %v4399_v41  ;;  %v4402_v20 = vadd.f32 %v7740_v44, %v4015_v58  ;;  %7787 = vmatpush3.msra.mxu1 %v4670_v39  ;;  %v10918_v60 = vld [vmem:[#allocation56_spill] sm:$0xff]  ;;  %v10921_v18 = vld [vmem:[#allocation58_spill] sm:$0xff] }
 0x22b   : > { %v4499_v15 = vld [vmem:[#allocation4 + $0x70] ss:$2 sm:$0xff]  ;;  %v4531_v3 = vld [vmem:[#allocation4 + $0x71] ss:$2 sm:$0xff]  ;;  %v4322_v50 = vpop.f32.mrf.mxu0  ;;  %7788 = vmatprep.subr.mxu1 %v4669_v14  ;;  %v3243_v0 = vadd.f32 %v10918_v60, %v10917_v61  ;;  %v3246_v21 = vadd.f32 %v10921_v18, %v10920_v46  ;;  %v4666_v58 = vld [vmem:[%s10700_s8 + $0x10] sm:$0xff]  ;;  %v4019_v30 = vadd.f32 %v10047_v25, %v3632_v54 }
 0x22c   : > { %v4555_v5 = vmax.f32 %v4499_v15, %v4531_v3  ;;  %4471 = vst.msk [vmem:[#allocation4 + $0x90] sm:$0xff] %vm4452_vm0, %v4438_v23  ;;  %v4441_v24 = vadd.f32 %v9928_v51, %v4402_v20  ;;  %v4401_v59 = vadd.f32 %v4322_v50, %v4014_v10  ;;  %vm4604_vm7 = vcmp.gt.f32.partialorder %v4596_v52, 0.0  ;;  %7789 = vmatpush3.msra.mxu1 %v4669_v14  ;;  %v10922_v39 = vld [vmem:[#allocation52_spill] sm:$0xff]  ;;  %v6792_v14 = vld [vmem:[%s10700_s8 + $0x1b0] sm:$0xff]  ;;  %v10926_v25 = vld [vmem:[#allocation61_spill] sm:$0xff] }
 0x22d   : > { %v7743_v4 = vpop.f32.mrf.mxu0  ;;  %v4612_v42 = vmul.f32 0.1, %v4596_v52  ;;  %7790 = vmatprep.subr.mxu1 %v4668_v16  ;;  %v3245_v1 = vadd.f32 %v10923_v11, %v10922_v39  ;;  %v3631_v48 = vadd.f32 %v10924_v8, %v3243_v0  ;;  %v3248_v35 = vadd.f32 %v10926_v25, %v10925_v38  ;;  %v4665_v10 = vld [vmem:[%s10700_s8 + $0x8] sm:$0xff]  ;;  %v4664_v3 = vld [vmem:[%s10700_s8] sm:$0xff]  ;;  %v10934_v46 = vld [vmem:[#allocation63_spill] sm:$0xff]  ;;  %v7705_v39 = vpop.f32.mrf.mxu1 }
 0x22e   : > { %v4567_v7 = vmax.f32 %v4554_v43, %v4555_v5  ;;  %4474 = vst.msk [vmem:[#allocation4 + $0xa8] sm:$0xff] %vm4452_vm0, %v4441_v24  ;;  %v4440_v40 = vadd.f32 %v9928_v51, %v4401_v59  ;;  %v4404_v63 = vadd.f32 %v7743_v4, %v4017_v32  ;;  %7791 = vmatpush3.msra.mxu1 %v4668_v16  ;;  %v10928_v16 = vld [vmem:[#allocation66_spill] sm:$0xff]  ;;  %v10930_v59 = vld [vmem:[#allocation21_spill] sm:$0xff]  ;;  %v10932_v60 = vld [vmem:[#allocation84_spill] sm:$0xff] }
 0x22f   : > { %v4332_v49 = vpop.f32.mrf.mxu0  ;;  %v10130_v6 = vld [vmem:[#allocation3 + $0x21] sm:$0xff]  ;;  %v4620_v34 = vsel %vm4604_vm7, %v4596_v52, %v4612_v42  ;;  %7792 = vmatprep.subr.mxu1 %v4667_v29  ;;  %v3634_v55 = vadd.f32 %v10927_v36, %v3246_v21  ;;  %v4018_v57 = vadd.f32 %v10066_v13, %v3631_v48  ;;  %v6791_v13 = vld [vmem:[%s10700_s8 + $0x1a8] sm:$0xff]  ;;  %v3633_v2 = vadd.f32 %v10929_v27, %v3245_v1 }
 0x230   : > { %v4582_v22 = vmul.f32 %v10003_v28, %v4567_v7  ;;  %v4501_v47 = vld [vmem:[#allocation4 + $0x80] ss:$2 sm:$0xff]  ;;  %v4533_v33 = vld [vmem:[#allocation4 + $0x81] ss:$2 sm:$0xff]  ;;  %4473 = vst.msk [vmem:[#allocation4 + $0xa0] sm:$0xff] %vm4452_vm0, %v4440_v40  ;;  %v4443_v41 = vadd.f32 %v9928_v51, %v4404_v63  ;;  %v4403_v56 = vadd.f32 %v4332_v49, %v4016_v19  ;;  %7775 = vmatprep.mubr.msk.f32.mxu1 %vm4452_vm0, %v10130_v6  ;;  %4650 = vst.msk [vmem:[#allocation3 + $0x31] sm:$0xff] %vm4452_vm0, %v4620_v34 }
 0x231   : > { %7885 = vmatmul.mubr.msk.f32.vlgmr.msra.gmra.mxu0 %vm4452_vm0, %v10130_v6  ;;  %v7746_v44 = vpop.f32.mrf.mxu0  ;;  %7793 = vmatpush3.msra.mxu1 %v4667_v29  ;;  %v4021_v17 = vadd.f32 %v10082_v45, %v3634_v55  ;;  %v4556_v26 = vmax.f32 %v4501_v47, %v4533_v33  ;;  %v6790_v45 = vld [vmem:[%s10700_s8 + $0x1a0] sm:$0xff]  ;;  %v10931_v29 = vld [vmem:[#allocation62_spill] sm:$0xff]  ;;  %v3636_v0 = vadd.f32 %v10932_v60, %v3248_v35  ;;  %v10181_v40 = vld [vmem:[%s10700_s8 + $0xb8] sm:$0xff] }
 0x232   : > { %v4597_v52 = vadd.f32 %v10017_v53, %v4582_v22  ;;  %4476 = vst.msk [vmem:[#allocation4 + $0xb8] sm:$0xff] %vm4452_vm0, %v4443_v41  ;;  %v4442_v23 = vadd.f32 %v9928_v51, %v4403_v56  ;;  %v4406_v20 = vadd.f32 %v7746_v44, %v4019_v30  ;;  %7794 = vmatprep.subr.mxu1 %v4666_v58  ;;  %v10933_v63 = vld [vmem:[#allocation57_spill] sm:$0xff]  ;;  %v10935_v18 = vld [vmem:[#allocation14_spill] sm:$0xff]  ;;  %v6789_v47 = vld [vmem:[%s10700_s8 + $0x198] sm:$0xff] }
 0x233   : > { %7925 = vmatpush3.msra.mxu0 %v10928_v16  ;;  %v4503_v32 = vld [vmem:[#allocation4 + $0x90] ss:$2 sm:$0xff]  ;;  %v4535_v43 = vld [vmem:[#allocation4 + $0x91] ss:$2 sm:$0xff]  ;;  %v4342_v15 = vpop.f32.mrf.mxu0  ;;  %7795 = vmatpush3.msra.mxu1 %v4666_v58  ;;  %v3247_v61 = vadd.f32 %v10931_v29, %v10930_v59  ;;  %v4020_v37 = vadd.f32 %v10110_v62, %v3633_v2  ;;  %v3250_v62 = vadd.f32 %v10934_v46, %v10933_v63  ;;  %v10936_v33 = vld [vmem:[#allocation59_spill] sm:$0xff] }
 0x234   : > { %7926 = vmatprep.subr.mxu0 %v6792_v14  ;;  %v4557_v50 = vmax.f32 %v4503_v32, %v4535_v43  ;;  %4475 = vst.msk [vmem:[#allocation4 + $0xb0] sm:$0xff] %vm4452_vm0, %v4442_v23  ;;  %v4445_v5 = vadd.f32 %v9928_v51, %v4406_v20  ;;  %v4405_v24 = vadd.f32 %v4342_v15, %v4018_v57  ;;  %vm4605_vm8 = vcmp.gt.f32.partialorder %v4597_v52, 0.0  ;;  %v10938_v56 = vld [vmem:[#allocation23_spill] sm:$0xff] }
 0x235   : > { %7796 = vmatprep.subr.mxu1 %v4665_v10  ;;  %7927 = vmatpush3.msra.mxu0 %v6792_v14  ;;  %v7749_v54 = vpop.f32.mrf.mxu0  ;;  %v4613_v4 = vmul.f32 0.1, %v4597_v52  ;;  %v3635_v21 = vadd.f32 %v10935_v18, %v3247_v61  ;;  %v4023_v48 = vadd.f32 %v10128_v31, %v3636_v0  ;;  %v10937_v31 = vld [vmem:[#allocation64_spill] sm:$0xff]  ;;  %v3638_v14 = vadd.f32 %v10938_v56, %v3250_v62  ;;  %v6788_v57 = vld [vmem:[%s10700_s8 + $0x190] sm:$0xff] }
 0x236   : > { %7797 = vmatpush3.msra.mxu1 %v4665_v10  ;;  %7928 = vmatprep.subr.mxu0 %v6791_v13  ;;  %v4568_v42 = vmax.f32 %v4556_v26, %v4557_v50  ;;  %4478 = vst.msk [vmem:[#allocation4 + $0xc8] sm:$0xff] %vm4452_vm0, %v4445_v5  ;;  %v4444_v19 = vadd.f32 %v9928_v51, %v4405_v24  ;;  %v6786_v61 = vld [vmem:[%s10700_s8 + $0x180] sm:$0xff] }
 0x237   : > { %v4408_v7 = vadd.f32 %v7749_v54, %v4021_v17  ;;  %7798 = vmatprep.subr.mxu1 %v4664_v3  ;;  %7929 = vmatpush3.msra.mxu0 %v6791_v13  ;;  %v4352_v11 = vpop.f32.mrf.mxu0  ;;  %v10186_v1 = vld [vmem:[#allocation3 + $0x31] sm:$0xff]  ;;  %v4621_v8 = vsel %vm4605_vm8, %v4597_v52, %v4613_v4  ;;  %v4505_v34 = vld [vmem:[#allocation4 + $0xa0] ss:$2 sm:$0xff]  ;;  %v4537_v58 = vld [vmem:[#allocation4 + $0xa1] ss:$2 sm:$0xff]  ;;  %v3249_v41 = vadd.f32 %v10937_v31, %v10936_v33  ;;  %v3985_v52 = vpop.f32.mrf.mxu1 }
 0x238   : > { %7799 = vmatpush3.msra.mxu1 %v4664_v3  ;;  %7930 = vmatprep.subr.mxu0 %v6790_v45  ;;  %v4583_v49 = vmul.f32 %v10003_v28, %v4568_v42  ;;  %4477 = vst.msk [vmem:[#allocation4 + $0xc0] sm:$0xff] %vm4452_vm0, %v4444_v19  ;;  %v4407_v22 = vadd.f32 %v4352_v11, %v4020_v37  ;;  %4651 = vst.msk [vmem:[#allocation3 + $0x41] sm:$0xff] %vm4452_vm0, %v4621_v8  ;;  %v10238_v4 = vld [vmem:[%s10700_s8 + $0x238] sm:$0xff] }
 0x239   : > { %v4447_v30 = vadd.f32 %v9928_v51, %v4408_v7  ;;  %7776 = vmatmul.mubr.msk.f32.gmra.mxu1 %vm4452_vm0, %v10186_v1  ;;  %7887 = vmatprep.mubr.msk.f32.mxu0 %vm4452_vm0, %v10186_v1  ;;  %v7752_v38 = vpop.f32.mrf.mxu0  ;;  %v4022_v25 = vadd.f32 %v3975_v9, %v3635_v21  ;;  %v3637_v44 = vadd.f32 %v9917_v12, %v3249_v41  ;;  %v6787_v9 = vld [vmem:[%s10700_s8 + $0x188] sm:$0xff] }
 0x23a   : > { %7812 = vmatprep.subr.mxu1 %v10181_v40  ;;  %v4598_v35 = vadd.f32 %v10017_v53, %v4583_v49  ;;  %v4446_v36 = vadd.f32 %v9928_v51, %v4407_v22  ;;  %v4410_v55 = vadd.f32 %v7752_v38, %v4023_v48  ;;  %7931 = vmatpush3.msra.mxu0 %v6790_v45 }
 0x23b   : > { %4480 = vst.msk [vmem:[#allocation4 + $0xd8] sm:$0xff] %vm4452_vm0, %v4447_v30  ;;  %v4025_v10 = vadd.f32 %v7705_v39, %v3638_v14  ;;  %v4558_v23 = vmax.f32 %v4505_v34, %v4537_v58  ;;  %v4507_v20 = vld [vmem:[#allocation4 + $0xb0] ss:$2 sm:$0xff]  ;;  %v4539_v16 = vld [vmem:[#allocation4 + $0xb1] ss:$2 sm:$0xff]  ;;  %v4362_v13 = vpop.f32.mrf.mxu0  ;;  %7932 = vmatprep.subr.mxu0 %v6789_v47  ;;  %v4024_v32 = vadd.f32 %v3985_v52, %v3637_v44  ;;  %v4656_v14 = vld [vmem:[#allocation3] sm:$0xff] }
 0x23c   : > { %v4559_v27 = vmax.f32 %v4507_v20, %v4539_v16  ;;  %4479 = vst.msk [vmem:[#allocation4 + $0xd0] sm:$0xff] %vm4452_vm0, %v4446_v36  ;;  %v4449_v2 = vadd.f32 %v9928_v51, %v4410_v55  ;;  %v4409_v17 = vadd.f32 %v4362_v13, %v4022_v25  ;;  %vm4606_vm9 = vcmp.gt.f32.partialorder %v4598_v35, 0.0  ;;  %7933 = vmatpush3.msra.mxu0 %v6789_v47  ;;  %v6727_v36 = vld [vmem:[%s10700_s8 + $0xa8] sm:$0xff]  ;;  %v10283_v55 = vld [vmem:[#allocation3 + $0x30] sm:$0xff]  ;;  %v6824_v16 = vld [vmem:[%s10700_s8 + $0x230] sm:$0xff] }
 0x23d   : > { %v7755_v12 = vpop.f32.mrf.mxu0  ;;  %v4614_v26 = vmul.f32 0.1, %v4598_v35  ;;  %7934 = vmatprep.subr.mxu0 %v6788_v57  ;;  %v6726_v44 = vld [vmem:[%s10700_s8 + $0xa0] sm:$0xff]  ;;  %v6723_v13 = vld [vmem:[%s10700_s8 + $0x88] sm:$0xff] }
 0x23e   : > { %v4569_v43 = vmax.f32 %v4558_v23, %v4559_v27  ;;  %4482 = vst.msk [vmem:[#allocation4 + $0xe8] sm:$0xff] %vm4452_vm0, %v4449_v2  ;;  %v4448_v15 = vadd.f32 %v9928_v51, %v4409_v17  ;;  %v4412_v3 = vadd.f32 %v7755_v12, %v4025_v10  ;;  %7935 = vmatpush3.msra.mxu0 %v6788_v57  ;;  %v6725_v10 = vld [vmem:[%s10700_s8 + $0x98] sm:$0xff]  ;;  %v6724_v23 = vld [vmem:[%s10700_s8 + $0x90] sm:$0xff]  ;;  %v6823_v27 = vld [vmem:[%s10700_s8 + $0x228] sm:$0xff] }
 0x23f   : > { %v4372_v50 = vpop.f32.mrf.mxu0  ;;  %v10219_v5 = vld [vmem:[#allocation3 + $0x41] sm:$0xff]  ;;  %v4622_v24 = vsel %vm4606_vm9, %v4598_v35, %v4614_v26  ;;  %7936 = vmatprep.subr.mxu0 %v6787_v9  ;;  %v10268_v35 = vld [vmem:[#allocation3 + $0x10] sm:$0xff] }
 0x240   : > { %v4584_v45 = vmul.f32 %v10003_v28, %v4569_v43  ;;  %4481 = vst.msk [vmem:[#allocation4 + $0xe0] sm:$0xff] %vm4452_vm0, %v4448_v15  ;;  %v4451_v59 = vadd.f32 %v9928_v51, %v4412_v3  ;;  %v4411_v29 = vadd.f32 %v4372_v50, %v4024_v32  ;;  %7778 = vmatprep.mubr.msk.f32.mxu1 %vm4452_vm0, %v10219_v5  ;;  %4652 = vst.msk [vmem:[#allocation3 + $0x51] sm:$0xff] %vm4452_vm0, %v4622_v24  ;;  %v4509_v60 = vld [vmem:[#allocation4 + $0xc0] ss:$2 sm:$0xff]  ;;  %v4541_v0 = vld [vmem:[#allocation4 + $0xc1] ss:$2 sm:$0xff] }
 0x241   : > { %7888 = vmatmul.mubr.msk.f32.gmra.mxu0 %vm4452_vm0, %v10219_v5  ;;  %v4560_v7 = vmax.f32 %v4509_v60, %v4541_v0  ;;  %v6722_v17 = vld [vmem:[%s10700_s8 + $0x80] sm:$0xff]  ;;  %v4947_v12 = vld [vmem:[#allocation3 + $0x2] sm:$0xff] }
 0x242   : > { %v4599_v37 = vadd.f32 %v10017_v53, %v4584_v45  ;;  %4484 = vst.msk [vmem:[#allocation4 + $0xf8] sm:$0xff] %vm4452_vm0, %v4451_v59  ;;  %v4450_v54 = vadd.f32 %v9928_v51, %v4411_v29  ;;  %7937 = vmatpush3.msra.mxu0 %v6787_v9  ;;  %v6822_v9 = vld [vmem:[%s10700_s8 + $0x220] sm:$0xff]  ;;  %v6745_v26 = vld [vmem:[%s10700_s8 + $0xf8] sm:$0xff]  ;;  %v6744_v15 = vld [vmem:[%s10700_s8 + $0xf0] sm:$0xff] }
 0x243   : > { %v4511_v42 = vld [vmem:[#allocation4 + $0xd0] ss:$2 sm:$0xff]  ;;  %v4543_v19 = vld [vmem:[#allocation4 + $0xd1] ss:$2 sm:$0xff]  ;;  %7938 = vmatprep.subr.mxu0 %v6786_v61  ;;  %v6821_v32 = vld [vmem:[%s10700_s8 + $0x218] sm:$0xff] }
 0x244   : > { %v4561_v63 = vmax.f32 %v4511_v42, %v4543_v19  ;;  %4483 = vst.msk [vmem:[#allocation4 + $0xf0] sm:$0xff] %vm4452_vm0, %v4450_v54  ;;  %vm4607_vm10 = vcmp.gt.f32.partialorder %v4599_v37, 0.0  ;;  %v4615_v46 = vmul.f32 0.1, %v4599_v37  ;;  %7939 = vmatpush3.msra.mxu0 %v6786_v61  ;;  %v10349_v43 = vld [vmem:[#allocation3 + $0x12] sm:$0xff]  ;;  %v10358_v3 = vld [vmem:[#allocation3 + $0x22] sm:$0xff] }
 0x245   : > { %7980 = vmatprep.subr.mxu0 %v10238_v4  ;;  %v6820_v50 = vld [vmem:[%s10700_s8 + $0x210] sm:$0xff]  ;;  %v6743_v45 = vld [vmem:[%s10700_s8 + $0xe8] sm:$0xff]  ;;  %v5571_v59 = vld [vmem:[#allocation3 + $0x90] sm:$0xff] }
 0x246   : > { %v4570_v62 = vmax.f32 %v4560_v7, %v4561_v63  ;;  %v4623_v51 = vsel %vm4607_vm10, %v4599_v37, %v4615_v46  ;;  %v6819_v29 = vld [vmem:[%s10700_s8 + $0x208] sm:$0xff]  ;;  %v6742_v60 = vld [vmem:[%s10700_s8 + $0xe0] sm:$0xff]  ;;  %v10383_v0 = vld [vmem:[#allocation3 + $0x42] sm:$0xff] }
 0x247   : > { %v10242_v18 = vld [vmem:[#allocation3 + $0x51] sm:$0xff]  ;;  %4653 = vst.msk [vmem:[#allocation3 + $0x61] sm:$0xff] %vm4452_vm0, %v4623_v51  ;;  %v4513_v39 = vld [vmem:[#allocation4 + $0xe0] ss:$2 sm:$0xff]  ;;  %v4545_v11 = vld [vmem:[#allocation4 + $0xe1] ss:$2 sm:$0xff] }
 0x248   : > { %v4585_v21 = vmul.f32 %v10003_v28, %v4570_v62  ;;  %7779 = vmatmul.mubr.msk.f32.gmra.mxu1 %vm4452_vm0, %v10242_v18  ;;  %7890 = vmatprep.mubr.msk.f32.mxu0 %vm4452_vm0, %v10242_v18  ;;  %v4562_v34 = vmax.f32 %v4513_v39, %v4545_v11  ;;  %v10303_v52 = vld [vmem:[#allocation3 + $0x50] sm:$0xff]  ;;  %v6741_v54 = vld [vmem:[%s10700_s8 + $0xd8] sm:$0xff]  ;;  %v6740_v42 = vld [vmem:[%s10700_s8 + $0xd0] sm:$0xff]  ;;  %v10939_v62 = vmov 0.0  }
 0x249   : > { %v10375_v61 = vld [vmem:[#allocation3 + $0x32] sm:$0xff]  ;;  %v6777_v51 = vld [vmem:[%s10700_s8 + $0x178] sm:$0xff] }
 0x24a   : > { %v4600_v8 = vadd.f32 %v10017_v53, %v4585_v21  ;;  %v6818_v37 = vld [vmem:[%s10700_s8 + $0x200] sm:$0xff]  ;;  %v6739_v7 = vld [vmem:[%s10700_s8 + $0xc8] sm:$0xff]  ;;  %v6776_v21 = vld [vmem:[%s10700_s8 + $0x170] sm:$0xff] }
 0x24b   : > { %v4515_v48 = vld [vmem:[#allocation4 + $0xf0] ss:$2 sm:$0xff]  ;;  %v4547_v49 = vld [vmem:[#allocation4 + $0xf1] ss:$2 sm:$0xff] }
 0x24c   : > { %v4563_v58 = vmax.f32 %v4515_v48, %v4547_v49  ;;  %vm4608_vm11 = vcmp.gt.f32.partialorder %v4600_v8, 0.0  ;;  %v4616_v30 = vmul.f32 0.1, %v4600_v8  ;;  %v6738_v46 = vld [vmem:[%s10700_s8 + $0xc0] sm:$0xff]  ;;  %v6775_v39 = vld [vmem:[%s10700_s8 + $0x168] sm:$0xff]  ;;  %v6773_v49 = vld [vmem:[%s10700_s8 + $0x158] sm:$0xff] }
 0x24d   : > { %v5879_v48 = vld [vmem:[#allocation3 + $0x92] sm:$0xff] }
 0x24e   : > { %v4571_v22 = vmax.f32 %v4562_v34, %v4563_v58  ;;  %v10251_v47 = vld [vmem:[#allocation3 + $0x61] sm:$0xff]  ;;  %v4624_v33 = vsel %vm4608_vm11, %v4600_v8, %v4616_v30  ;;  %v6774_v8 = vld [vmem:[%s10700_s8 + $0x160] sm:$0xff]  ;;  %v6771_v58 = vld [vmem:[%s10700_s8 + $0x148] sm:$0xff] }
 0x24f   : > { %7781 = vmatprep.mubr.msk.f32.mxu1 %vm4452_vm0, %v10251_v47  ;;  %7891 = vmatmul.mubr.msk.f32.gmra.mxu0 %vm4452_vm0, %v10251_v47  ;;  %4654 = vst.msk [vmem:[#allocation3 + $0x71] sm:$0xff] %vm4452_vm0, %v4624_v33  ;;  %v10312_v20 = vld [vmem:[#allocation3 + $0x60] sm:$0xff]  ;;  %v6770_v30 = vld [vmem:[%s10700_s8 + $0x140] sm:$0xff] }
 0x250   : > { %v4586_v31 = vmul.f32 %v10003_v28, %v4571_v22  ;;  %v6728_v28 = vld [vmem:[%s10700_s8 + $0xb0] sm:$0xff]  ;;  %v6809_v22 = vld [vmem:[%s10700_s8 + $0x1f8] sm:$0xff] }
 0x251   : > { %v10404_v19 = vld [vmem:[#allocation3 + $0x62] sm:$0xff] }
 0x252   : > { %v4601_v41 = vadd.f32 %v10017_v53, %v4586_v31  ;;  %v10275_v53 = vld [vmem:[#allocation3 + $0x20] sm:$0xff]  ;;  %v6807_v31 = vld [vmem:[%s10700_s8 + $0x1e8] sm:$0xff] }
 0x253   : > { %v6772_v34 = vld [vmem:[%s10700_s8 + $0x150] sm:$0xff] }
 0x254   : > { %vm4609_vm12 = vcmp.gt.f32.partialorder %v4601_v41, 0.0  ;;  %v4617_v56 = vmul.f32 0.1, %v4601_v41  ;;  %v6808_v33 = vld [vmem:[%s10700_s8 + $0x1f0] sm:$0xff] }
 0x256   : > { %v10260_v38 = vld [vmem:[#allocation3 + $0x71] sm:$0xff]  ;;  %v4625_v25 = vsel %vm4609_vm12, %v4601_v41, %v4617_v56  ;;  %v6805_v56 = vld [vmem:[%s10700_s8 + $0x1d8] sm:$0xff] }
 0x257   : > { %7782 = vmatmul.mubr.msk.f32.gmra.mxu1 %vm4452_vm0, %v10260_v38  ;;  %7893 = vmatprep.mubr.msk.f32.mxu0 %vm4452_vm0, %v10260_v38  ;;  %4655 = vst.msk [vmem:[#allocation3 + $0x81] sm:$0xff] %vm4452_vm0, %v4625_v25  ;;  %v10328_v2 = vld [vmem:[#allocation3 + $0x70] sm:$0xff]  ;;  %v6803_v25 = vld [vmem:[%s10700_s8 + $0x1c8] sm:$0xff] }
 0x258   : > { %7800 = vmatprep.mubr.msk.f32.mxu1 %vm4452_vm0, %v4656_v14  ;;  %v10413_v63 = vld [vmem:[#allocation3 + $0x72] sm:$0xff]  ;;  %v6804_v14 = vld [vmem:[%s10700_s8 + $0x1d0] sm:$0xff] }
 0x259   : > { %v6806_v41 = vld [vmem:[%s10700_s8 + $0x1e0] sm:$0xff] }
 0x25b   : > { %7801 = vmatmul.mubr.msk.f32.vlgmr.msra.gmra.mxu1 %vm4452_vm0, %v10268_v35 }
 0x25c   : > { %7813 = vmatpush3.msra.mxu1 %v10181_v40  ;;  %7803 = vmatprep.mubr.msk.f32.mxu1 %vm4452_vm0, %v10275_v53  ;;  %v10294_v40 = vld [vmem:[#allocation3 + $0x40] sm:$0xff] }
 0x25d   : > { %7814 = vmatprep.subr.mxu1 %v6728_v28 }
 0x25e   : > { %7815 = vmatpush3.msra.mxu1 %v6728_v28  ;;  %v10285_v57 = vld [vmem:[#allocation3 + $0x81] sm:$0xff] }
 0x25f   : > { %7816 = vmatprep.subr.mxu1 %v6727_v36  ;;  %7804 = vmatmul.mubr.msk.f32.gmra.mxu1 %vm4452_vm0, %v10283_v55  ;;  %v10365_v24 = vld [vmem:[#allocation3 + $0x80] sm:$0xff] }
 0x260   : > { %7817 = vmatpush3.msra.mxu1 %v6727_v36  ;;  %7894 = vmatmul.mubr.msk.f32.gmra.mxu0 %vm4452_vm0, %v10285_v57  ;;  %v5878_v11 = vld [vmem:[#allocation3 + $0x82] sm:$0xff] }
 0x261   : > { %7806 = vmatprep.mubr.msk.f32.mxu1 %vm4452_vm0, %v10294_v40  ;;  %7818 = vmatprep.subr.mxu1 %v6726_v44 }
 0x262   : > { %7940 = vmatprep.mubr.msk.f32.mxu0 %vm4452_vm0, %v10275_v53  ;;  %7819 = vmatpush3.msra.mxu1 %v6726_v44  ;;  %v6115_v44 = vld [vmem:[%s10704_s12] sm:$0xff] }
 0x263   : > { %7820 = vmatprep.subr.mxu1 %v6725_v10  ;;  %7807 = vmatmul.mubr.msk.f32.gmra.mxu1 %vm4452_vm0, %v10303_v52 }
 0x264   : > { %7821 = vmatpush3.msra.mxu1 %v6725_v10  ;;  %7941 = vmatmul.mubr.msk.f32.vlgmr.msra.gmra.mxu0 %vm4452_vm0, %v10283_v55 }
 0x265   : > { %7809 = vmatprep.mubr.msk.f32.mxu1 %vm4452_vm0, %v10312_v20  ;;  %7822 = vmatprep.subr.mxu1 %v6724_v23 }
 0x266   : > { %7943 = vmatprep.mubr.msk.f32.mxu0 %vm4452_vm0, %v10294_v40  ;;  %7981 = vmatpush3.msra.mxu0 %v10238_v4  ;;  %v10395_v4 = vld [vmem:[#allocation3 + $0x52] sm:$0xff] }
 0x267   : > { %7823 = vmatpush3.msra.mxu1 %v6724_v23  ;;  %7982 = vmatprep.subr.mxu0 %v6824_v16 }
 0x268   : > { %7824 = vmatprep.subr.mxu1 %v6723_v13  ;;  %7983 = vmatpush3.msra.mxu0 %v6824_v16 }
 0x269   : > { %7810 = vmatmul.mubr.msk.f32.gmra.mxu1 %vm4452_vm0, %v10328_v2  ;;  %7944 = vmatmul.mubr.msk.f32.gmra.mxu0 %vm4452_vm0, %v10303_v52 }
 0x26a   : > { %7825 = vmatpush3.msra.mxu1 %v6723_v13  ;;  %7984 = vmatprep.subr.mxu0 %v6823_v27 }
 0x26b   : > { %7826 = vmatprep.subr.mxu1 %v6722_v17  ;;  %7946 = vmatprep.mubr.msk.f32.mxu0 %vm4452_vm0, %v10312_v20 }
 0x26c   : > { %7985 = vmatpush3.msra.mxu0 %v6823_v27  ;;  %7827 = vmatpush3.msra.mxu1 %v6722_v17 }
 0x26d   : > { %7986 = vmatprep.subr.mxu0 %v6822_v9  ;;  %7828 = vmatprep.mubr.msk.f32.mxu1 %vm4452_vm0, %v4947_v12 }
 0x26e   : > { %7840 = vmatprep.subr.mxu1 %v6745_v26  ;;  %7987 = vmatpush3.msra.mxu0 %v6822_v9 }
 0x26f   : > { %7829 = vmatmul.mubr.msk.f32.vlgmr.msra.gmra.mxu1 %vm4452_vm0, %v10349_v43  ;;  %7947 = vmatmul.mubr.msk.f32.gmra.mxu0 %vm4452_vm0, %v10328_v2 }
 0x270   : > { %7841 = vmatpush3.msra.mxu1 %v6745_v26  ;;  %7988 = vmatprep.subr.mxu0 %v6821_v32 }
 0x271   : > { %7831 = vmatprep.mubr.msk.f32.mxu1 %vm4452_vm0, %v10358_v3  ;;  %7842 = vmatprep.subr.mxu1 %v6744_v15 }
 0x272   : > { %7949 = vmatprep.mubr.msk.f32.mxu0 %vm4452_vm0, %v10365_v24  ;;  %7989 = vmatpush3.msra.mxu0 %v6821_v32 }
 0x273   : > { %7843 = vmatpush3.msra.mxu1 %v6744_v15  ;;  %7990 = vmatprep.subr.mxu0 %v6820_v50 }
 0x274   : > { %7844 = vmatprep.subr.mxu1 %v6743_v45  ;;  %7991 = vmatpush3.msra.mxu0 %v6820_v50 }
 0x275   : > { %7832 = vmatmul.mubr.msk.f32.gmra.mxu1 %vm4452_vm0, %v10375_v61  ;;  %7950 = vmatmul.mubr.msk.f32.gmra.mxu0 %vm4452_vm0, %v5571_v59 }
 0x276   : > { %7845 = vmatpush3.msra.mxu1 %v6743_v45  ;;  %7992 = vmatprep.subr.mxu0 %v6819_v29 }
 0x277   : > { %7834 = vmatprep.mubr.msk.f32.mxu1 %vm4452_vm0, %v10383_v0  ;;  %7846 = vmatprep.subr.mxu1 %v6742_v60 }
 0x278   : > { %7993 = vmatpush3.msra.mxu0 %v6819_v29  ;;  %7996 = vmatprep.mubr.msk.f32.mxu0 %vm4452_vm0, %v10358_v3 }
 0x279   : > { %7847 = vmatpush3.msra.mxu1 %v6742_v60  ;;  %7994 = vmatprep.subr.mxu0 %v6818_v37 }
 0x27a   : > { %7848 = vmatprep.subr.mxu1 %v6741_v54  ;;  %7995 = vmatpush3.msra.mxu0 %v6818_v37 }
 0x27b   : > { %7835 = vmatmul.mubr.msk.f32.gmra.mxu1 %vm4452_vm0, %v10395_v4  ;;  %7997 = vmatmul.mubr.msk.f32.vlgmr.msra.gmra.mxu0 %vm4452_vm0, %v10375_v61 }
 0x27c   : > { %7849 = vmatpush3.msra.mxu1 %v6741_v54  ;;  %7837 = vmatprep.mubr.msk.f32.mxu1 %vm4452_vm0, %v10404_v19 }
 0x27d   : > { %7850 = vmatprep.subr.mxu1 %v6740_v42  ;;  %7999 = vmatprep.mubr.msk.f32.mxu0 %vm4452_vm0, %v10383_v0 }
 0x27e   : > { %7851 = vmatpush3.msra.mxu1 %v6740_v42  ;;  %8027 = vmatprep.subr.mxu0 %v10939_v62 }
 0x27f   : > { %7852 = vmatprep.subr.mxu1 %v6739_v7  ;;  %7838 = vmatmul.mubr.msk.f32.gmra.mxu1 %vm4452_vm0, %v10413_v63 }
 0x280   : > { %7853 = vmatpush3.msra.mxu1 %v6739_v7  ;;  %8000 = vmatmul.mubr.msk.f32.gmra.mxu0 %vm4452_vm0, %v10395_v4 }
 0x281   : > { %7854 = vmatprep.subr.mxu1 %v6738_v46  ;;  %7856 = vmatprep.mubr.msk.f32.mxu1 %vm4452_vm0, %v10268_v35  ;;  %v6802_v35 = vld [vmem:[%s10700_s8 + $0x1c0] sm:$0xff] }
 0x282   : > { %8002 = vmatprep.mubr.msk.f32.mxu0 %vm4452_vm0, %v10404_v19  ;;  %7855 = vmatpush3.msra.mxu1 %v6738_v46 }
 0x283   : > { %7896 = vmatprep.subr.mxu1 %v6777_v51  ;;  %7857 = vmatmul.mubr.msk.f32.vlgmr.msra.gmra.mxu1 %vm4452_vm0, %v10275_v53  ;;  %v6117_v53 = vld [vmem:[%s10704_s12 + $0x10] sm:$0xff] }
 0x284   : > { %7897 = vmatpush3.msra.mxu1 %v6777_v51  ;;  %8003 = vmatmul.mubr.msk.f32.gmra.mxu0 %vm4452_vm0, %v10413_v63 }
 0x285   : > { %7859 = vmatprep.mubr.msk.f32.mxu1 %vm4452_vm0, %v10283_v55  ;;  %7898 = vmatprep.subr.mxu1 %v6776_v21  ;;  %v6116_v55 = vld [vmem:[%s10704_s12 + $0x8] sm:$0xff] }
 0x286   : > { %8005 = vmatprep.mubr.msk.f32.mxu0 %vm4452_vm0, %v5878_v11  ;;  %7899 = vmatpush3.msra.mxu1 %v6776_v21 }
 0x287   : > { %7900 = vmatprep.subr.mxu1 %v6775_v39  ;;  %7860 = vmatmul.mubr.msk.f32.gmra.mxu1 %vm4452_vm0, %v10294_v40 }
 0x288   : > { %7901 = vmatpush3.msra.mxu1 %v6775_v39  ;;  %7862 = vmatprep.mubr.msk.f32.mxu1 %vm4452_vm0, %v10303_v52 }
 0x289   : > { %7902 = vmatprep.subr.mxu1 %v6774_v8  ;;  %8006 = vmatmul.mubr.msk.f32.gmra.mxu0 %vm4452_vm0, %v5879_v48 }
 0x28a   : > { %7903 = vmatpush3.msra.mxu1 %v6774_v8 }
 0x28b   : > { %7904 = vmatprep.subr.mxu1 %v6773_v49  ;;  %7863 = vmatmul.mubr.msk.f32.gmra.mxu1 %vm4452_vm0, %v10312_v20 }
 0x28c   : > { %7905 = vmatpush3.msra.mxu1 %v6773_v49  ;;  %7865 = vmatprep.mubr.msk.f32.mxu1 %vm4452_vm0, %v10328_v2 }
 0x28d   : > { %7906 = vmatprep.subr.mxu1 %v6772_v34 }
 0x28e   : > { %7907 = vmatpush3.msra.mxu1 %v6772_v34 }
 0x28f   : > { %7908 = vmatprep.subr.mxu1 %v6771_v58  ;;  %7866 = vmatmul.mubr.msk.f32.gmra.mxu1 %vm4452_vm0, %v10365_v24 }
 0x290   : > { %7909 = vmatpush3.msra.mxu1 %v6771_v58  ;;  %7912 = vmatprep.mubr.msk.f32.mxu1 %vm4452_vm0, %v10349_v43 }
 0x291   : > { %7910 = vmatprep.subr.mxu1 %v6770_v30 }
 0x292   : > { %7911 = vmatpush3.msra.mxu1 %v6770_v30 }
 0x293   : > { %7952 = vmatprep.subr.mxu1 %v6809_v22  ;;  %7913 = vmatmul.mubr.msk.f32.vlgmr.msra.gmra.mxu1 %vm4452_vm0, %v10358_v3 }
 0x294   : > { %7953 = vmatpush3.msra.mxu1 %v6809_v22  ;;  %7915 = vmatprep.mubr.msk.f32.mxu1 %vm4452_vm0, %v10375_v61 }
 0x295   : > { %7954 = vmatprep.subr.mxu1 %v6808_v33 }
 0x296   : > { %7955 = vmatpush3.msra.mxu1 %v6808_v33 }
 0x297   : > { %7956 = vmatprep.subr.mxu1 %v6807_v31  ;;  %7916 = vmatmul.mubr.msk.f32.gmra.mxu1 %vm4452_vm0, %v10383_v0 }
 0x298   : > { %7957 = vmatpush3.msra.mxu1 %v6807_v31  ;;  %7918 = vmatprep.mubr.msk.f32.mxu1 %vm4452_vm0, %v10395_v4 }
 0x299   : > { %7958 = vmatprep.subr.mxu1 %v6806_v41 }
 0x29a   : > { %7959 = vmatpush3.msra.mxu1 %v6806_v41 }
 0x29b   : > { %7960 = vmatprep.subr.mxu1 %v6805_v56  ;;  %7919 = vmatmul.mubr.msk.f32.gmra.mxu1 %vm4452_vm0, %v10404_v19 }
 0x29c   : > { %7961 = vmatpush3.msra.mxu1 %v6805_v56  ;;  %7921 = vmatprep.mubr.msk.f32.mxu1 %vm4452_vm0, %v10413_v63 }
 0x29d   : > { %7962 = vmatprep.subr.mxu1 %v6804_v14 }
 0x29e   : > { %7963 = vmatpush3.msra.mxu1 %v6804_v14 }
 0x29f   : > { %7964 = vmatprep.subr.mxu1 %v6803_v25  ;;  %7922 = vmatmul.mubr.msk.f32.gmra.mxu1 %vm4452_vm0, %v5878_v11 }
 0x2a0   : > { %7965 = vmatpush3.msra.mxu1 %v6803_v25  ;;  %7968 = vmatprep.mubr.msk.f32.mxu1 %vm4452_vm0, %v10130_v6  ;;  %v5725_v6 = vld [vmem:[#allocation3 + $0x91] sm:$0xff] }
 0x2a1   : > { %7966 = vmatprep.subr.mxu1 %v6802_v35 }
 0x2a2   : > { %7967 = vmatpush3.msra.mxu1 %v6802_v35 }
 0x2a3   : > { %7969 = vmatmul.mubr.msk.f32.vlgmr.msra.gmra.mxu1 %vm4452_vm0, %v10186_v1  ;;  %v6122_v1 = vld [vmem:[%s10704_s12 + $0x38] sm:$0xff] }
 0x2a4   : > { %7971 = vmatprep.mubr.msk.f32.mxu1 %vm4452_vm0, %v10219_v5  ;;  %v6121_v5 = vld [vmem:[%s10704_s12 + $0x30] sm:$0xff]  ;;  %8008 = vmatprep.subr.mxu1 %v6122_v1 }
 0x2a5   : > { %8009 = vmatpush3.msra.mxu1 %v6122_v1 }
 0x2a6   : > { %8010 = vmatprep.subr.mxu1 %v6121_v5 }
 0x2a7   : > { %7972 = vmatmul.mubr.msk.f32.gmra.mxu1 %vm4452_vm0, %v10242_v18  ;;  %v6120_v18 = vld [vmem:[%s10704_s12 + $0x28] sm:$0xff] }
 0x2a8   : > { %7974 = vmatprep.mubr.msk.f32.mxu1 %vm4452_vm0, %v10251_v47  ;;  %8011 = vmatpush3.msra.mxu1 %v6121_v5  ;;  %v6119_v47 = vld [vmem:[%s10704_s12 + $0x20] sm:$0xff] }
 0x2a9   : > { %8012 = vmatprep.subr.mxu1 %v6120_v18 }
 0x2aa   : > { %8013 = vmatpush3.msra.mxu1 %v6120_v18 }
 0x2ab   : > { %7975 = vmatmul.mubr.msk.f32.gmra.mxu1 %vm4452_vm0, %v10260_v38  ;;  %v6118_v38 = vld [vmem:[%s10704_s12 + $0x18] sm:$0xff]  ;;  %8014 = vmatprep.subr.mxu1 %v6119_v47 }
 0x2ac   : > { %7977 = vmatprep.mubr.msk.f32.mxu1 %vm4452_vm0, %v10285_v57  ;;  %8015 = vmatpush3.msra.mxu1 %v6119_v47 }
 0x2ad   : > { %8016 = vmatprep.subr.mxu1 %v6118_v38 }
 0x2ae   : > { %8017 = vmatpush3.msra.mxu1 %v6118_v38 }
 0x2af   : > { %7978 = vmatmul.mubr.msk.f32.gmra.mxu1 %vm4452_vm0, %v5725_v6  ;;  %8018 = vmatprep.subr.mxu1 %v6117_v53 }
 0x2b0   : > { %8019 = vmatpush3.msra.mxu1 %v6117_v53 }
 0x2b1   : > { %8020 = vmatprep.subr.mxu1 %v6116_v55 }
 0x2b2   : > { %8021 = vmatpush3.msra.mxu1 %v6116_v55 }
 0x2b3   : > { %8022 = vmatprep.subr.mxu1 %v6115_v44 }
 0x2b4   : > { %8023 = vmatpush3.msra.mxu1 %v6115_v44 }
 0x2e7   : > { %v7774_v28 = vpop.f32.mrf.mxu1 }
 0x2e9   : > { %v4779_v36 = vpop.f32.mrf.mxu1 }
 0x2f1   : > { %v7886_v27 = vpop.f32.mrf.mxu0 }
 0x2f3   : > { %v5362_v9 = vpop.f32.mrf.mxu0 }
 0x2f9   : > { %v7777_v57 = vpop.f32.mrf.mxu1 }
 0x2fb   : > { %v4789_v40 = vpop.f32.mrf.mxu1 }
 0x301   : > { %v10551_v26 = vpop.f32.mrf.mxu0 }
 0x303   : > { %v10553_v43 = vpop.f32.mrf.mxu0 }
 0x308   : > { %v7780_v10 = vpop.f32.mrf.mxu1 }
 0x30a   : > { %v4799_v52 = vpop.f32.mrf.mxu1 }
 0x30f   : > { %v10555_v3 = vpop.f32.mrf.mxu0 }
 0x311   : > { %v10557_v24 = vpop.f32.mrf.mxu0 }
 0x317   : > { %v10547_v23 = vpop.f32.mrf.mxu1 }
 0x319   : > { %v10549_v20 = vpop.f32.mrf.mxu1 }
 0x31b   : > { %v7802_v16 = vpop.f32.mrf.mxu1 }
 0x31c   : > { %v4914_v31 = vadd.f32 %v7802_v16, %v7774_v28 }
 0x31d   : > { %v4908_v13 = vpop.f32.mrf.mxu1 }
 0x31e   : > { %v4909_v14 = vadd.f32 %v4908_v13, %v4779_v36 }
 0x31f   : > { %v7805_v2 = vpop.f32.mrf.mxu1 }
 0x320   : > { %v10559_v59 = vpop.f32.mrf.mxu0  ;;  %v4924_v6 = vadd.f32 %v7805_v2, %v7777_v57 }
 0x321   : > { %v4918_v17 = vpop.f32.mrf.mxu1 }
 0x322   : > { %v10561_v61 = vpop.f32.mrf.mxu0  ;;  %v4919_v38 = vadd.f32 %v4918_v17, %v4789_v40 }
 0x323   : > { %v7808_v12 = vpop.f32.mrf.mxu1  ;;  %10940 = vst [vmem:[#allocation22_spill] sm:$0xff] %v10561_v61 }
 0x324   : > { %v7942_v37 = vpop.f32.mrf.mxu0  ;;  %v4934_v44 = vadd.f32 %v7808_v12, %v7780_v10 }
 0x325   : > { %v4928_v32 = vpop.f32.mrf.mxu1 }
 0x326   : > { %v10563_v4 = vpop.f32.mrf.mxu0  ;;  %v4929_v28 = vadd.f32 %v4928_v32, %v4799_v52 }
 0x329   : > { %v7811_v15 = vpop.f32.mrf.mxu1  ;;  %v10565_v7 = vpop.f32.mrf.mxu0 }
 0x32a   : > { %v4944_v57 = vadd.f32 %v7811_v15, %v10547_v23 }
 0x32b   : > { %v4938_v50 = vpop.f32.mrf.mxu1  ;;  %v10567_v51 = vpop.f32.mrf.mxu0 }
 0x32c   : > { %v4939_v10 = vadd.f32 %v4938_v50, %v10549_v20 }
 0x32f   : > { %v7830_v45 = vpop.f32.mrf.mxu1  ;;  %v10569_v11 = vpop.f32.mrf.mxu0 }
 0x330   : > { %10941 = vst [vmem:[#allocation12_spill] sm:$0xff] %v10569_v11  ;;  %v5094_v25 = vadd.f32 %v7830_v45, %v4914_v31 }
 0x331   : > { %v5054_v29 = vpop.f32.mrf.mxu1  ;;  %v10571_v49 = vpop.f32.mrf.mxu0 }
 0x332   : > { %10942 = vst [vmem:[#allocation16_spill] sm:$0xff] %v10571_v49  ;;  %v5093_v1 = vadd.f32 %v5054_v29, %v4909_v14 }
 0x335   : > { %v7833_v60 = vpop.f32.mrf.mxu1  ;;  %v10573_v30 = vpop.f32.mrf.mxu0 }
 0x336   : > { %10943 = vst [vmem:[#allocation25_spill] sm:$0xff] %v10573_v30  ;;  %v5096_v53 = vadd.f32 %v7833_v60, %v4924_v6 }
 0x337   : > { %v5064_v0 = vpop.f32.mrf.mxu1  ;;  %v10575_v41 = vpop.f32.mrf.mxu0 }
 0x338   : > { %10944 = vst [vmem:[#allocation24_spill] sm:$0xff] %v10575_v41  ;;  %v5095_v30 = vadd.f32 %v5064_v0, %v4919_v38 }
 0x33b   : > { %v7836_v54 = vpop.f32.mrf.mxu1  ;;  %v7998_v18 = vpop.f32.mrf.mxu0 }
 0x33c   : > { %v5098_v16 = vadd.f32 %v7836_v54, %v4934_v44 }
 0x33d   : > { %v5074_v42 = vpop.f32.mrf.mxu1  ;;  %v5979_v41 = vpop.f32.mrf.mxu0 }
 0x33e   : > { %v5097_v2 = vadd.f32 %v5074_v42, %v4929_v28  ;;  %v10948_v28 = vld [vmem:[#allocation25_spill] sm:$0xff] }
 0x33f   : > { %v7839_v19 = vpop.f32.mrf.mxu1 }
 0x340   : > { %v5100_v12 = vadd.f32 %v7839_v19, %v4944_v57  ;;  %v8001_v60 = vpop.f32.mrf.mxu0  ;;  %v6834_v19 = vld [vmem:[%s10701_s9] ss:$0 sm:$0xff] }
 0x341   : > { %v5084_v63 = vpop.f32.mrf.mxu1 }
 0x343   : > { %v7858_v46 = vpop.f32.mrf.mxu1 }
 0x344   : > { %v5248_v5 = vadd.f32 %v7858_v46, %v5094_v25 }
 0x345   : > { %v5208_v21 = vpop.f32.mrf.mxu1 }
 0x346   : > { %v5247_v55 = vadd.f32 %v5208_v21, %v5093_v1  ;;  %v5402_v11 = vadd.f32 %v7886_v27, %v5248_v5  ;;  %v5099_v21 = vadd.f32 %v5084_v63, %v4939_v10 }
 0x347   : > { %v7861_v39 = vpop.f32.mrf.mxu1 }
 0x348   : > { %v5250_v49 = vadd.f32 %v7861_v39, %v5096_v53  ;;  %v5401_v45 = vadd.f32 %v5362_v9, %v5247_v55 }
 0x349   : > { %v5218_v8 = vpop.f32.mrf.mxu1 }
 0x34a   : > { %v5249_v36 = vadd.f32 %v5218_v8, %v5095_v30  ;;  %v5404_v17 = vadd.f32 %v10551_v26, %v5250_v49  ;;  %v5989_v26 = vpop.f32.mrf.mxu0 }
 0x34b   : > { %v7864_v48 = vpop.f32.mrf.mxu1 }
 0x34c   : > { %v5252_v29 = vadd.f32 %v7864_v48, %v5098_v16  ;;  %v5403_v0 = vadd.f32 %v10553_v43, %v5249_v36 }
 0x34d   : > { %v5228_v34 = vpop.f32.mrf.mxu1 }
 0x34e   : > { %v5251_v27 = vadd.f32 %v5228_v34, %v5097_v2  ;;  %v5406_v23 = vadd.f32 %v10555_v3, %v5252_v29  ;;  %v10949_v29 = vld [vmem:[#allocation24_spill] sm:$0xff] }
 0x34f   : > { %v7867_v58 = vpop.f32.mrf.mxu1 }
 0x350   : > { %v5254_v9 = vadd.f32 %v7867_v58, %v5100_v12  ;;  %v5405_v50 = vadd.f32 %v10557_v24, %v5251_v27  ;;  %v10945_v24 = vld [vmem:[#allocation22_spill] sm:$0xff] }
 0x351   : > { %v5238_v22 = vpop.f32.mrf.mxu1 }
 0x352   : > { %v5253_v8 = vadd.f32 %v5238_v22, %v5099_v21  ;;  %v5408_v49 = vadd.f32 %v10559_v59, %v5254_v9  ;;  %v8004_v22 = vpop.f32.mrf.mxu0  ;;  %v10947_v59 = vld [vmem:[#allocation16_spill] sm:$0xff] }
 0x353   : > { %v7914_v33 = vpop.f32.mrf.mxu1 }
 0x354   : > { %v5556_v13 = vadd.f32 %v7914_v33, %v5402_v11  ;;  %v5407_v33 = vadd.f32 %v10945_v24, %v5253_v8  ;;  %v6836_v8 = vld [vmem:[%s10703_s11] ss:$0 sm:$0xff] }
 0x355   : > { %v5516_v56 = vpop.f32.mrf.mxu1 }
 0x356   : > { %v5555_v40 = vadd.f32 %v5516_v56, %v5401_v45  ;;  %v5711_v54 = vadd.f32 %v7942_v37, %v5556_v13  ;;  %v10946_v56 = vld [vmem:[#allocation12_spill] sm:$0xff] }
 0x357   : > { %v7917_v35 = vpop.f32.mrf.mxu1 }
 0x358   : > { %v5558_v32 = vadd.f32 %v7917_v35, %v5404_v17  ;;  %v5710_v11 = vadd.f32 %v10563_v4, %v5555_v40 }
 0x359   : > { %v5526_v47 = vpop.f32.mrf.mxu1 }
 0x35a   : > { %v5557_v42 = vadd.f32 %v5526_v47, %v5403_v0  ;;  %v5713_v48 = vadd.f32 %v10565_v7, %v5558_v32  ;;  %v5999_v47 = vpop.f32.mrf.mxu0 }
 0x35b   : > { %v7920_v62 = vpop.f32.mrf.mxu1 }
 0x35c   : > { %v5560_v20 = vadd.f32 %v7920_v62, %v5406_v23  ;;  %v5712_v62 = vadd.f32 %v10567_v51, %v5557_v42  ;;  %v8007_v13 = vpop.f32.mrf.mxu0 }
 0x35d   : > { %v5536_v61 = vpop.f32.mrf.mxu1 }
 0x35e   : > { %v5559_v3 = vadd.f32 %v5536_v61, %v5405_v50  ;;  %v5715_v14 = vadd.f32 %v10946_v56, %v5560_v20 }
 0x35f   : > { %v7923_v46 = vpop.f32.mrf.mxu1 }
 0x360   : > { %v5562_v25 = vadd.f32 %v7923_v46, %v5408_v49  ;;  %v5714_v1 = vadd.f32 %v10947_v59, %v5559_v3 }
 0x361   : > { %v5546_v52 = vpop.f32.mrf.mxu1 }
 0x362   : > { %v5561_v5 = vadd.f32 %v5546_v52, %v5407_v33  ;;  %v5717_v16 = vadd.f32 %v10948_v28, %v5562_v25  ;;  %v6009_v52 = vpop.f32.mrf.mxu0 }
 0x363   : > { %v7970_v15 = vpop.f32.mrf.mxu1 }
 0x364   : > { %v5865_v39 = vadd.f32 %v7970_v15, %v5711_v54  ;;  %v5716_v46 = vadd.f32 %v10949_v29, %v5561_v5  ;;  %v6835_v15 = vld [vmem:[%s10702_s10] ss:$0 sm:$0xff] }
 0x365   : > { %v5825_v43 = vpop.f32.mrf.mxu1  ;;  %v6229_v29 = vld [vmem:[%s10706_s14 + $0x20] sm:$0xff] }
 0x366   : > { %v6019_v37 = vadd.f32 %v7998_v18, %v5865_v39  ;;  %v5864_v63 = vadd.f32 %v5825_v43, %v5710_v11 }
 0x367   : > { %v7973_v34 = vpop.f32.mrf.mxu1 }
 0x368   : > { %v6034_v58 = vadd.f32 %v6834_v19, %v6019_v37  ;;  %v6018_v4 = vadd.f32 %v5979_v41, %v5864_v63  ;;  %v5867_v30 = vadd.f32 %v7973_v34, %v5713_v48  ;;  %v6084_v63 = vcombine.high %v6835_v15, %v6835_v15 }
 0x369   : > { %v5835_v31 = vpop.f32.mrf.mxu1 }
 0x36a   : > { %6042 = vst.msk [vmem:[#allocation4 + $0x10] sm:$0xff] %vm4452_vm0, %v6034_v58  ;;  %v6033_v35 = vadd.f32 %v6834_v19, %v6018_v4  ;;  %v6021_v7 = vadd.f32 %v8001_v60, %v5867_v30  ;;  %v5866_v61 = vadd.f32 %v5835_v31, %v5712_v62  ;;  %v6097_v58 = vcombine.high %v6836_v8, %v6836_v8 }
 0x36b   : > { %v7976_v6 = vpop.f32.mrf.mxu1 }
 0x36c   : > { %6041 = vst.msk [vmem:[#allocation4] sm:$0xff] %vm4452_vm0, %v6033_v35  ;;  %v6036_v41 = vadd.f32 %v6834_v19, %v6021_v7  ;;  %v6020_v51 = vadd.f32 %v5989_v26, %v5866_v61  ;;  %v5869_v18 = vadd.f32 %v7976_v6, %v5715_v14 }
 0x36d   : > { %v5845_v38 = vpop.f32.mrf.mxu1 }
 0x36e   : > { %6044 = vst.msk [vmem:[#allocation4 + $0x30] sm:$0xff] %vm4452_vm0, %v6036_v41  ;;  %v6035_v53 = vadd.f32 %v6834_v19, %v6020_v51  ;;  %v6023_v55 = vadd.f32 %v8004_v22, %v5869_v18  ;;  %v5868_v44 = vadd.f32 %v5845_v38, %v5714_v1 }
 0x36f   : > { %v7979_v36 = vpop.f32.mrf.mxu1 }
 0x370   : > { %6043 = vst.msk [vmem:[#allocation4 + $0x20] sm:$0xff] %vm4452_vm0, %v6035_v53  ;;  %v6038_v45 = vadd.f32 %v6834_v19, %v6023_v55  ;;  %v6022_v57 = vadd.f32 %v5999_v47, %v5868_v44  ;;  %v5871_v2 = vadd.f32 %v7979_v36, %v5717_v16 }
 0x371   : > { %v5855_v40 = vpop.f32.mrf.mxu1  ;;  %v6050_v17 = vld [vmem:[#allocation4 + $0x10] ss:$2 sm:$0xf]  ;;  %v6058_v10 = vld [vmem:[#allocation4 + $0x11] ss:$2 sm:$0xf] }
 0x372   : > { %6046 = vst.msk [vmem:[#allocation4 + $0x50] sm:$0xff] %vm4452_vm0, %v6038_v45  ;;  %v6037_v12 = vadd.f32 %v6834_v19, %v6022_v57  ;;  %v6025_v60 = vadd.f32 %v8007_v13, %v5871_v2  ;;  %v5870_v27 = vadd.f32 %v5855_v40, %v5716_v46  ;;  %v6066_v23 = vmax.f32 %v6050_v17, %v6058_v10  ;;  %v6232_v13 = vld [vmem:[%s10706_s14 + $0x38] sm:$0xff]  ;;  %v6231_v57 = vld [vmem:[%s10706_s14 + $0x30] sm:$0xff]  ;;  %v6230_v2 = vld [vmem:[%s10706_s14 + $0x28] sm:$0xff] }
 0x373   : > { %v6049_v32 = vld [vmem:[#allocation4] ss:$2 sm:$0xf]  ;;  %v6057_v0 = vld [vmem:[#allocation4 + $0x1] ss:$2 sm:$0xf]  ;;  %8028 = vmatpush3.msra.mxu0 %v6232_v13 }
 0x374   : > { %6045 = vst.msk [vmem:[#allocation4 + $0x40] sm:$0xff] %vm4452_vm0, %v6037_v12  ;;  %v6040_v54 = vadd.f32 %v6834_v19, %v6025_v60  ;;  %v6024_v21 = vadd.f32 %v6009_v52, %v5870_v27  ;;  %v6065_v9 = vmax.f32 %v6049_v32, %v6057_v0  ;;  %v10950_v45 = vmov 0.0   ;;  %v6228_v46 = vld [vmem:[%s10706_s14 + $0x18] sm:$0xff]  ;;  %v6227_v40 = vld [vmem:[%s10706_s14 + $0x10] sm:$0xff]  ;;  %v6226_v17 = vld [vmem:[%s10706_s14 + $0x8] sm:$0xff] }
 0x375   : > { %v6052_v42 = vld [vmem:[#allocation4 + $0x30] ss:$2 sm:$0xf]  ;;  %v6060_v39 = vld [vmem:[#allocation4 + $0x31] ss:$2 sm:$0xf]  ;;  %8029 = vmatprep.subr.mxu0 %v10950_v45  ;;  %8043 = vmatprep.mubr.msk.f32.mxu0 %vm8153_vm2, %v10950_v45 }
 0x376   : > { %6048 = vst.msk [vmem:[#allocation4 + $0x70] sm:$0xff] %vm4452_vm0, %v6040_v54  ;;  %v6039_v11 = vadd.f32 %v6834_v19, %v6024_v21  ;;  %v6073_v26 = vmax.f32 %v6065_v9, %v6066_v23  ;;  %v6068_v37 = vmax.f32 %v6052_v42, %v6060_v39  ;;  %8030 = vmatpush3.msra.mxu0 %v6231_v57  ;;  %v6225_v10 = vld [vmem:[%s10706_s14] sm:$0xff] }
 0x377   : > { %v6051_v20 = vld [vmem:[#allocation4 + $0x20] ss:$2 sm:$0xf]  ;;  %v6059_v50 = vld [vmem:[#allocation4 + $0x21] ss:$2 sm:$0xf]  ;;  %8031 = vmatprep.subr.mxu0 %v10950_v45 }
 0x378   : > { %6047 = vst.msk [vmem:[#allocation4 + $0x60] sm:$0xff] %vm4452_vm0, %v6039_v11  ;;  %v6067_v43 = vmax.f32 %v6051_v20, %v6059_v50  ;;  %v6086_v48 = vmul.f32 %v6835_v15, %v6073_v26  ;;  %8032 = vmatpush3.msra.mxu0 %v6230_v2  ;;  %v6837_v12 = vld [vmem:[%s10705_s13] ss:$0 sm:$0xff] }
 0x379   : > { %v6054_v3 = vld [vmem:[#allocation4 + $0x50] ss:$2 sm:$0xf]  ;;  %v6062_v49 = vld [vmem:[#allocation4 + $0x51] ss:$2 sm:$0xf]  ;;  %8033 = vmatprep.subr.mxu0 %v10950_v45 }
 0x37a   : > { %v6074_v34 = vmax.f32 %v6067_v43, %v6068_v37  ;;  %v6099_v4 = vadd.f32 %v6836_v8, %v6086_v48  ;;  %v6070_v22 = vmax.f32 %v6054_v3, %v6062_v49  ;;  %8034 = vmatpush3.msra.mxu0 %v6229_v29 }
 0x37b   : > { %v6053_v30 = vld [vmem:[#allocation4 + $0x40] ss:$2 sm:$0xf]  ;;  %v6061_v19 = vld [vmem:[#allocation4 + $0x41] ss:$2 sm:$0xf]  ;;  %8035 = vmatprep.subr.mxu0 %v10950_v45 }
 0x37c   : > { %v6069_v62 = vmax.f32 %v6053_v30, %v6061_v19  ;;  %v6087_v24 = vmul.f32 %v6084_v63, %v6074_v34  ;;  %vm6103_vm13 = vcmp.gt.f32.partialorder %v6099_v4, 0.0  ;;  %v6107_v25 = vmul.f32 0.1, %v6099_v4  ;;  %8036 = vmatpush3.msra.mxu0 %v6228_v46 }
 0x37d   : > { %v6056_v33 = vld [vmem:[#allocation4 + $0x70] ss:$2 sm:$0xf]  ;;  %v6064_v31 = vld [vmem:[#allocation4 + $0x71] ss:$2 sm:$0xf]  ;;  %8037 = vmatprep.subr.mxu0 %v10950_v45 }
 0x37e   : > { %v6075_v56 = vmax.f32 %v6069_v62, %v6070_v22  ;;  %v6100_v14 = vadd.f32 %v6097_v58, %v6087_v24  ;;  %v6072_v61 = vmax.f32 %v6056_v33, %v6064_v31  ;;  %v6111_v51 = vsel %vm6103_vm13, %v6099_v4, %v6107_v25  ;;  %8038 = vmatpush3.msra.mxu0 %v6227_v40 }
 0x37f   : > { %v6055_v35 = vld [vmem:[#allocation4 + $0x60] ss:$2 sm:$0xf]  ;;  %v6063_v7 = vld [vmem:[#allocation4 + $0x61] ss:$2 sm:$0xf]  ;;  %8039 = vmatprep.subr.mxu0 %v10950_v45 }
 0x380   : > { %v6071_v6 = vmax.f32 %v6055_v35, %v6063_v7  ;;  %v6088_v59 = vmul.f32 %v6835_v15, %v6075_v56  ;;  %vm6104_vm14 = vcmp.gt.f32.partialorder %v6100_v14, 0.0  ;;  %v6108_v1 = vmul.f32 0.1, %v6100_v14  ;;  %8040 = vmatpush3.msra.mxu0 %v6226_v17 }
 0x381   : > { %8041 = vmatprep.subr.mxu0 %v10950_v45 }
 0x382   : > { %v6076_v5 = vmax.f32 %v6071_v6, %v6072_v61  ;;  %v6101_v41 = vadd.f32 %v6836_v8, %v6088_v59  ;;  %v6112_v18 = vsel %vm6104_vm14, %v6100_v14, %v6108_v1  ;;  %8042 = vmatpush3.msra.mxu0 %v6225_v10  ;;  %v6233_v8 = vld [vmem:[%s10707_s15] sm:$0x1] }
 0x383   : > { %v6134_v47 = vcombine.low %v6111_v51, %v6112_v18 }
 0x384   : > { %v6089_v38 = vmul.f32 %v6084_v63, %v6076_v5  ;;  %v6109_v55 = vmul.f32 0.1, %v6101_v41  ;;  %vm6105_vm15 = vcmp.gt.f32.partialorder %v6101_v41, 0.0 }
 0x385   : > { %8024 = vmatprep.mubr.msk.f32.mxu1 %vm4452_vm0, %v6134_v47 }
 0x386   : > { %v6102_v53 = vadd.f32 %v6097_v58, %v6089_v38  ;;  %v6113_v28 = vsel %vm6105_vm15, %v6101_v41, %v6109_v55 }
 0x388   : > { %vm6106_vm1 = vcmp.gt.f32.partialorder %v6102_v53, 0.0  ;;  %v6110_v44 = vmul.f32 0.1, %v6102_v53 }
 0x38a   : > { %v6114_v16 = vsel %vm6106_vm1, %v6102_v53, %v6110_v44 }
 0x38b   : > { %v6135_v36 = vcombine.low %v6113_v28, %v6114_v16 }
 0x38d   : > { %8025 = vmatmul.mubr.msk.f32.vlgmr.msra.gmra.mxu1 %vm4452_vm0, %v6135_v36 }
 0x44d   : > { %v8026_v60 = vpop.f32.mrf.mxu1 }
 0x44e   : > { %v6212_v27 = vadd.f32 %v8026_v60, %v6837_v12 }
 0x44f   : > { %v6206_v52 = vpop.f32.mrf.mxu1 }
 0x450   : > { %v6207_v32 = vadd.f32 %v6837_v12, %v6206_v52  ;;  %v6216_v0 = vsel %vm4452_vm0, %v6212_v27, 0.0 }
 0x452   : > { %v6215_v54 = vsel %vm4452_vm0, %v6207_v32, 0.0 }
 0x453   : > { %v6217_v21 = vadd.f32 %v6216_v0, %v6215_v54 }
 0x455   : > { %v6218_v9 = vrot.slane %v6217_v21, 4 }
 0x457   : > { %v6219_v23 = vadd.f32 %v6218_v9, %v6217_v21 }
 0x459   : > { %v6220_v15 = vrot.slane %v6219_v23, 2 }
 0x45b   : > { %v6221_v42 = vadd.f32 %v6220_v15, %v6219_v23 }
 0x45d   : > { %v6222_v39 = vrot.slane %v6221_v42, 1 }
 0x45f   : > { %v6223_v11 = vadd.f32 %v6222_v39, %v6221_v42 }
 0x461   : > { %v6224_v26 = vmul.f32 0.0625, %v6223_v11 }
 0x463   : > { %8044 = vmatmul.mubr.msk.f32.vlgmr.msra.gmra.mxu0 %vm4452_vm0, %v6224_v26 }
 0x523   : > { %v6303_v20 = vpop.f32.mrf.mxu0 }
 0x524   : > { %v6304_v50 = vadd.f32 %v6303_v20, %v6233_v8 }
 0x525   : > { %v8045_v43 = vpop.f32.mrf.mxu0 }
 0x526   : > { %6308 = vst.msk [vmem:[%s528_s26] sm:$0x1] %vm6307_vm3, %v6304_v50 }
 0x527   : > { %8103 = shalt.err (!%p8100_p3)
}
 0x528   : > { %s8104_s20 = scalar_lea.hbm %s10657_s18, 16  ;;  %s8108_s30 = scalar_lea.hbm %s10708_s16, 32 }
 0x529   : > { %p8105_p4 = scmp.ne.s32.totalorder %s10657_s18, %s8104_s20  ;;  %p8109_p9 = scmp.lt.s32.totalorder %s10657_s18, %s10708_s16 }
 0x52a   : > { %p8110_p10 = scmp.lt.s32.totalorder %s8108_s30, %s8104_s20 }
 0x52b   : > { %p8106_p7 = pnand %p8105_p4, %p8278_p5 }
 0x52c   : > { %p8111_p11 = por %p8110_p10, %p8109_p9 }
 0x52d   : > { %p8107_p8 = pneg %p8106_p7 }
 0x52f   : > { %p8112_p12 = pnand %p8111_p11, %p8107_p8 }
 0x531   : > { %8115 = shalt.err (!%p8112_p12)
}
 0x532   : > { %8048 = dma.vmem_to_hbm [thread:$0]  (%p8278_p5), %s6323_s28, 16, %s10657_s18, %s6310_s1  }
 0x533 PF: > { %p8054_p13 = scmp.ge.s32.totalorder %s8150_s24, 2  ;;  %s6334_s2 = sand.u32 1, %s8138_s21  }
 0x534   : > { %s6335_s29 = scalar_lea.sflag [#allocation6], %s6334_s2 }
 0x535   : > { %p8051_p0 = pnand %p8054_p13, %p8282_p6 }
 0x537   : > { %p8052_p1 = pneg %p8051_p0 }
 0x539   : > { %8133 = dma.done.wait (%p8052_p1), %s6335_s29, 16  }
 0x53a   : > { %8135 = vsyncadd (%p8052_p1), %s6335_s29, 4294967280  ;;  %s10951_s24 = sld [smem:[#allocation9_spill]]  ;;  %s10954_s21 = smov %s8142_s22 }
 0x53b   : > { %s10952_s19 = sld [smem:[#allocation8_spill]] }
 0x53c   : > { %s10953_s23 = sld [smem:[#allocation10_spill]] }
 0x540   : > { %p26_p2 = scmp.ge.s32.totalorder %s10951_s24, 4  }
 0x541   : > { %s10955_s22 = smov %s10952_s19 }
 0x542   :  { %28 = sbr.rel (!%p26_p2) target bundleno = 7 (0x7), region = 173 }
 0x547   :  { %6339 = vsyncpa [#allocation6], 1 }
 0x548   :  { %6341 = vsyncpa [#allocation6 + $0x1], 1 }

</bundles_post_ra>
